<compile_context>
chip_gen: v7x
topology: tpu7x:2x2x1
jax: 0.10.0
libtpu: 0.0.40
codegen_flags: <defaults>
</compile_context>

<pallas_src>
import functools

import jax
import jax.numpy as jnp
from jax.experimental import pallas as pl
from jax.experimental.pallas import tpu as pltpu


EPS = 1e-5
VMEM_LIMIT = 32 * 1024 * 1024      # explicit scoped-VMEM cap (safe on v5e/v6e/v7x)


def _compiler_params(semantics):
    return pltpu.CompilerParams(dimension_semantics=semantics,
                                vmem_limit_bytes=VMEM_LIMIT)


def _largest_divisor_tile(rows, cap=512):
    """Largest multiple-of-8 tile <= cap that divides `rows` (else rows)."""
    t = min(cap, rows)
    for cand in range(t, 7, -1):
        if cand % 8 == 0 and rows % cand == 0:
            return cand
    return rows


# ---------------------------------------------------------------------------
# kernel 1: conv1 (in-kernel 9-tap GEMM accumulation) + partial BN1 stats
#   grid = (N,)  ["arbitrary": stats accumulate into a resident output block]
# ---------------------------------------------------------------------------
def _conv1_stats_kernel(xp_ref, w1_ref, pre1_ref, stats1_ref, *, hw):
    H, W = hw
    C = xp_ref.shape[-1]
    F = w1_ref.shape[-1]

    @pl.when(pl.program_id(0) == 0)
    def _():
        stats1_ref[...] = jnp.zeros_like(stats1_ref)

    acc = jnp.zeros((H * W, F), jnp.float32)
    for dy in range(3):
        for dx in range(3):
            tap = xp_ref[0, dy:dy + H, dx:dx + W, :].reshape(H * W, C)
            acc += jnp.dot(tap.astype(jnp.bfloat16), w1_ref[3 * dy + dx],
                           preferred_element_type=jnp.float32)

    pre1_ref[0] = acc.reshape(H, W, F).astype(pre1_ref.dtype)
    # per-channel partial sums for train-mode BN (no centered temporary)
    stats1_ref[0:1, :] += jnp.sum(acc, axis=0, keepdims=True)
    stats1_ref[1:2, :] += jnp.sum(acc * acc, axis=0, keepdims=True)


def _conv1_stats(xp, w1, hw):
    N, Hp, Wp, C = xp.shape
    H, W = hw
    F = w1.shape[-1]
    return pl.pallas_call(
        functools.partial(_conv1_stats_kernel, hw=hw),
        out_shape=(jax.ShapeDtypeStruct((N, H, W, F), jnp.float32),
                   jax.ShapeDtypeStruct((2, F), jnp.float32)),
        grid_spec=pltpu.PrefetchScalarGridSpec(
            num_scalar_prefetch=0,
            grid=(N,),
            in_specs=[
                pl.BlockSpec((1, Hp, Wp, C), lambda n: (n, 0, 0, 0)),
                pl.BlockSpec((9, C, F), lambda n: (0, 0, 0)),   # weights resident
            ],
            out_specs=[
                pl.BlockSpec((1, H, W, F), lambda n: (n, 0, 0, 0)),
                pl.BlockSpec((2, F), lambda n: (0, 0)),          # stats accumulator
            ],
        ),
        compiler_params=_compiler_params(("arbitrary",)),
    )(xp, w1)


# ---------------------------------------------------------------------------
# kernel 2: BN1-normalize+ReLU (fused) -> conv2 (9-tap GEMMs on a VMEM-padded
#           y1) + 1x1-shortcut GEMM + partial BN2/BNsc stats
#   grid = (N,)  ["arbitrary"]
# ---------------------------------------------------------------------------
def _conv2_shortcut_stats_kernel(pre1_ref, xp_ref, stats1_ref, pack_ref,
                                 w2_ref, wsc_ref,
                                 pre2_ref, presc_ref, stats2_ref,
                                 y1p_ref, *, hw, inv_count, eps):
    H, W = hw
    C = xp_ref.shape[-1]
    F = w2_ref.shape[-1]

    @pl.when(pl.program_id(0) == 0)
    def _():
        y1p_ref[...] = jnp.zeros_like(y1p_ref)      # zero halo once; interior
        stats2_ref[...] = jnp.zeros_like(stats2_ref)  # overwritten every step

    # BN1 (training-mode batch stats from kernel 1's global sums)
    s = stats1_ref[...]
    mean1 = s[0:1, :] * inv_count
    var1 = s[1:2, :] * inv_count - mean1 * mean1
    scale1 = jax.lax.rsqrt(var1 + eps) * pack_ref[0:1, :]
    shift1 = pack_ref[1:2, :]

    pre1 = pre1_ref[0].reshape(H * W, F)
    y1 = jnp.maximum((pre1 - mean1) * scale1 + shift1, 0.0)
    y1p_ref[1:H + 1, 1:W + 1, :] = y1.reshape(H, W, F)   # write interior of pad

    # conv2 as 9 accumulating GEMMs over the VMEM-padded y1
    acc2 = jnp.zeros((H * W, F), jnp.float32)
    for dy in range(3):
        for dx in range(3):
            tap = y1p_ref[dy:dy + H, dx:dx + W, :].reshape(H * W, F)
            acc2 += jnp.dot(tap.astype(jnp.bfloat16), w2_ref[3 * dy + dx],
                            preferred_element_type=jnp.float32)
    pre2_ref[0] = acc2.reshape(H, W, F).astype(pre2_ref.dtype)

    # 1x1 projection shortcut on the original input (interior of padded x)
    x_in = xp_ref[0, 1:H + 1, 1:W + 1, :].reshape(H * W, C)
    accsc = jnp.dot(x_in.astype(jnp.bfloat16), wsc_ref[...],
                    preferred_element_type=jnp.float32)
    presc_ref[0] = accsc.reshape(H, W, F).astype(presc_ref.dtype)

    # partial sums for BN2 and BN_sc
    stats2_ref[0:1, :] += jnp.sum(acc2, axis=0, keepdims=True)
    stats2_ref[1:2, :] += jnp.sum(acc2 * acc2, axis=0, keepdims=True)
    stats2_ref[2:3, :] += jnp.sum(accsc, axis=0, keepdims=True)
    stats2_ref[3:4, :] += jnp.sum(accsc * accsc, axis=0, keepdims=True)


def _conv2_shortcut_stats(pre1, xp, stats1, pack, w2, wsc, hw, inv_count, eps):
    N, H, W, F = pre1.shape
    Hp, Wp, C = xp.shape[1:]
    return pl.pallas_call(
        functools.partial(_conv2_shortcut_stats_kernel, hw=hw,
                          inv_count=inv_count, eps=eps),
        out_shape=(jax.ShapeDtypeStruct((N, H, W, F), jnp.float32),
                   jax.ShapeDtypeStruct((N, H, W, F), jnp.float32),
                   jax.ShapeDtypeStruct((4, F), jnp.float32)),
        grid_spec=pltpu.PrefetchScalarGridSpec(
            num_scalar_prefetch=0,
            grid=(N,),
            in_specs=[
                pl.BlockSpec((1, H, W, F), lambda n: (n, 0, 0, 0)),
                pl.BlockSpec((1, Hp, Wp, C), lambda n: (n, 0, 0, 0)),
                pl.BlockSpec((2, F), lambda n: (0, 0)),
                pl.BlockSpec((8, F), lambda n: (0, 0)),          # packed BN params
                pl.BlockSpec((9, F, F), lambda n: (0, 0, 0)),
                pl.BlockSpec((C, F), lambda n: (0, 0)),
            ],
            out_specs=[
                pl.BlockSpec((1, H, W, F), lambda n: (n, 0, 0, 0)),
                pl.BlockSpec((1, H, W, F), lambda n: (n, 0, 0, 0)),
                pl.BlockSpec((4, F), lambda n: (0, 0)),
            ],
            scratch_shapes=[pltpu.VMEM((Hp, Wp, F), jnp.float32)],  # padded y1
        ),
        compiler_params=_compiler_params(("arbitrary",)),
    )(pre1, xp, stats1, pack, w2, wsc)


# ---------------------------------------------------------------------------
# kernel 3: BN2(pre2) + BNsc(presc) + add + ReLU, row-tiled & lane-folded
#   grid = (R2 // tile_r,)  ["parallel": shards across TensorCores]
# ---------------------------------------------------------------------------
def _normalize_add_relu_kernel(pre2_ref, presc_ref, stats_ref, pack_ref,
                               out_ref, *, inv_count, eps):
    s = stats_ref[...]
    m2 = s[0:1, :] * inv_count
    v2 = s[1:2, :] * inv_count - m2 * m2
    msc = s[2:3, :] * inv_count
    vsc = s[3:4, :] * inv_count - msc * msc
    scale2 = jax.lax.rsqrt(v2 + eps) * pack_ref[2:3, :]
    scalesc = jax.lax.rsqrt(vsc + eps) * pack_ref[4:5, :]
    y2 = (pre2_ref[...] - m2) * scale2 + pack_ref[3:4, :]
    ysc = (presc_ref[...] - msc) * scalesc + pack_ref[5:6, :]
    out_ref[...] = jnp.maximum(y2 + ysc, 0.0).astype(out_ref.dtype)


def _normalize_add_relu(pre2_2d, presc_2d, stats2_t, pack_t, tile_r,
                        inv_count, eps):
    R2, L = pre2_2d.shape
    return pl.pallas_call(
        functools.partial(_normalize_add_relu_kernel,
                          inv_count=inv_count, eps=eps),
        out_shape=jax.ShapeDtypeStruct((R2, L), jnp.float32),
        grid_spec=pltpu.PrefetchScalarGridSpec(
            num_scalar_prefetch=0,
            grid=(R2 // tile_r,),
            in_specs=[
                pl.BlockSpec((tile_r, L), lambda i: (i, 0)),
                pl.BlockSpec((tile_r, L), lambda i: (i, 0)),
                pl.BlockSpec((4, L), lambda i: (0, 0)),
                pl.BlockSpec((8, L), lambda i: (0, 0)),
            ],
            out_specs=pl.BlockSpec((tile_r, L), lambda i: (i, 0)),
        ),
        compiler_params=_compiler_params(("parallel",)),
    )(pre2_2d, presc_2d, stats2_t, pack_t)


# ---------------------------------------------------------------------------
# parameters + forward
# ---------------------------------------------------------------------------
def init_params(key, first_num_filters, filters):
    ks = jax.random.split(key, 10)
    cin, f = first_num_filters, filters

    def uni(k, shape, fan_in):
        bound = 1.0 / float(jnp.sqrt(jnp.float32(fan_in)))
        return jax.random.uniform(k, shape, jnp.float32, -bound, bound)

    return dict(
        # conv weights stored HWIO; biases kept only for the reference (the
        # Pallas path drops them: BN cancels a per-channel pre-BN bias).
        w1=uni(ks[0], (3, 3, cin, f), 9 * cin),
        b1=uni(ks[1], (f,), 9 * cin),
        w2=uni(ks[2], (3, 3, f, f), 9 * f),
        b2=uni(ks[3], (f,), 9 * f),
        wsc=uni(ks[4], (cin, f), cin),               # 1x1 conv, bias=False
        # BN affine params perturbed so the check exercises scale/shift.
        g1=1.0 + 0.1 * jax.random.normal(ks[5], (f,), jnp.float32),
        be1=0.1 * jax.random.normal(ks[6], (f,), jnp.float32),
        g2=1.0 + 0.1 * jax.random.normal(ks[7], (f,), jnp.float32),
        be2=0.1 * jax.random.normal(ks[8], (f,), jnp.float32),
        gsc=1.0 + 0.1 * jax.random.normal(ks[9], (f,), jnp.float32),
        besc=jnp.zeros((f,), jnp.float32),
    )


@jax.jit
def standard_block_forward(params, x_nchw):
    N, C, H, W = x_nchw.shape
    F = params["g1"].shape[0]
    R = N * H * W
    inv_count = 1.0 / float(R)

    x = jnp.transpose(x_nchw, (0, 2, 3, 1)).astype(jnp.float32)   # NHWC
    xp = jnp.pad(x, ((0, 0), (1, 1), (1, 1), (0, 0)))             # 1-px halo

    # bf16 weights (MXU throughput); tap index t = 3*dy + dx matches kernels.
    w1 = params["w1"].reshape(9, C, F).astype(jnp.bfloat16)
    w2 = params["w2"].reshape(9, F, F).astype(jnp.bfloat16)
    wsc = params["wsc"].astype(jnp.bfloat16)

    zf = jnp.zeros((F,), jnp.float32)
    pack = jnp.stack([params["g1"], params["be1"],
                      params["g2"], params["be2"],
                      params["gsc"], params["besc"], zf, zf],
                     axis=0).astype(jnp.float32)                  # (8, F)

    # pass 1: conv1 + BN1 partial sums
    pre1, stats1 = _conv1_stats(xp, w1, (H, W))

    # pass 2: BN1+ReLU (fused), conv2, 1x1 shortcut, BN2/BNsc partial sums
    pre2, presc, stats2 = _conv2_shortcut_stats(
        pre1, xp, stats1, pack, w2, wsc, (H, W), inv_count, EPS)

    # pass 3: normalize + residual add + ReLU (lane-dense, row-tiled, parallel)
    fold = 1
    if F < 128 and 128 % F == 0 and R % (128 // F) == 0:
        fold = 128 // F
    L = F * fold
    R2 = R // fold
    pre2_2d = pre2.reshape(R2, L)
    presc_2d = presc.reshape(R2, L)
    stats2_t = jnp.tile(stats2, (1, fold))
    pack_t = jnp.tile(pack, (1, fold))
    tile_r = _largest_divisor_tile(R2)
    out2d = _normalize_add_relu(pre2_2d, presc_2d, stats2_t, pack_t,
                                tile_r, inv_count, EPS)

    out = out2d.reshape(N, H, W, F)
    return jnp.transpose(out, (0, 3, 1, 2))


class StandardBlock:
    """Pallas port of ResNet/Block.py::standard_block (forward pass only)."""

    def __init__(self, filters, projection_shortcut, strides,
                 first_num_filters, key):
        # `projection_shortcut` accepted for signature parity but (exactly like
        # the PyTorch module) ignored: the block always applies its own
        # 1x1-conv + BN shortcut.
        if strides != 1:
            raise ValueError(
                "padding='same' requires stride 1 (PyTorch raises too)")
        self.params = init_params(key, first_num_filters, filters)

    def __call__(self, x_nchw):
        return standard_block_forward(self.params, x_nchw)


# ---------------------------------------------------------------------------
# pure-JAX reference.  Matches the kernel's mixed precision (bf16 matmul
# operands, f32 accumulation) but KEEPS the conv biases, which validates the
# bn(x + b) == bn(x) cancellation the kernel exploits.
# ---------------------------------------------------------------------------
def reference_forward(params, x_nchw, eps=EPS):
    x = jnp.transpose(x_nchw, (0, 2, 3, 1)).astype(jnp.float32)

    def conv3(xx, w_hwio, b):
        y = jax.lax.conv_general_dilated(
            xx.astype(jnp.bfloat16), w_hwio.astype(jnp.bfloat16),
            window_strides=(1, 1), padding="SAME",
            dimension_numbers=("NHWC", "HWIO", "NHWC"),
            preferred_element_type=jnp.float32)
        return y + b

    def bn(xx, g, bt):
        m = jnp.mean(xx, axis=(0, 1, 2), keepdims=True)
        v = jnp.var(xx, axis=(0, 1, 2), keepdims=True)   # biased (train mode)
        return (xx - m) * jax.lax.rsqrt(v + eps) * g + bt

    y = jnp.maximum(bn(conv3(x, params["w1"], params["b1"]),
                       params["g1"], params["be1"]), 0.0)
    y = bn(conv3(y, params["w2"], params["b2"]), params["g2"], params["be2"])
    sc = bn(jnp.einsum("nhwc,cf->nhwf",
                       x.astype(jnp.bfloat16), params["wsc"].astype(jnp.bfloat16),
                       preferred_element_type=jnp.float32),
            params["gsc"], params["besc"])
    return jnp.transpose(jnp.maximum(y + sc, 0.0), (0, 3, 1, 2))


if __name__ == "__main__":
    key = jax.random.PRNGKey(0)
    kx, kp = jax.random.split(key)

    N, CIN, H, W = 2, 4, 16, 16
    FILTERS = 8

    x = jax.random.normal(kx, (N, CIN, H, W), jnp.float32)
    block = StandardBlock(filters=FILTERS, projection_shortcut=None,
                          strides=1, first_num_filters=CIN, key=kp)

    out = jax.block_until_ready(block(x))
    assert out.shape == (N, FILTERS, H, W)

    ref = reference_forward(block.params, x)
    max_err = float(jnp.max(jnp.abs(out - ref)))
    assert jnp.allclose(out, ref, rtol=2e-2, atol=2e-2), \
        f"mismatch vs reference: max abs err {max_err}"

    print("KERNEL_OK")
</pallas_src>

<mosaic_0001>
module attributes {stable_mosaic.version = 11 : i64} {
  func.func @_conv1_stats_kernel(%arg0: i32, %arg1: memref<1x18x18x4xf32, #tpu.memory_space<vmem>>, %arg2: memref<9x4x8xbf16, #tpu.memory_space<vmem>>, %arg3: memref<1x16x16x8xf32, #tpu.memory_space<vmem>>, %arg4: memref<2x8xf32, #tpu.memory_space<vmem>>) attributes {dimension_semantics = [#tpu.dimension_semantics<arbitrary>], iteration_bounds = array<i64: 2>, scalar_prefetch = 0 : i64, scratch_operands = 0 : i64, tpu.core_type = #tpu.core_type<tc>, window_params = [{transform_indices = @transform_0, window_bounds = array<i64: 1, 18, 18, 4>}, {pipeline_mode = #tpu.pipeline_mode<synchronous>, transform_indices = @transform_1, window_bounds = array<i64: 9, 4, 8>}, {transform_indices = @transform_2, window_bounds = array<i64: 1, 16, 16, 8>}, {pipeline_mode = #tpu.pipeline_mode<synchronous>, transform_indices = @transform_3, window_bounds = array<i64: 2, 8>}]} {
    %c0_i32 = arith.constant 0 : i32
    %0 = arith.cmpi eq, %arg0, %c0_i32 : i32
    %1 = arith.extui %0 : i1 to i32
    %c0_i32_0 = arith.constant 0 : i32
    %2 = arith.cmpi ne, %1, %c0_i32_0 : i32
    scf.if %2 {
      %cst_78 = arith.constant 0.000000e+00 : f32
      %91 = vector.broadcast %cst_78 : f32 to vector<2x8xf32>
      %c0_79 = arith.constant 0 : index
      %c0_80 = arith.constant 0 : index
      %92 = vector.load %arg4[%c0_79, %c0_80] : memref<2x8xf32, #tpu.memory_space<vmem>>, vector<2x8xf32>
      tpu.vector_store %arg4[%c0_79, %c0_80], %91 {strides = array<i32>} : memref<2x8xf32, #tpu.memory_space<vmem>>, vector<2x8xf32>,
    } else {
    }
    %cst = arith.constant 0.000000e+00 : f32
    %3 = vector.broadcast %cst : f32 to vector<256x8xf32>
    %c0 = arith.constant 0 : index
    %c0_1 = arith.constant 0 : index
    %c0_2 = arith.constant 0 : index
    %c0_3 = arith.constant 0 : index
    %4 = vector.load %arg1[%c0, %c0_1, %c0_2, %c0_3] : memref<1x18x18x4xf32, #tpu.memory_space<vmem>>, vector<1x16x16x4xf32>
    %5 = vector.shape_cast %4 : vector<1x16x16x4xf32> to vector<16x16x4xf32>
    %6 = vector.shape_cast %5 : vector<16x16x4xf32> to vector<256x4xf32>
    %7 = arith.truncf %6 : vector<256x4xf32> to vector<256x4xbf16>
    %c0_4 = arith.constant 0 : index
    %c0_5 = arith.constant 0 : index
    %c0_6 = arith.constant 0 : index
    %8 = vector.load %arg2[%c0_4, %c0_5, %c0_6] : memref<9x4x8xbf16, #tpu.memory_space<vmem>>, vector<1x4x8xbf16>
    %9 = vector.shape_cast %8 : vector<1x4x8xbf16> to vector<4x8xbf16>
    %cst_7 = arith.constant dense<0.000000e+00> : vector<256x8xf32>
    %10 = tpu.matmul %7, %9, %cst_7 {dimension_numbers = #tpu.dot_dimension_numbers<[1], [0], [0], [1], [0, 0, 1, 1], [], []>} : vector<256x4xbf16>, vector<4x8xbf16>, vector<256x8xf32> -> vector<256x8xf32>
    %11 = arith.addf %3, %10 : vector<256x8xf32>
    %c0_8 = arith.constant 0 : index
    %c0_9 = arith.constant 0 : index
    %c1 = arith.constant 1 : index
    %c0_10 = arith.constant 0 : index
    %12 = vector.load %arg1[%c0_8, %c0_9, %c1, %c0_10] : memref<1x18x18x4xf32, #tpu.memory_space<vmem>>, vector<1x16x16x4xf32>
    %13 = vector.shape_cast %12 : vector<1x16x16x4xf32> to vector<16x16x4xf32>
    %14 = vector.shape_cast %13 : vector<16x16x4xf32> to vector<256x4xf32>
    %15 = arith.truncf %14 : vector<256x4xf32> to vector<256x4xbf16>
    %c1_11 = arith.constant 1 : index
    %c0_12 = arith.constant 0 : index
    %c0_13 = arith.constant 0 : index
    %16 = vector.load %arg2[%c1_11, %c0_12, %c0_13] : memref<9x4x8xbf16, #tpu.memory_space<vmem>>, vector<1x4x8xbf16>
    %17 = vector.shape_cast %16 : vector<1x4x8xbf16> to vector<4x8xbf16>
    %cst_14 = arith.constant dense<0.000000e+00> : vector<256x8xf32>
    %18 = tpu.matmul %15, %17, %cst_14 {dimension_numbers = #tpu.dot_dimension_numbers<[1], [0], [0], [1], [0, 0, 1, 1], [], []>} : vector<256x4xbf16>, vector<4x8xbf16>, vector<256x8xf32> -> vector<256x8xf32>
    %19 = arith.addf %11, %18 : vector<256x8xf32>
    %c0_15 = arith.constant 0 : index
    %c0_16 = arith.constant 0 : index
    %c2 = arith.constant 2 : index
    %c0_17 = arith.constant 0 : index
    %20 = vector.load %arg1[%c0_15, %c0_16, %c2, %c0_17] : memref<1x18x18x4xf32, #tpu.memory_space<vmem>>, vector<1x16x16x4xf32>
    %21 = vector.shape_cast %20 : vector<1x16x16x4xf32> to vector<16x16x4xf32>
    %22 = vector.shape_cast %21 : vector<16x16x4xf32> to vector<256x4xf32>
    %23 = arith.truncf %22 : vector<256x4xf32> to vector<256x4xbf16>
    %c2_18 = arith.constant 2 : index
    %c0_19 = arith.constant 0 : index
    %c0_20 = arith.constant 0 : index
    %24 = vector.load %arg2[%c2_18, %c0_19, %c0_20] : memref<9x4x8xbf16, #tpu.memory_space<vmem>>, vector<1x4x8xbf16>
    %25 = vector.shape_cast %24 : vector<1x4x8xbf16> to vector<4x8xbf16>
    %cst_21 = arith.constant dense<0.000000e+00> : vector<256x8xf32>
    %26 = tpu.matmul %23, %25, %cst_21 {dimension_numbers = #tpu.dot_dimension_numbers<[1], [0], [0], [1], [0, 0, 1, 1], [], []>} : vector<256x4xbf16>, vector<4x8xbf16>, vector<256x8xf32> -> vector<256x8xf32>
    %27 = arith.addf %19, %26 : vector<256x8xf32>
    %c0_22 = arith.constant 0 : index
    %c1_23 = arith.constant 1 : index
    %c0_24 = arith.constant 0 : index
    %c0_25 = arith.constant 0 : index
    %28 = vector.load %arg1[%c0_22, %c1_23, %c0_24, %c0_25] : memref<1x18x18x4xf32, #tpu.memory_space<vmem>>, vector<1x16x16x4xf32>
    %29 = vector.shape_cast %28 : vector<1x16x16x4xf32> to vector<16x16x4xf32>
    %30 = vector.shape_cast %29 : vector<16x16x4xf32> to vector<256x4xf32>
    %31 = arith.truncf %30 : vector<256x4xf32> to vector<256x4xbf16>
    %c3 = arith.constant 3 : index
    %c0_26 = arith.constant 0 : index
    %c0_27 = arith.constant 0 : index
    %32 = vector.load %arg2[%c3, %c0_26, %c0_27] : memref<9x4x8xbf16, #tpu.memory_space<vmem>>, vector<1x4x8xbf16>
    %33 = vector.shape_cast %32 : vector<1x4x8xbf16> to vector<4x8xbf16>
    %cst_28 = arith.constant dense<0.000000e+00> : vector<256x8xf32>
    %34 = tpu.matmul %31, %33, %cst_28 {dimension_numbers = #tpu.dot_dimension_numbers<[1], [0], [0], [1], [0, 0, 1, 1], [], []>} : vector<256x4xbf16>, vector<4x8xbf16>, vector<256x8xf32> -> vector<256x8xf32>
    %35 = arith.addf %27, %34 : vector<256x8xf32>
    %c0_29 = arith.constant 0 : index
    %c1_30 = arith.constant 1 : index
    %c1_31 = arith.constant 1 : index
    %c0_32 = arith.constant 0 : index
    %36 = vector.load %arg1[%c0_29, %c1_30, %c1_31, %c0_32] : memref<1x18x18x4xf32, #tpu.memory_space<vmem>>, vector<1x16x16x4xf32>
    %37 = vector.shape_cast %36 : vector<1x16x16x4xf32> to vector<16x16x4xf32>
    %38 = vector.shape_cast %37 : vector<16x16x4xf32> to vector<256x4xf32>
    %39 = arith.truncf %38 : vector<256x4xf32> to vector<256x4xbf16>
    %c4 = arith.constant 4 : index
    %c0_33 = arith.constant 0 : index
    %c0_34 = arith.constant 0 : index
    %40 = vector.load %arg2[%c4, %c0_33, %c0_34] : memref<9x4x8xbf16, #tpu.memory_space<vmem>>, vector<1x4x8xbf16>
    %41 = vector.shape_cast %40 : vector<1x4x8xbf16> to vector<4x8xbf16>
    %cst_35 = arith.constant dense<0.000000e+00> : vector<256x8xf32>
    %42 = tpu.matmul %39, %41, %cst_35 {dimension_numbers = #tpu.dot_dimension_numbers<[1], [0], [0], [1], [0, 0, 1, 1], [], []>} : vector<256x4xbf16>, vector<4x8xbf16>, vector<256x8xf32> -> vector<256x8xf32>
    %43 = arith.addf %35, %42 : vector<256x8xf32>
    %c0_36 = arith.constant 0 : index
    %c1_37 = arith.constant 1 : index
    %c2_38 = arith.constant 2 : index
    %c0_39 = arith.constant 0 : index
    %44 = vector.load %arg1[%c0_36, %c1_37, %c2_38, %c0_39] : memref<1x18x18x4xf32, #tpu.memory_space<vmem>>, vector<1x16x16x4xf32>
    %45 = vector.shape_cast %44 : vector<1x16x16x4xf32> to vector<16x16x4xf32>
    %46 = vector.shape_cast %45 : vector<16x16x4xf32> to vector<256x4xf32>
    %47 = arith.truncf %46 : vector<256x4xf32> to vector<256x4xbf16>
    %c5 = arith.constant 5 : index
    %c0_40 = arith.constant 0 : index
    %c0_41 = arith.constant 0 : index
    %48 = vector.load %arg2[%c5, %c0_40, %c0_41] : memref<9x4x8xbf16, #tpu.memory_space<vmem>>, vector<1x4x8xbf16>
    %49 = vector.shape_cast %48 : vector<1x4x8xbf16> to vector<4x8xbf16>
    %cst_42 = arith.constant dense<0.000000e+00> : vector<256x8xf32>
    %50 = tpu.matmul %47, %49, %cst_42 {dimension_numbers = #tpu.dot_dimension_numbers<[1], [0], [0], [1], [0, 0, 1, 1], [], []>} : vector<256x4xbf16>, vector<4x8xbf16>, vector<256x8xf32> -> vector<256x8xf32>
    %51 = arith.addf %43, %50 : vector<256x8xf32>
    %c0_43 = arith.constant 0 : index
    %c2_44 = arith.constant 2 : index
    %c0_45 = arith.constant 0 : index
    %c0_46 = arith.constant 0 : index
    %52 = vector.load %arg1[%c0_43, %c2_44, %c0_45, %c0_46] : memref<1x18x18x4xf32, #tpu.memory_space<vmem>>, vector<1x16x16x4xf32>
    %53 = vector.shape_cast %52 : vector<1x16x16x4xf32> to vector<16x16x4xf32>
    %54 = vector.shape_cast %53 : vector<16x16x4xf32> to vector<256x4xf32>
    %55 = arith.truncf %54 : vector<256x4xf32> to vector<256x4xbf16>
    %c6 = arith.constant 6 : index
    %c0_47 = arith.constant 0 : index
    %c0_48 = arith.constant 0 : index
    %56 = vector.load %arg2[%c6, %c0_47, %c0_48] : memref<9x4x8xbf16, #tpu.memory_space<vmem>>, vector<1x4x8xbf16>
    %57 = vector.shape_cast %56 : vector<1x4x8xbf16> to vector<4x8xbf16>
    %cst_49 = arith.constant dense<0.000000e+00> : vector<256x8xf32>
    %58 = tpu.matmul %55, %57, %cst_49 {dimension_numbers = #tpu.dot_dimension_numbers<[1], [0], [0], [1], [0, 0, 1, 1], [], []>} : vector<256x4xbf16>, vector<4x8xbf16>, vector<256x8xf32> -> vector<256x8xf32>
    %59 = arith.addf %51, %58 : vector<256x8xf32>
    %c0_50 = arith.constant 0 : index
    %c2_51 = arith.constant 2 : index
    %c1_52 = arith.constant 1 : index
    %c0_53 = arith.constant 0 : index
    %60 = vector.load %arg1[%c0_50, %c2_51, %c1_52, %c0_53] : memref<1x18x18x4xf32, #tpu.memory_space<vmem>>, vector<1x16x16x4xf32>
    %61 = vector.shape_cast %60 : vector<1x16x16x4xf32> to vector<16x16x4xf32>
    %62 = vector.shape_cast %61 : vector<16x16x4xf32> to vector<256x4xf32>
    %63 = arith.truncf %62 : vector<256x4xf32> to vector<256x4xbf16>
    %c7 = arith.constant 7 : index
    %c0_54 = arith.constant 0 : index
    %c0_55 = arith.constant 0 : index
    %64 = vector.load %arg2[%c7, %c0_54, %c0_55] : memref<9x4x8xbf16, #tpu.memory_space<vmem>>, vector<1x4x8xbf16>
    %65 = vector.shape_cast %64 : vector<1x4x8xbf16> to vector<4x8xbf16>
    %cst_56 = arith.constant dense<0.000000e+00> : vector<256x8xf32>
    %66 = tpu.matmul %63, %65, %cst_56 {dimension_numbers = #tpu.dot_dimension_numbers<[1], [0], [0], [1], [0, 0, 1, 1], [], []>} : vector<256x4xbf16>, vector<4x8xbf16>, vector<256x8xf32> -> vector<256x8xf32>
    %67 = arith.addf %59, %66 : vector<256x8xf32>
    %c0_57 = arith.constant 0 : index
    %c2_58 = arith.constant 2 : index
    %c2_59 = arith.constant 2 : index
    %c0_60 = arith.constant 0 : index
    %68 = vector.load %arg1[%c0_57, %c2_58, %c2_59, %c0_60] : memref<1x18x18x4xf32, #tpu.memory_space<vmem>>, vector<1x16x16x4xf32>
    %69 = vector.shape_cast %68 : vector<1x16x16x4xf32> to vector<16x16x4xf32>
    %70 = vector.shape_cast %69 : vector<16x16x4xf32> to vector<256x4xf32>
    %71 = arith.truncf %70 : vector<256x4xf32> to vector<256x4xbf16>
    %c8 = arith.constant 8 : index
    %c0_61 = arith.constant 0 : index
    %c0_62 = arith.constant 0 : index
    %72 = vector.load %arg2[%c8, %c0_61, %c0_62] : memref<9x4x8xbf16, #tpu.memory_space<vmem>>, vector<1x4x8xbf16>
    %73 = vector.shape_cast %72 : vector<1x4x8xbf16> to vector<4x8xbf16>
    %cst_63 = arith.constant dense<0.000000e+00> : vector<256x8xf32>
    %74 = tpu.matmul %71, %73, %cst_63 {dimension_numbers = #tpu.dot_dimension_numbers<[1], [0], [0], [1], [0, 0, 1, 1], [], []>} : vector<256x4xbf16>, vector<4x8xbf16>, vector<256x8xf32> -> vector<256x8xf32>
    %75 = arith.addf %67, %74 : vector<256x8xf32>
    %76 = vector.shape_cast %75 : vector<256x8xf32> to vector<16x16x8xf32>
    %c0_64 = arith.constant 0 : index
    %c0_65 = arith.constant 0 : index
    %c0_66 = arith.constant 0 : index
    %c0_67 = arith.constant 0 : index
    %77 = vector.load %arg3[%c0_64, %c0_65, %c0_66, %c0_67] : memref<1x16x16x8xf32, #tpu.memory_space<vmem>>, vector<1x16x16x8xf32>
    %78 = vector.shape_cast %77 : vector<1x16x16x8xf32> to vector<16x16x8xf32>
    %79 = vector.shape_cast %76 : vector<16x16x8xf32> to vector<1x16x16x8xf32>
    tpu.vector_store %arg3[%c0_64, %c0_65, %c0_66, %c0_67], %79 {strides = array<i32>} : memref<1x16x16x8xf32, #tpu.memory_space<vmem>>, vector<1x16x16x8xf32>,
    %c0_68 = arith.constant 0 : index
    %c0_69 = arith.constant 0 : index
    %80 = vector.load %arg4[%c0_68, %c0_69] : memref<2x8xf32, #tpu.memory_space<vmem>>, vector<1x8xf32>
    %cst_70 = arith.constant dense<0.000000e+00> : vector<8xf32>
    %81 = vector.multi_reduction <add>, %75, %cst_70 [0] : vector<256x8xf32> to vector<8xf32>
    %82 = vector.shape_cast %81 : vector<8xf32> to vector<1x8xf32>
    %83 = arith.addf %80, %82 : vector<1x8xf32>
    %c0_71 = arith.constant 0 : index
    %c0_72 = arith.constant 0 : index
    %84 = vector.load %arg4[%c0_71, %c0_72] : memref<2x8xf32, #tpu.memory_space<vmem>>, vector<1x8xf32>
    tpu.vector_store %arg4[%c0_71, %c0_72], %83 {strides = array<i32>} : memref<2x8xf32, #tpu.memory_space<vmem>>, vector<1x8xf32>,
    %c1_73 = arith.constant 1 : index
    %c0_74 = arith.constant 0 : index
    %85 = vector.load %arg4[%c1_73, %c0_74] : memref<2x8xf32, #tpu.memory_space<vmem>>, vector<1x8xf32>
    %86 = arith.mulf %75, %75 : vector<256x8xf32>
    %cst_75 = arith.constant dense<0.000000e+00> : vector<8xf32>
    %87 = vector.multi_reduction <add>, %86, %cst_75 [0] : vector<256x8xf32> to vector<8xf32>
    %88 = vector.shape_cast %87 : vector<8xf32> to vector<1x8xf32>
    %89 = arith.addf %85, %88 : vector<1x8xf32>
    %c1_76 = arith.constant 1 : index
    %c0_77 = arith.constant 0 : index
    %90 = vector.load %arg4[%c1_76, %c0_77] : memref<2x8xf32, #tpu.memory_space<vmem>>, vector<1x8xf32>
    tpu.vector_store %arg4[%c1_76, %c0_77], %89 {strides = array<i32>} : memref<2x8xf32, #tpu.memory_space<vmem>>, vector<1x8xf32>,
    return
  }
  func.func @transform_0(%arg0: i32) -> (i32, i32, i32, i32) {
    %c0_i32 = arith.constant 0 : i32
    %c0_i32_0 = arith.constant 0 : i32
    %c0_i32_1 = arith.constant 0 : i32
    %c0_i32_2 = arith.constant 0 : i32
    return %arg0, %c0_i32, %c0_i32_0, %c0_i32_1 : i32, i32, i32, i32
  }
  func.func @transform_1(%arg0: i32) -> (i32, i32, i32) {
    %c0_i32 = arith.constant 0 : i32
    %c0_i32_0 = arith.constant 0 : i32
    %c0_i32_1 = arith.constant 0 : i32
    %c0_i32_2 = arith.constant 0 : i32
    return %c0_i32, %c0_i32_0, %c0_i32_1 : i32, i32, i32
  }
  func.func @transform_2(%arg0: i32) -> (i32, i32, i32, i32) {
    %c0_i32 = arith.constant 0 : i32
    %c0_i32_0 = arith.constant 0 : i32
    %c0_i32_1 = arith.constant 0 : i32
    %c0_i32_2 = arith.constant 0 : i32
    return %arg0, %c0_i32, %c0_i32_0, %c0_i32_1 : i32, i32, i32, i32
  }
  func.func @transform_3(%arg0: i32) -> (i32, i32) {
    %c0_i32 = arith.constant 0 : i32
    %c0_i32_0 = arith.constant 0 : i32
    %c0_i32_1 = arith.constant 0 : i32
    return %c0_i32, %c0_i32_0 : i32, i32
  }
}

module attributes {stable_mosaic.version = 11 : i64} {
  func.func @_conv2_shortcut_stats_kernel(%arg0: i32, %arg1: memref<1x16x16x8xf32, #tpu.memory_space<vmem>>, %arg2: memref<1x18x18x4xf32, #tpu.memory_space<vmem>>, %arg3: memref<2x8xf32, #tpu.memory_space<vmem>>, %arg4: memref<8x8xf32, #tpu.memory_space<vmem>>, %arg5: memref<9x8x8xbf16, #tpu.memory_space<vmem>>, %arg6: memref<4x8xbf16, #tpu.memory_space<vmem>>, %arg7: memref<1x16x16x8xf32, #tpu.memory_space<vmem>>, %arg8: memref<1x16x16x8xf32, #tpu.memory_space<vmem>>, %arg9: memref<4x8xf32, #tpu.memory_space<vmem>>, %arg10: memref<18x18x8xf32, #tpu.memory_space<vmem>>) attributes {dimension_semantics = [#tpu.dimension_semantics<arbitrary>], iteration_bounds = array<i64: 2>, scalar_prefetch = 0 : i64, scratch_operands = 1 : i64, tpu.core_type = #tpu.core_type<tc>, window_params = [{transform_indices = @transform_0, window_bounds = array<i64: 1, 16, 16, 8>}, {transform_indices = @transform_1, window_bounds = array<i64: 1, 18, 18, 4>}, {pipeline_mode = #tpu.pipeline_mode<synchronous>, transform_indices = @transform_2, window_bounds = array<i64: 2, 8>}, {pipeline_mode = #tpu.pipeline_mode<synchronous>, transform_indices = @transform_3, window_bounds = array<i64: 8, 8>}, {pipeline_mode = #tpu.pipeline_mode<synchronous>, transform_indices = @transform_4, window_bounds = array<i64: 9, 8, 8>}, {pipeline_mode = #tpu.pipeline_mode<synchronous>, transform_indices = @transform_5, window_bounds = array<i64: 4, 8>}, {transform_indices = @transform_6, window_bounds = array<i64: 1, 16, 16, 8>}, {transform_indices = @transform_7, window_bounds = array<i64: 1, 16, 16, 8>}, {pipeline_mode = #tpu.pipeline_mode<synchronous>, transform_indices = @transform_8, window_bounds = array<i64: 4, 8>}]} {
    %c0_i32 = arith.constant 0 : i32
    %0 = arith.cmpi eq, %arg0, %c0_i32 : i32
    %1 = arith.extui %0 : i1 to i32
    %c0_i32_0 = arith.constant 0 : i32
    %2 = arith.cmpi ne, %1, %c0_i32_0 : i32
    scf.if %2 {
      %cst_107 = arith.constant 0.000000e+00 : f32
      %131 = vector.broadcast %cst_107 : f32 to vector<18x18x8xf32>
      %c0_108 = arith.constant 0 : index
      %c0_109 = arith.constant 0 : index
      %c0_110 = arith.constant 0 : index
      %132 = vector.load %arg10[%c0_108, %c0_109, %c0_110] : memref<18x18x8xf32, #tpu.memory_space<vmem>>, vector<18x18x8xf32>
      tpu.vector_store %arg10[%c0_108, %c0_109, %c0_110], %131 {strides = array<i32>} : memref<18x18x8xf32, #tpu.memory_space<vmem>>, vector<18x18x8xf32>,
      %cst_111 = arith.constant 0.000000e+00 : f32
      %133 = vector.broadcast %cst_111 : f32 to vector<4x8xf32>
      %c0_112 = arith.constant 0 : index
      %c0_113 = arith.constant 0 : index
      %134 = vector.load %arg9[%c0_112, %c0_113] : memref<4x8xf32, #tpu.memory_space<vmem>>, vector<4x8xf32>
      tpu.vector_store %arg9[%c0_112, %c0_113], %133 {strides = array<i32>} : memref<4x8xf32, #tpu.memory_space<vmem>>, vector<4x8xf32>,
    } else {
    }
    %c0 = arith.constant 0 : index
    %c0_1 = arith.constant 0 : index
    %3 = vector.load %arg3[%c0, %c0_1] : memref<2x8xf32, #tpu.memory_space<vmem>>, vector<2x8xf32>
    %4 = vector.extract_strided_slice %3 {offsets = [0, 0], sizes = [1, 8], strides = [1, 1]} : vector<2x8xf32> to vector<1x8xf32>
    %cst = arith.constant 0.001953125 : f32
    %5 = vector.broadcast %cst : f32 to vector<1x8xf32>
    %6 = arith.mulf %4, %5 : vector<1x8xf32>
    %7 = vector.extract_strided_slice %3 {offsets = [1, 0], sizes = [1, 8], strides = [1, 1]} : vector<2x8xf32> to vector<1x8xf32>
    %cst_2 = arith.constant 0.001953125 : f32
    %8 = vector.broadcast %cst_2 : f32 to vector<1x8xf32>
    %9 = arith.mulf %7, %8 : vector<1x8xf32>
    %10 = arith.mulf %6, %6 : vector<1x8xf32>
    %11 = arith.subf %9, %10 : vector<1x8xf32>
    %cst_3 = arith.constant 9.99999974E-6 : f32
    %12 = vector.broadcast %cst_3 : f32 to vector<1x8xf32>
    %13 = arith.addf %11, %12 : vector<1x8xf32>
    %14 = math.rsqrt %13 : vector<1x8xf32>
    %c0_4 = arith.constant 0 : index
    %c0_5 = arith.constant 0 : index
    %15 = vector.load %arg4[%c0_4, %c0_5] : memref<8x8xf32, #tpu.memory_space<vmem>>, vector<1x8xf32>
    %16 = arith.mulf %14, %15 : vector<1x8xf32>
    %c1 = arith.constant 1 : index
    %c0_6 = arith.constant 0 : index
    %17 = vector.load %arg4[%c1, %c0_6] : memref<8x8xf32, #tpu.memory_space<vmem>>, vector<1x8xf32>
    %c0_7 = arith.constant 0 : index
    %c0_8 = arith.constant 0 : index
    %c0_9 = arith.constant 0 : index
    %c0_10 = arith.constant 0 : index
    %18 = vector.load %arg1[%c0_7, %c0_8, %c0_9, %c0_10] : memref<1x16x16x8xf32, #tpu.memory_space<vmem>>, vector<1x16x16x8xf32>
    %19 = vector.shape_cast %18 : vector<1x16x16x8xf32> to vector<16x16x8xf32>
    %20 = vector.shape_cast %19 : vector<16x16x8xf32> to vector<256x8xf32>
    %21 = vector.broadcast %6 : vector<1x8xf32> to vector<256x8xf32>
    %22 = arith.subf %20, %21 : vector<256x8xf32>
    %23 = vector.broadcast %16 : vector<1x8xf32> to vector<256x8xf32>
    %24 = arith.mulf %22, %23 : vector<256x8xf32>
    %25 = vector.broadcast %17 : vector<1x8xf32> to vector<256x8xf32>
    %26 = arith.addf %24, %25 : vector<256x8xf32>
    %cst_11 = arith.constant 0.000000e+00 : f32
    %27 = vector.broadcast %cst_11 : f32 to vector<256x8xf32>
    %28 = arith.maximumf %26, %27 : vector<256x8xf32>
    %29 = vector.shape_cast %28 : vector<256x8xf32> to vector<16x16x8xf32>
    %c1_12 = arith.constant 1 : index
    %c1_13 = arith.constant 1 : index
    %c0_14 = arith.constant 0 : index
    %30 = vector.load %arg10[%c1_12, %c1_13, %c0_14] : memref<18x18x8xf32, #tpu.memory_space<vmem>>, vector<16x16x8xf32>
    tpu.vector_store %arg10[%c1_12, %c1_13, %c0_14], %29 {strides = array<i32>} : memref<18x18x8xf32, #tpu.memory_space<vmem>>, vector<16x16x8xf32>,
    %cst_15 = arith.constant 0.000000e+00 : f32
    %31 = vector.broadcast %cst_15 : f32 to vector<256x8xf32>
    %c0_16 = arith.constant 0 : index
    %c0_17 = arith.constant 0 : index
    %c0_18 = arith.constant 0 : index
    %32 = vector.load %arg10[%c0_16, %c0_17, %c0_18] : memref<18x18x8xf32, #tpu.memory_space<vmem>>, vector<16x16x8xf32>
    %33 = vector.shape_cast %32 : vector<16x16x8xf32> to vector<256x8xf32>
    %34 = arith.truncf %33 : vector<256x8xf32> to vector<256x8xbf16>
    %c0_19 = arith.constant 0 : index
    %c0_20 = arith.constant 0 : index
    %c0_21 = arith.constant 0 : index
    %35 = vector.load %arg5[%c0_19, %c0_20, %c0_21] : memref<9x8x8xbf16, #tpu.memory_space<vmem>>, vector<1x8x8xbf16>
    %36 = vector.shape_cast %35 : vector<1x8x8xbf16> to vector<8x8xbf16>
    %cst_22 = arith.constant dense<0.000000e+00> : vector<256x8xf32>
    %37 = tpu.matmul %34, %36, %cst_22 {dimension_numbers = #tpu.dot_dimension_numbers<[1], [0], [0], [1], [0, 0, 1, 1], [], []>} : vector<256x8xbf16>, vector<8x8xbf16>, vector<256x8xf32> -> vector<256x8xf32>
    %38 = arith.addf %31, %37 : vector<256x8xf32>
    %c0_23 = arith.constant 0 : index
    %c1_24 = arith.constant 1 : index
    %c0_25 = arith.constant 0 : index
    %39 = vector.load %arg10[%c0_23, %c1_24, %c0_25] : memref<18x18x8xf32, #tpu.memory_space<vmem>>, vector<16x16x8xf32>
    %40 = vector.shape_cast %39 : vector<16x16x8xf32> to vector<256x8xf32>
    %41 = arith.truncf %40 : vector<256x8xf32> to vector<256x8xbf16>
    %c1_26 = arith.constant 1 : index
    %c0_27 = arith.constant 0 : index
    %c0_28 = arith.constant 0 : index
    %42 = vector.load %arg5[%c1_26, %c0_27, %c0_28] : memref<9x8x8xbf16, #tpu.memory_space<vmem>>, vector<1x8x8xbf16>
    %43 = vector.shape_cast %42 : vector<1x8x8xbf16> to vector<8x8xbf16>
    %cst_29 = arith.constant dense<0.000000e+00> : vector<256x8xf32>
    %44 = tpu.matmul %41, %43, %cst_29 {dimension_numbers = #tpu.dot_dimension_numbers<[1], [0], [0], [1], [0, 0, 1, 1], [], []>} : vector<256x8xbf16>, vector<8x8xbf16>, vector<256x8xf32> -> vector<256x8xf32>
    %45 = arith.addf %38, %44 : vector<256x8xf32>
    %c0_30 = arith.constant 0 : index
    %c2 = arith.constant 2 : index
    %c0_31 = arith.constant 0 : index
    %46 = vector.load %arg10[%c0_30, %c2, %c0_31] : memref<18x18x8xf32, #tpu.memory_space<vmem>>, vector<16x16x8xf32>
    %47 = vector.shape_cast %46 : vector<16x16x8xf32> to vector<256x8xf32>
    %48 = arith.truncf %47 : vector<256x8xf32> to vector<256x8xbf16>
    %c2_32 = arith.constant 2 : index
    %c0_33 = arith.constant 0 : index
    %c0_34 = arith.constant 0 : index
    %49 = vector.load %arg5[%c2_32, %c0_33, %c0_34] : memref<9x8x8xbf16, #tpu.memory_space<vmem>>, vector<1x8x8xbf16>
    %50 = vector.shape_cast %49 : vector<1x8x8xbf16> to vector<8x8xbf16>
    %cst_35 = arith.constant dense<0.000000e+00> : vector<256x8xf32>
    %51 = tpu.matmul %48, %50, %cst_35 {dimension_numbers = #tpu.dot_dimension_numbers<[1], [0], [0], [1], [0, 0, 1, 1], [], []>} : vector<256x8xbf16>, vector<8x8xbf16>, vector<256x8xf32> -> vector<256x8xf32>
    %52 = arith.addf %45, %51 : vector<256x8xf32>
    %c1_36 = arith.constant 1 : index
    %c0_37 = arith.constant 0 : index
    %c0_38 = arith.constant 0 : index
    %53 = vector.load %arg10[%c1_36, %c0_37, %c0_38] : memref<18x18x8xf32, #tpu.memory_space<vmem>>, vector<16x16x8xf32>
    %54 = vector.shape_cast %53 : vector<16x16x8xf32> to vector<256x8xf32>
    %55 = arith.truncf %54 : vector<256x8xf32> to vector<256x8xbf16>
    %c3 = arith.constant 3 : index
    %c0_39 = arith.constant 0 : index
    %c0_40 = arith.constant 0 : index
    %56 = vector.load %arg5[%c3, %c0_39, %c0_40] : memref<9x8x8xbf16, #tpu.memory_space<vmem>>, vector<1x8x8xbf16>
    %57 = vector.shape_cast %56 : vector<1x8x8xbf16> to vector<8x8xbf16>
    %cst_41 = arith.constant dense<0.000000e+00> : vector<256x8xf32>
    %58 = tpu.matmul %55, %57, %cst_41 {dimension_numbers = #tpu.dot_dimension_numbers<[1], [0], [0], [1], [0, 0, 1, 1], [], []>} : vector<256x8xbf16>, vector<8x8xbf16>, vector<256x8xf32> -> vector<256x8xf32>
    %59 = arith.addf %52, %58 : vector<256x8xf32>
    %c1_42 = arith.constant 1 : index
    %c1_43 = arith.constant 1 : index
    %c0_44 = arith.constant 0 : index
    %60 = vector.load %arg10[%c1_42, %c1_43, %c0_44] : memref<18x18x8xf32, #tpu.memory_space<vmem>>, vector<16x16x8xf32>
    %61 = vector.shape_cast %60 : vector<16x16x8xf32> to vector<256x8xf32>
    %62 = arith.truncf %61 : vector<256x8xf32> to vector<256x8xbf16>
    %c4 = arith.constant 4 : index
    %c0_45 = arith.constant 0 : index
    %c0_46 = arith.constant 0 : index
    %63 = vector.load %arg5[%c4, %c0_45, %c0_46] : memref<9x8x8xbf16, #tpu.memory_space<vmem>>, vector<1x8x8xbf16>
    %64 = vector.shape_cast %63 : vector<1x8x8xbf16> to vector<8x8xbf16>
    %cst_47 = arith.constant dense<0.000000e+00> : vector<256x8xf32>
    %65 = tpu.matmul %62, %64, %cst_47 {dimension_numbers = #tpu.dot_dimension_numbers<[1], [0], [0], [1], [0, 0, 1, 1], [], []>} : vector<256x8xbf16>, vector<8x8xbf16>, vector<256x8xf32> -> vector<256x8xf32>
    %66 = arith.addf %59, %65 : vector<256x8xf32>
    %c1_48 = arith.constant 1 : index
    %c2_49 = arith.constant 2 : index
    %c0_50 = arith.constant 0 : index
    %67 = vector.load %arg10[%c1_48, %c2_49, %c0_50] : memref<18x18x8xf32, #tpu.memory_space<vmem>>, vector<16x16x8xf32>
    %68 = vector.shape_cast %67 : vector<16x16x8xf32> to vector<256x8xf32>
    %69 = arith.truncf %68 : vector<256x8xf32> to vector<256x8xbf16>
    %c5 = arith.constant 5 : index
    %c0_51 = arith.constant 0 : index
    %c0_52 = arith.constant 0 : index
    %70 = vector.load %arg5[%c5, %c0_51, %c0_52] : memref<9x8x8xbf16, #tpu.memory_space<vmem>>, vector<1x8x8xbf16>
    %71 = vector.shape_cast %70 : vector<1x8x8xbf16> to vector<8x8xbf16>
    %cst_53 = arith.constant dense<0.000000e+00> : vector<256x8xf32>
    %72 = tpu.matmul %69, %71, %cst_53 {dimension_numbers = #tpu.dot_dimension_numbers<[1], [0], [0], [1], [0, 0, 1, 1], [], []>} : vector<256x8xbf16>, vector<8x8xbf16>, vector<256x8xf32> -> vector<256x8xf32>
    %73 = arith.addf %66, %72 : vector<256x8xf32>
    %c2_54 = arith.constant 2 : index
    %c0_55 = arith.constant 0 : index
    %c0_56 = arith.constant 0 : index
    %74 = vector.load %arg10[%c2_54, %c0_55, %c0_56] : memref<18x18x8xf32, #tpu.memory_space<vmem>>, vector<16x16x8xf32>
    %75 = vector.shape_cast %74 : vector<16x16x8xf32> to vector<256x8xf32>
    %76 = arith.truncf %75 : vector<256x8xf32> to vector<256x8xbf16>
    %c6 = arith.constant 6 : index
    %c0_57 = arith.constant 0 : index
    %c0_58 = arith.constant 0 : index
    %77 = vector.load %arg5[%c6, %c0_57, %c0_58] : memref<9x8x8xbf16, #tpu.memory_space<vmem>>, vector<1x8x8xbf16>
    %78 = vector.shape_cast %77 : vector<1x8x8xbf16> to vector<8x8xbf16>
    %cst_59 = arith.constant dense<0.000000e+00> : vector<256x8xf32>
    %79 = tpu.matmul %76, %78, %cst_59 {dimension_numbers = #tpu.dot_dimension_numbers<[1], [0], [0], [1], [0, 0, 1, 1], [], []>} : vector<256x8xbf16>, vector<8x8xbf16>, vector<256x8xf32> -> vector<256x8xf32>
    %80 = arith.addf %73, %79 : vector<256x8xf32>
    %c2_60 = arith.constant 2 : index
    %c1_61 = arith.constant 1 : index
    %c0_62 = arith.constant 0 : index
    %81 = vector.load %arg10[%c2_60, %c1_61, %c0_62] : memref<18x18x8xf32, #tpu.memory_space<vmem>>, vector<16x16x8xf32>
    %82 = vector.shape_cast %81 : vector<16x16x8xf32> to vector<256x8xf32>
    %83 = arith.truncf %82 : vector<256x8xf32> to vector<256x8xbf16>
    %c7 = arith.constant 7 : index
    %c0_63 = arith.constant 0 : index
    %c0_64 = arith.constant 0 : index
    %84 = vector.load %arg5[%c7, %c0_63, %c0_64] : memref<9x8x8xbf16, #tpu.memory_space<vmem>>, vector<1x8x8xbf16>
    %85 = vector.shape_cast %84 : vector<1x8x8xbf16> to vector<8x8xbf16>
    %cst_65 = arith.constant dense<0.000000e+00> : vector<256x8xf32>
    %86 = tpu.matmul %83, %85, %cst_65 {dimension_numbers = #tpu.dot_dimension_numbers<[1], [0], [0], [1], [0, 0, 1, 1], [], []>} : vector<256x8xbf16>, vector<8x8xbf16>, vector<256x8xf32> -> vector<256x8xf32>
    %87 = arith.addf %80, %86 : vector<256x8xf32>
    %c2_66 = arith.constant 2 : index
    %c2_67 = arith.constant 2 : index
    %c0_68 = arith.constant 0 : index
    %88 = vector.load %arg10[%c2_66, %c2_67, %c0_68] : memref<18x18x8xf32, #tpu.memory_space<vmem>>, vector<16x16x8xf32>
    %89 = vector.shape_cast %88 : vector<16x16x8xf32> to vector<256x8xf32>
    %90 = arith.truncf %89 : vector<256x8xf32> to vector<256x8xbf16>
    %c8 = arith.constant 8 : index
    %c0_69 = arith.constant 0 : index
    %c0_70 = arith.constant 0 : index
    %91 = vector.load %arg5[%c8, %c0_69, %c0_70] : memref<9x8x8xbf16, #tpu.memory_space<vmem>>, vector<1x8x8xbf16>
    %92 = vector.shape_cast %91 : vector<1x8x8xbf16> to vector<8x8xbf16>
    %cst_71 = arith.constant dense<0.000000e+00> : vector<256x8xf32>
    %93 = tpu.matmul %90, %92, %cst_71 {dimension_numbers = #tpu.dot_dimension_numbers<[1], [0], [0], [1], [0, 0, 1, 1], [], []>} : vector<256x8xbf16>, vector<8x8xbf16>, vector<256x8xf32> -> vector<256x8xf32>
    %94 = arith.addf %87, %93 : vector<256x8xf32>
    %95 = vector.shape_cast %94 : vector<256x8xf32> to vector<16x16x8xf32>
    %c0_72 = arith.constant 0 : index
    %c0_73 = arith.constant 0 : index
    %c0_74 = arith.constant 0 : index
    %c0_75 = arith.constant 0 : index
    %96 = vector.load %arg7[%c0_72, %c0_73, %c0_74, %c0_75] : memref<1x16x16x8xf32, #tpu.memory_space<vmem>>, vector<1x16x16x8xf32>
    %97 = vector.shape_cast %96 : vector<1x16x16x8xf32> to vector<16x16x8xf32>
    %98 = vector.shape_cast %95 : vector<16x16x8xf32> to vector<1x16x16x8xf32>
    tpu.vector_store %arg7[%c0_72, %c0_73, %c0_74, %c0_75], %98 {strides = array<i32>} : memref<1x16x16x8xf32, #tpu.memory_space<vmem>>, vector<1x16x16x8xf32>,
    %c0_76 = arith.constant 0 : index
    %c1_77 = arith.constant 1 : index
    %c1_78 = arith.constant 1 : index
    %c0_79 = arith.constant 0 : index
    %99 = vector.load %arg2[%c0_76, %c1_77, %c1_78, %c0_79] : memref<1x18x18x4xf32, #tpu.memory_space<vmem>>, vector<1x16x16x4xf32>
    %100 = vector.shape_cast %99 : vector<1x16x16x4xf32> to vector<16x16x4xf32>
    %101 = vector.shape_cast %100 : vector<16x16x4xf32> to vector<256x4xf32>
    %102 = arith.truncf %101 : vector<256x4xf32> to vector<256x4xbf16>
    %c0_80 = arith.constant 0 : index
    %c0_81 = arith.constant 0 : index
    %103 = vector.load %arg6[%c0_80, %c0_81] : memref<4x8xbf16, #tpu.memory_space<vmem>>, vector<4x8xbf16>
    %cst_82 = arith.constant dense<0.000000e+00> : vector<256x8xf32>
    %104 = tpu.matmul %102, %103, %cst_82 {dimension_numbers = #tpu.dot_dimension_numbers<[1], [0], [0], [1], [0, 0, 1, 1], [], []>} : vector<256x4xbf16>, vector<4x8xbf16>, vector<256x8xf32> -> vector<256x8xf32>
    %105 = vector.shape_cast %104 : vector<256x8xf32> to vector<16x16x8xf32>
    %c0_83 = arith.constant 0 : index
    %c0_84 = arith.constant 0 : index
    %c0_85 = arith.constant 0 : index
    %c0_86 = arith.constant 0 : index
    %106 = vector.load %arg8[%c0_83, %c0_84, %c0_85, %c0_86] : memref<1x16x16x8xf32, #tpu.memory_space<vmem>>, vector<1x16x16x8xf32>
    %107 = vector.shape_cast %106 : vector<1x16x16x8xf32> to vector<16x16x8xf32>
    %108 = vector.shape_cast %105 : vector<16x16x8xf32> to vector<1x16x16x8xf32>
    tpu.vector_store %arg8[%c0_83, %c0_84, %c0_85, %c0_86], %108 {strides = array<i32>} : memref<1x16x16x8xf32, #tpu.memory_space<vmem>>, vector<1x16x16x8xf32>,
    %c0_87 = arith.constant 0 : index
    %c0_88 = arith.constant 0 : index
    %109 = vector.load %arg9[%c0_87, %c0_88] : memref<4x8xf32, #tpu.memory_space<vmem>>, vector<1x8xf32>
    %cst_89 = arith.constant dense<0.000000e+00> : vector<8xf32>
    %110 = vector.multi_reduction <add>, %94, %cst_89 [0] : vector<256x8xf32> to vector<8xf32>
    %111 = vector.shape_cast %110 : vector<8xf32> to vector<1x8xf32>
    %112 = arith.addf %109, %111 : vector<1x8xf32>
    %c0_90 = arith.constant 0 : index
    %c0_91 = arith.constant 0 : index
    %113 = vector.load %arg9[%c0_90, %c0_91] : memref<4x8xf32, #tpu.memory_space<vmem>>, vector<1x8xf32>
    tpu.vector_store %arg9[%c0_90, %c0_91], %112 {strides = array<i32>} : memref<4x8xf32, #tpu.memory_space<vmem>>, vector<1x8xf32>,
    %c1_92 = arith.constant 1 : index
    %c0_93 = arith.constant 0 : index
    %114 = vector.load %arg9[%c1_92, %c0_93] : memref<4x8xf32, #tpu.memory_space<vmem>>, vector<1x8xf32>
    %115 = arith.mulf %94, %94 : vector<256x8xf32>
    %cst_94 = arith.constant dense<0.000000e+00> : vector<8xf32>
    %116 = vector.multi_reduction <add>, %115, %cst_94 [0] : vector<256x8xf32> to vector<8xf32>
    %117 = vector.shape_cast %116 : vector<8xf32> to vector<1x8xf32>
    %118 = arith.addf %114, %117 : vector<1x8xf32>
    %c1_95 = arith.constant 1 : index
    %c0_96 = arith.constant 0 : index
    %119 = vector.load %arg9[%c1_95, %c0_96] : memref<4x8xf32, #tpu.memory_space<vmem>>, vector<1x8xf32>
    tpu.vector_store %arg9[%c1_95, %c0_96], %118 {strides = array<i32>} : memref<4x8xf32, #tpu.memory_space<vmem>>, vector<1x8xf32>,
    %c2_97 = arith.constant 2 : index
    %c0_98 = arith.constant 0 : index
    %120 = vector.load %arg9[%c2_97, %c0_98] : memref<4x8xf32, #tpu.memory_space<vmem>>, vector<1x8xf32>
    %cst_99 = arith.constant dense<0.000000e+00> : vector<8xf32>
    %121 = vector.multi_reduction <add>, %104, %cst_99 [0] : vector<256x8xf32> to vector<8xf32>
    %122 = vector.shape_cast %121 : vector<8xf32> to vector<1x8xf32>
    %123 = arith.addf %120, %122 : vector<1x8xf32>
    %c2_100 = arith.constant 2 : index
    %c0_101 = arith.constant 0 : index
    %124 = vector.load %arg9[%c2_100, %c0_101] : memref<4x8xf32, #tpu.memory_space<vmem>>, vector<1x8xf32>
    tpu.vector_store %arg9[%c2_100, %c0_101], %123 {strides = array<i32>} : memref<4x8xf32, #tpu.memory_space<vmem>>, vector<1x8xf32>,
    %c3_102 = arith.constant 3 : index
    %c0_103 = arith.constant 0 : index
    %125 = vector.load %arg9[%c3_102, %c0_103] : memref<4x8xf32, #tpu.memory_space<vmem>>, vector<1x8xf32>
    %126 = arith.mulf %104, %104 : vector<256x8xf32>
    %cst_104 = arith.constant dense<0.000000e+00> : vector<8xf32>
    %127 = vector.multi_reduction <add>, %126, %cst_104 [0] : vector<256x8xf32> to vector<8xf32>
    %128 = vector.shape_cast %127 : vector<8xf32> to vector<1x8xf32>
    %129 = arith.addf %125, %128 : vector<1x8xf32>
    %c3_105 = arith.constant 3 : index
    %c0_106 = arith.constant 0 : index
    %130 = vector.load %arg9[%c3_105, %c0_106] : memref<4x8xf32, #tpu.memory_space<vmem>>, vector<1x8xf32>
    tpu.vector_store %arg9[%c3_105, %c0_106], %129 {strides = array<i32>} : memref<4x8xf32, #tpu.memory_space<vmem>>, vector<1x8xf32>,
    return
  }
  func.func @transform_0(%arg0: i32) -> (i32, i32, i32, i32) {
    %c0_i32 = arith.constant 0 : i32
    %c0_i32_0 = arith.constant 0 : i32
    %c0_i32_1 = arith.constant 0 : i32
    %c0_i32_2 = arith.constant 0 : i32
    return %arg0, %c0_i32, %c0_i32_0, %c0_i32_1 : i32, i32, i32, i32
  }
  func.func @transform_1(%arg0: i32) -> (i32, i32, i32, i32) {
    %c0_i32 = arith.constant 0 : i32
    %c0_i32_0 = arith.constant 0 : i32
    %c0_i32_1 = arith.constant 0 : i32
    %c0_i32_2 = arith.constant 0 : i32
    return %arg0, %c0_i32, %c0_i32_0, %c0_i32_1 : i32, i32, i32, i32
  }
  func.func @transform_2(%arg0: i32) -> (i32, i32) {
    %c0_i32 = arith.constant 0 : i32
    %c0_i32_0 = arith.constant 0 : i32
    %c0_i32_1 = arith.constant 0 : i32
    return %c0_i32, %c0_i32_0 : i32, i32
  }
  func.func @transform_3(%arg0: i32) -> (i32, i32) {
    %c0_i32 = arith.constant 0 : i32
    %c0_i32_0 = arith.constant 0 : i32
    %c0_i32_1 = arith.constant 0 : i32
    return %c0_i32, %c0_i32_0 : i32, i32
  }
  func.func @transform_4(%arg0: i32) -> (i32, i32, i32) {
    %c0_i32 = arith.constant 0 : i32
    %c0_i32_0 = arith.constant 0 : i32
    %c0_i32_1 = arith.constant 0 : i32
    %c0_i32_2 = arith.constant 0 : i32
    return %c0_i32, %c0_i32_0, %c0_i32_1 : i32, i32, i32
  }
  func.func @transform_5(%arg0: i32) -> (i32, i32) {
    %c0_i32 = arith.constant 0 : i32
    %c0_i32_0 = arith.constant 0 : i32
    %c0_i32_1 = arith.constant 0 : i32
    return %c0_i32, %c0_i32_0 : i32, i32
  }
  func.func @transform_6(%arg0: i32) -> (i32, i32, i32, i32) {
    %c0_i32 = arith.constant 0 : i32
    %c0_i32_0 = arith.constant 0 : i32
    %c0_i32_1 = arith.constant 0 : i32
    %c0_i32_2 = arith.constant 0 : i32
    return %arg0, %c0_i32, %c0_i32_0, %c0_i32_1 : i32, i32, i32, i32
  }
  func.func @transform_7(%arg0: i32) -> (i32, i32, i32, i32) {
    %c0_i32 = arith.constant 0 : i32
    %c0_i32_0 = arith.constant 0 : i32
    %c0_i32_1 = arith.constant 0 : i32
    %c0_i32_2 = arith.constant 0 : i32
    return %arg0, %c0_i32, %c0_i32_0, %c0_i32_1 : i32, i32, i32, i32
  }
  func.func @transform_8(%arg0: i32) -> (i32, i32) {
    %c0_i32 = arith.constant 0 : i32
    %c0_i32_0 = arith.constant 0 : i32
    %c0_i32_1 = arith.constant 0 : i32
    return %c0_i32, %c0_i32_0 : i32, i32
  }
}

module attributes {stable_mosaic.version = 11 : i64} {
  func.func @_normalize_add_relu_kernel(%arg0: i32, %arg1: memref<32x128xf32, #tpu.memory_space<vmem>>, %arg2: memref<32x128xf32, #tpu.memory_space<vmem>>, %arg3: memref<4x128xf32, #tpu.memory_space<vmem>>, %arg4: memref<8x128xf32, #tpu.memory_space<vmem>>, %arg5: memref<32x128xf32, #tpu.memory_space<vmem>>) attributes {dimension_semantics = [#tpu.dimension_semantics<parallel>], iteration_bounds = array<i64: 1>, scalar_prefetch = 0 : i64, scratch_operands = 0 : i64, tpu.core_type = #tpu.core_type<tc>, window_params = [{transform_indices = @transform_0, window_bounds = array<i64: 32, 128>}, {transform_indices = @transform_1, window_bounds = array<i64: 32, 128>}, {pipeline_mode = #tpu.pipeline_mode<synchronous>, transform_indices = @transform_2, window_bounds = array<i64: 4, 128>}, {pipeline_mode = #tpu.pipeline_mode<synchronous>, transform_indices = @transform_3, window_bounds = array<i64: 8, 128>}, {transform_indices = @transform_4, window_bounds = array<i64: 32, 128>}]} {
    %c0 = arith.constant 0 : index
    %c0_0 = arith.constant 0 : index
    %0 = vector.load %arg3[%c0, %c0_0] : memref<4x128xf32, #tpu.memory_space<vmem>>, vector<4x128xf32>
    %1 = vector.extract_strided_slice %0 {offsets = [0, 0], sizes = [1, 128], strides = [1, 1]} : vector<4x128xf32> to vector<1x128xf32>
    %cst = arith.constant 0.001953125 : f32
    %2 = vector.broadcast %cst : f32 to vector<1x128xf32>
    %3 = arith.mulf %1, %2 : vector<1x128xf32>
    %4 = vector.extract_strided_slice %0 {offsets = [1, 0], sizes = [1, 128], strides = [1, 1]} : vector<4x128xf32> to vector<1x128xf32>
    %cst_1 = arith.constant 0.001953125 : f32
    %5 = vector.broadcast %cst_1 : f32 to vector<1x128xf32>
    %6 = arith.mulf %4, %5 : vector<1x128xf32>
    %7 = arith.mulf %3, %3 : vector<1x128xf32>
    %8 = arith.subf %6, %7 : vector<1x128xf32>
    %9 = vector.extract_strided_slice %0 {offsets = [2, 0], sizes = [1, 128], strides = [1, 1]} : vector<4x128xf32> to vector<1x128xf32>
    %cst_2 = arith.constant 0.001953125 : f32
    %10 = vector.broadcast %cst_2 : f32 to vector<1x128xf32>
    %11 = arith.mulf %9, %10 : vector<1x128xf32>
    %12 = vector.extract_strided_slice %0 {offsets = [3, 0], sizes = [1, 128], strides = [1, 1]} : vector<4x128xf32> to vector<1x128xf32>
    %cst_3 = arith.constant 0.001953125 : f32
    %13 = vector.broadcast %cst_3 : f32 to vector<1x128xf32>
    %14 = arith.mulf %12, %13 : vector<1x128xf32>
    %15 = arith.mulf %11, %11 : vector<1x128xf32>
    %16 = arith.subf %14, %15 : vector<1x128xf32>
    %cst_4 = arith.constant 9.99999974E-6 : f32
    %17 = vector.broadcast %cst_4 : f32 to vector<1x128xf32>
    %18 = arith.addf %8, %17 : vector<1x128xf32>
    %19 = math.rsqrt %18 : vector<1x128xf32>
    %c2 = arith.constant 2 : index
    %c0_5 = arith.constant 0 : index
    %20 = vector.load %arg4[%c2, %c0_5] : memref<8x128xf32, #tpu.memory_space<vmem>>, vector<1x128xf32>
    %21 = arith.mulf %19, %20 : vector<1x128xf32>
    %cst_6 = arith.constant 9.99999974E-6 : f32
    %22 = vector.broadcast %cst_6 : f32 to vector<1x128xf32>
    %23 = arith.addf %16, %22 : vector<1x128xf32>
    %24 = math.rsqrt %23 : vector<1x128xf32>
    %c4 = arith.constant 4 : index
    %c0_7 = arith.constant 0 : index
    %25 = vector.load %arg4[%c4, %c0_7] : memref<8x128xf32, #tpu.memory_space<vmem>>, vector<1x128xf32>
    %26 = arith.mulf %24, %25 : vector<1x128xf32>
    %c0_8 = arith.constant 0 : index
    %c0_9 = arith.constant 0 : index
    %27 = vector.load %arg1[%c0_8, %c0_9] : memref<32x128xf32, #tpu.memory_space<vmem>>, vector<32x128xf32>
    %28 = vector.broadcast %3 : vector<1x128xf32> to vector<32x128xf32>
    %29 = arith.subf %27, %28 : vector<32x128xf32>
    %30 = vector.broadcast %21 : vector<1x128xf32> to vector<32x128xf32>
    %31 = arith.mulf %29, %30 : vector<32x128xf32>
    %c3 = arith.constant 3 : index
    %c0_10 = arith.constant 0 : index
    %32 = vector.load %arg4[%c3, %c0_10] : memref<8x128xf32, #tpu.memory_space<vmem>>, vector<1x128xf32>
    %33 = vector.broadcast %32 : vector<1x128xf32> to vector<32x128xf32>
    %34 = arith.addf %31, %33 : vector<32x128xf32>
    %c0_11 = arith.constant 0 : index
    %c0_12 = arith.constant 0 : index
    %35 = vector.load %arg2[%c0_11, %c0_12] : memref<32x128xf32, #tpu.memory_space<vmem>>, vector<32x128xf32>
    %36 = vector.broadcast %11 : vector<1x128xf32> to vector<32x128xf32>
    %37 = arith.subf %35, %36 : vector<32x128xf32>
    %38 = vector.broadcast %26 : vector<1x128xf32> to vector<32x128xf32>
    %39 = arith.mulf %37, %38 : vector<32x128xf32>
    %c5 = arith.constant 5 : index
    %c0_13 = arith.constant 0 : index
    %40 = vector.load %arg4[%c5, %c0_13] : memref<8x128xf32, #tpu.memory_space<vmem>>, vector<1x128xf32>
    %41 = vector.broadcast %40 : vector<1x128xf32> to vector<32x128xf32>
    %42 = arith.addf %39, %41 : vector<32x128xf32>
    %43 = arith.addf %34, %42 : vector<32x128xf32>
    %cst_14 = arith.constant 0.000000e+00 : f32
    %44 = vector.broadcast %cst_14 : f32 to vector<32x128xf32>
    %45 = arith.maximumf %43, %44 : vector<32x128xf32>
    %c0_15 = arith.constant 0 : index
    %c0_16 = arith.constant 0 : index
    %46 = vector.load %arg5[%c0_15, %c0_16] : memref<32x128xf32, #tpu.memory_space<vmem>>, vector<32x128xf32>
    tpu.vector_store %arg5[%c0_15, %c0_16], %45 {strides = array<i32>} : memref<32x128xf32, #tpu.memory_space<vmem>>, vector<32x128xf32>,
    return
  }
  func.func @transform_0(%arg0: i32) -> (i32, i32) {
    %c0_i32 = arith.constant 0 : i32
    %c0_i32_0 = arith.constant 0 : i32
    return %arg0, %c0_i32 : i32, i32
  }
  func.func @transform_1(%arg0: i32) -> (i32, i32) {
    %c0_i32 = arith.constant 0 : i32
    %c0_i32_0 = arith.constant 0 : i32
    return %arg0, %c0_i32 : i32, i32
  }
  func.func @transform_2(%arg0: i32) -> (i32, i32) {
    %c0_i32 = arith.constant 0 : i32
    %c0_i32_0 = arith.constant 0 : i32
    %c0_i32_1 = arith.constant 0 : i32
    return %c0_i32, %c0_i32_0 : i32, i32
  }
  func.func @transform_3(%arg0: i32) -> (i32, i32) {
    %c0_i32 = arith.constant 0 : i32
    %c0_i32_0 = arith.constant 0 : i32
    %c0_i32_1 = arith.constant 0 : i32
    return %c0_i32, %c0_i32_0 : i32, i32
  }
  func.func @transform_4(%arg0: i32) -> (i32, i32) {
    %c0_i32 = arith.constant 0 : i32
    %c0_i32_0 = arith.constant 0 : i32
    return %arg0, %c0_i32 : i32, i32
  }
}

</mosaic_0001>

<bundles_post_ra>
// kernel: tile.14
= control target key start
LH: loop header
LB: loop body
LE: loop exit
PB: predicated region body
PF: predicated region fallthrough
CT: control target
= control target key end

     0   :  { %vm6_vm0 = vcmask 1043458   ;;  %s11_s6 = smov 3  ;;  %s14_s7 = smov 12  ;;  %vm8_vm1 = vcmask 64512   ;;  %vm20_vm2 = vcmask 1048512   ;;  %vm32_vm3 = vcmask 982912   ;;  %s381_s0 = inlined_call_operand.vmem [shape: f32[4,16,8], index: 0, kind: input, shape index: {}]   ;;  %s382_s1 = inlined_call_operand.vmem [shape: f32[4,128], index: 1, kind: output, shape index: {}]  }
   0x1   :  { %v196_v0 = vld [vmem:[%s381_s0 + $0xf] ss:$16 sm:%s11_s6]   ;;  %s35_s12 = smov 3  ;;  %s38_s15 = smov 12  ;;  %vm44_vm4 = vcmask 917312   ;;  %vm56_vm5 = vcmask 851712  }
   0x2   :  { %v197_v1 = vld [vmem:[%s381_s0 + $0xf] ss:$16 sm:%s14_s7]   ;;  %v200_v3 = vld [vmem:[%s381_s0 + $0xd] ss:$16 sm:%s35_s12]   ;;  %s241_s16 = smov 120   ;;  %s23_s19 = smov 3 }
   0x3   :  { %v17_v2 = vsel %vm6_vm0, %v197_v1, %v196_v0  ;;  %v201_v4 = vld [vmem:[%s381_s0 + $0xd] ss:$16 sm:%s38_s15]   ;;  %s26_s20 = smov 12  ;;  %v198_v6 = vld [vmem:[%s381_s0 + $0xe] ss:$16 sm:%s23_s19]   ;;  %s47_s25 = smov 3 }
   0x4   :  { %18 = vrot.lane.b32.xlu0 %v17_v2, %s241_s16  ;;  %v41_v5 = vsel %vm6_vm0, %v201_v4, %v200_v3  ;;  %v199_v7 = vld [vmem:[%s381_s0 + $0xe] ss:$16 sm:%s26_s20]   ;;  %s242_s26 = smov 104   ;;  %s50_s29 = smov 12  ;;  %vm68_vm6 = vcmask 786112   ;;  %vm80_vm7 = vcmask 720512  }
   0x5   :  { %42 = vrot.lane.b32.xlu1 %v41_v5, %s242_s26  ;;  %v29_v8 = vsel %vm6_vm0, %v199_v7, %v198_v6  ;;  %v202_v9 = vld [vmem:[%s381_s0 + $0xc] ss:$16 sm:%s47_s25]   ;;  %s59_s3 = smov 3  ;;  %s62_s4 = smov 12  ;;  %vm92_vm8 = vcmask 654912   ;;  %vm104_vm9 = vcmask 589312  }
   0x6   :  { %v203_v10 = vld [vmem:[%s381_s0 + $0xc] ss:$16 sm:%s50_s29]   ;;  %s243_s5 = smov 112   ;;  %v204_v12 = vld [vmem:[%s381_s0 + $0xb] ss:$16 sm:%s59_s3]   ;;  %s71_s8 = smov 3 }
   0x7   :  { %v53_v11 = vsel %vm6_vm0, %v203_v10, %v202_v9  ;;  %v205_v13 = vld [vmem:[%s381_s0 + $0xb] ss:$16 sm:%s62_s4]   ;;  %v206_v14 = vld [vmem:[%s381_s0 + $0xa] ss:$16 sm:%s71_s8]   ;;  %s74_s13 = smov 12  ;;  %s244_s14 = smov 96  }
   0x8   :  { %30 = vrot.lane.b32.xlu0 %v29_v8, %s243_s5  ;;  %v65_v15 = vsel %vm6_vm0, %v205_v13, %v204_v12  ;;  %v207_v16 = vld [vmem:[%s381_s0 + $0xa] ss:$16 sm:%s74_s13]   ;;  %s83_s17 = smov 3  ;;  %s86_s18 = smov 12  ;;  %vm116_vm10 = vcmask 523712   ;;  %vm128_vm11 = vcmask 458112  }
   0x9   :  { %54 = vrot.lane.b32.xlu1 %v53_v11, %s244_s14  ;;  %v77_v17 = vsel %vm6_vm0, %v207_v16, %v206_v14  ;;  %v208_v18 = vld [vmem:[%s381_s0 + $0x9] ss:$16 sm:%s83_s17]   ;;  %s95_s23 = smov 3  ;;  %s245_s24 = smov 88   ;;  %vm140_vm12 = vcmask 392512   ;;  %vm152_vm13 = vcmask 326912  }
   0xa   :  { %v209_v19 = vld [vmem:[%s381_s0 + $0x9] ss:$16 sm:%s86_s18]   ;;  %v210_v20 = vld [vmem:[%s381_s0 + $0x8] ss:$16 sm:%s95_s23]   ;;  %s98_s27 = smov 12  ;;  %s107_s30 = smov 3 }
   0xb   :  { %v89_v21 = vsel %vm6_vm0, %v209_v19, %v208_v18  ;;  %v211_v22 = vld [vmem:[%s381_s0 + $0x8] ss:$16 sm:%s98_s27]   ;;  %s110_s2 = smov 12  ;;  %s246_s3 = smov 80   ;;  %v212_v23 = vld [vmem:[%s381_s0 + $0x7] ss:$16 sm:%s107_s30]  }
   0xc   :  { %66 = vrot.lane.b32.xlu0 %v65_v15, %s245_s24  ;;  %s119_s6 = smov 3  ;;  %v101_v24 = vsel %vm6_vm0, %v211_v22, %v210_v20  ;;  %v213_v25 = vld [vmem:[%s381_s0 + $0x7] ss:$16 sm:%s110_s2]   ;;  %s122_s11 = smov 12  ;;  %vm164_vm14 = vcmask 261312   ;;  %vm176_vm15 = vcmask 195712  }
   0xd   :  { %78 = vrot.lane.b32.xlu1 %v77_v17, %s246_s3  ;;  %v214_v26 = vld [vmem:[%s381_s0 + $0x6] ss:$16 sm:%s119_s6]   ;;  %s247_s12 = smov 72   ;;  %s131_s15 = smov 3  ;;  %v113_v28 = vsel %vm6_vm0, %v213_v25, %v212_v23 }
   0xe   :  { %v215_v27 = vld [vmem:[%s381_s0 + $0x6] ss:$16 sm:%s122_s11]   ;;  %s134_s16 = smov 12  ;;  %v216_v29 = vld [vmem:[%s381_s0 + $0x5] ss:$16 sm:%s131_s15]   ;;  %s143_s19 = smov 3 }
   0xf   :  { %s248_s20 = smov 64   ;;  %v217_v30 = vld [vmem:[%s381_s0 + $0x5] ss:$16 sm:%s134_s16]   ;;  %s146_s23 = smov 12  ;;  %v125_v31 = vsel %vm6_vm0, %v215_v27, %v214_v26  ;;  %v218_v32 = vld [vmem:[%s381_s0 + $0x4] ss:$16 sm:%s143_s19]  }
  0x10   :  { %90 = vrot.lane.b32.xlu0 %v89_v21, %s247_s12  ;;  %s155_s26 = smov 3  ;;  %s158_s27 = smov 12  ;;  %v219_v33 = vld [vmem:[%s381_s0 + $0x4] ss:$16 sm:%s146_s23]   ;;  %v137_v34 = vsel %vm6_vm0, %v217_v30, %v216_v29 }
  0x11   :  { %102 = vrot.lane.b32.xlu1 %v101_v24, %s248_s20  ;;  %s249_s28 = smov 56   ;;  %s167_s2 = smov 3  ;;  %v220_v35 = vld [vmem:[%s381_s0 + $0x3] ss:$16 sm:%s155_s26]   ;;  %v149_v37 = vsel %vm6_vm0, %v219_v33, %v218_v32 }
  0x12   :  { %s170_s5 = smov 12  ;;  %s250_s6 = smov 48   ;;  %v221_v36 = vld [vmem:[%s381_s0 + $0x3] ss:$16 sm:%s158_s27]   ;;  %v222_v38 = vld [vmem:[%s381_s0 + $0x2] ss:$16 sm:%s167_s2]  }
  0x13   :  { %s179_s9 = smov 3  ;;  %v223_v39 = vld [vmem:[%s381_s0 + $0x2] ss:$16 sm:%s170_s5]   ;;  %s182_s14 = smov 12  ;;  %v161_v41 = vsel %vm6_vm0, %v221_v36, %v220_v35 }
  0x14   :  { %114 = vrot.lane.b32.xlu0 %v113_v28, %s249_s28  ;;  %s2_s15 = smov 3  ;;  %s251_s16 = smov 40   ;;  %v224_v42 = vld [vmem:[%s381_s0 + $0x1] ss:$16 sm:%s179_s9]   ;;  %v173_v46 = vsel %vm6_vm0, %v223_v39, %v222_v38 }
  0x15   :  { %126 = vrot.lane.b32.xlu1 %v125_v31, %s250_s6  ;;  %v3_v40 = vld [vmem:[%s381_s0] ss:$16 sm:%s2_s15]   ;;  %s4_s19 = smov 12  ;;  %s252_s24 = smov 32  }
  0x16   :  { %v5_v43 = vld [vmem:[%s381_s0] ss:$16 sm:%s4_s19]   ;;  %v225_v44 = vld [vmem:[%s381_s0 + $0x1] ss:$16 sm:%s182_s14]   ;;  %s253_s0 = smov 24   ;;  %s254_s27 = smov 16  }
  0x17   :  { %v7_v45 = vsel %vm6_vm0, %v5_v43, %v3_v40  ;;  %v185_v47 = vsel %vm6_vm0, %v225_v44, %v224_v42  ;;  %s255_s28 = smov 8   ;;  %vm188_vm0 = vcmask 130112  }
  0x18   :  { %138 = vrot.lane.b32.xlu0 %v137_v34, %s251_s16  ;;  %9 = vst.msk [vmem:[#allocation0] sm:$0xf] %vm8_vm1, %v7_v45  }
  0x19   :  { %150 = vrot.lane.b32.xlu1 %v149_v37, %s252_s24 }
  0x1c   :  { %162 = vrot.lane.b32.xlu0 %v161_v41, %s253_s0 }
  0x1d   :  { %174 = vrot.lane.b32.xlu1 %v173_v46, %s254_s27 }
  0x20   :  { %186 = vrot.lane.b32.xlu0 %v185_v47, %s255_s28 }
  0x76   :  { %v19_v48 = vpop.permute.xlu0 %18  }
  0x77   :  { %21 = vst.msk [vmem:[#allocation0] sm:$0xf] %vm20_vm2, %v19_v48   ;;  %v43_v49 = vpop.permute.xlu1 %42  }
  0x7a   :  { %v31_v50 = vpop.permute.xlu0 %30  }
  0x7b   :  { %33 = vst.msk [vmem:[#allocation0] sm:$0xf] %vm32_vm3, %v31_v50   ;;  %v55_v51 = vpop.permute.xlu1 %54  }
  0x7c   :  { %45 = vst.msk [vmem:[#allocation0] sm:$0xf] %vm44_vm4, %v43_v49  }
  0x7d   :  { %57 = vst.msk [vmem:[#allocation0] sm:$0xf] %vm56_vm5, %v55_v51  }
  0x7e   :  { %v67_v52 = vpop.permute.xlu0 %66  }
  0x7f   :  { %69 = vst.msk [vmem:[#allocation0] sm:$0xf] %vm68_vm6, %v67_v52   ;;  %v79_v53 = vpop.permute.xlu1 %78  }
  0x80   :  { %81 = vst.msk [vmem:[#allocation0] sm:$0xf] %vm80_vm7, %v79_v53  }
  0x82   :  { %v91_v54 = vpop.permute.xlu0 %90  }
  0x83   :  { %93 = vst.msk [vmem:[#allocation0] sm:$0xf] %vm92_vm8, %v91_v54   ;;  %v103_v55 = vpop.permute.xlu1 %102  }
  0x84   :  { %105 = vst.msk [vmem:[#allocation0] sm:$0xf] %vm104_vm9, %v103_v55  }
  0x86   :  { %v115_v56 = vpop.permute.xlu0 %114  }
  0x87   :  { %117 = vst.msk [vmem:[#allocation0] sm:$0xf] %vm116_vm10, %v115_v56   ;;  %v127_v57 = vpop.permute.xlu1 %126  }
  0x88   :  { %129 = vst.msk [vmem:[#allocation0] sm:$0xf] %vm128_vm11, %v127_v57  }
  0x8a   :  { %v139_v58 = vpop.permute.xlu0 %138  }
  0x8b   :  { %141 = vst.msk [vmem:[#allocation0] sm:$0xf] %vm140_vm12, %v139_v58   ;;  %v151_v59 = vpop.permute.xlu1 %150  }
  0x8c   :  { %153 = vst.msk [vmem:[#allocation0] sm:$0xf] %vm152_vm13, %v151_v59  }
  0x8e   :  { %v163_v60 = vpop.permute.xlu0 %162  }
  0x8f   :  { %165 = vst.msk [vmem:[#allocation0] sm:$0xf] %vm164_vm14, %v163_v60   ;;  %v175_v61 = vpop.permute.xlu1 %174  }
  0x90   :  { %177 = vst.msk [vmem:[#allocation0] sm:$0xf] %vm176_vm15, %v175_v61  }
  0x92   :  { %v187_v62 = vpop.permute.xlu0 %186  }
  0x93   :  { %189 = vst.msk [vmem:[#allocation0] sm:$0xf] %vm188_vm0, %v187_v62  }
  0x9a   :  { %v193_v63 = vld [vmem:[#allocation0] sm:$0xf] }
  0x9b   :  { %195 = vst [vmem:[%s382_s1] sm:$0xf] %v193_v63 }

// kernel: tile.19
= control target key start
LH: loop header
LB: loop body
LE: loop exit
PB: predicated region body
PF: predicated region fallthrough
CT: control target
= control target key end

     0   :  { %vm6_vm0 = vcmask 1043458   ;;  %vm10_vm1 = vcmask 1045508   ;;  %vm14_vm2 = vcmask 1047558   ;;  %s19_s6 = smov 3  ;;  %s22_s7 = smov 12  ;;  %vm16_vm3 = vcmask 64512   ;;  %s736_s0 = inlined_call_operand.vmem [shape: f32[8,16,8], index: 0, kind: input, shape index: {}]   ;;  %s737_s1 = inlined_call_operand.vmem [shape: f32[8,128], index: 1, kind: output, shape index: {}]  }
   0x1   :  { %v348_v0 = vld [vmem:[%s736_s0 + $0xf] ss:$16 sm:%s19_s6]   ;;  %s27_s12 = smov 48  ;;  %s32_s13 = smov 192  ;;  %vm38_vm4 = vcmask 1048512   ;;  %vm60_vm5 = vcmask 982912  }
   0x2   :  { %v349_v1 = vld [vmem:[%s736_s0 + $0xf] ss:$16 sm:%s22_s7]   ;;  %s63_s18 = smov 3  ;;  %s66_s21 = smov 12  ;;  %vm82_vm6 = vcmask 917312   ;;  %vm104_vm7 = vcmask 851712  }
   0x3   :  { %v25_v2 = vsel %vm6_vm0, %v349_v1, %v348_v0  ;;  %v350_v3 = vld [vmem:[%s736_s0 + $0xf] ss:$16 sm:%s27_s12]   ;;  %v356_v6 = vld [vmem:[%s736_s0 + $0xd] ss:$16 sm:%s63_s18]   ;;  %s71_s22 = smov 48  ;;  %s76_s27 = smov 192 }
   0x4   :  { %v351_v4 = vld [vmem:[%s736_s0 + $0xf] ss:$16 sm:%s32_s13]   ;;  %v30_v5 = vsel %vm10_vm1, %v350_v3, %v25_v2  ;;  %v357_v8 = vld [vmem:[%s736_s0 + $0xd] ss:$16 sm:%s66_s21]   ;;  %s423_s28 = smov 120   ;;  %s41_s2 = smov 3 }
   0x5   :  { %v35_v7 = vsel %vm14_vm2, %v351_v4, %v30_v5  ;;  %v358_v9 = vld [vmem:[%s736_s0 + $0xd] ss:$16 sm:%s71_s22]   ;;  %v69_v10 = vsel %vm6_vm0, %v357_v8, %v356_v6  ;;  %s44_s3 = smov 12  ;;  %v352_v13 = vld [vmem:[%s736_s0 + $0xe] ss:$16 sm:%s41_s2]   ;;  %s49_s8 = smov 48 }
   0x6   :  { %36 = vrot.lane.b32.xlu0 %v35_v7, %s423_s28  ;;  %v359_v11 = vld [vmem:[%s736_s0 + $0xd] ss:$16 sm:%s76_s27]   ;;  %v74_v12 = vsel %vm10_vm1, %v358_v9, %v69_v10  ;;  %s54_s9 = smov 192  ;;  %s85_s14 = smov 3  ;;  %vm126_vm8 = vcmask 786112   ;;  %vm148_vm9 = vcmask 720512  }
   0x7   :  { %v353_v14 = vld [vmem:[%s736_s0 + $0xe] ss:$16 sm:%s44_s3]   ;;  %v79_v15 = vsel %vm14_vm2, %v359_v11, %v74_v12  ;;  %s424_s15 = smov 104   ;;  %v360_v20 = vld [vmem:[%s736_s0 + $0xc] ss:$16 sm:%s85_s14]   ;;  %s88_s18 = smov 12 }
   0x8   :  { %v47_v16 = vsel %vm6_vm0, %v353_v14, %v352_v13  ;;  %v354_v17 = vld [vmem:[%s736_s0 + $0xe] ss:$16 sm:%s49_s8]   ;;  %80 = vrot.lane.b32.xlu1 %v79_v15, %s424_s15  ;;  %s93_s19 = smov 48  ;;  %s98_s24 = smov 192  ;;  %vm170_vm10 = vcmask 654912   ;;  %vm192_vm11 = vcmask 589312  }
   0x9   :  { %v355_v18 = vld [vmem:[%s736_s0 + $0xe] ss:$16 sm:%s54_s9]   ;;  %v52_v19 = vsel %vm10_vm1, %v354_v17, %v47_v16  ;;  %v361_v22 = vld [vmem:[%s736_s0 + $0xc] ss:$16 sm:%s88_s18]   ;;  %s425_s25 = smov 112   ;;  %s107_s28 = smov 3 }
   0xa   :  { %v57_v21 = vsel %vm14_vm2, %v355_v18, %v52_v19  ;;  %v362_v23 = vld [vmem:[%s736_s0 + $0xc] ss:$16 sm:%s93_s19]   ;;  %v91_v24 = vsel %vm6_vm0, %v361_v22, %v360_v20  ;;  %s110_s29 = smov 12  ;;  %v364_v27 = vld [vmem:[%s736_s0 + $0xb] ss:$16 sm:%s107_s28]   ;;  %s115_s5 = smov 48 }
   0xb   :  { %58 = vrot.lane.b32.xlu0 %v57_v21, %s425_s25  ;;  %v363_v25 = vld [vmem:[%s736_s0 + $0xc] ss:$16 sm:%s98_s24]   ;;  %v96_v26 = vsel %vm10_vm1, %v362_v23, %v91_v24  ;;  %s120_s6 = smov 192  ;;  %s129_s11 = smov 3  ;;  %vm214_vm12 = vcmask 523712   ;;  %vm236_vm13 = vcmask 458112  }
   0xc   :  { %v365_v28 = vld [vmem:[%s736_s0 + $0xb] ss:$16 sm:%s110_s29]   ;;  %v101_v29 = vsel %vm14_vm2, %v363_v25, %v96_v26  ;;  %s426_s12 = smov 96   ;;  %v368_v34 = vld [vmem:[%s736_s0 + $0xa] ss:$16 sm:%s129_s11]   ;;  %s132_s15 = smov 12 }
   0xd   :  { %v113_v30 = vsel %vm6_vm0, %v365_v28, %v364_v27  ;;  %v366_v31 = vld [vmem:[%s736_s0 + $0xb] ss:$16 sm:%s115_s5]   ;;  %102 = vrot.lane.b32.xlu1 %v101_v29, %s426_s12  ;;  %s137_s16 = smov 48  ;;  %s142_s21 = smov 192  ;;  %vm258_vm14 = vcmask 392512   ;;  %vm280_vm15 = vcmask 326912  }
   0xe   :  { %v367_v32 = vld [vmem:[%s736_s0 + $0xb] ss:$16 sm:%s120_s6]   ;;  %v118_v33 = vsel %vm10_vm1, %v366_v31, %v113_v30  ;;  %v369_v36 = vld [vmem:[%s736_s0 + $0xa] ss:$16 sm:%s132_s15]   ;;  %s427_s22 = smov 88   ;;  %s151_s25 = smov 3 }
   0xf   :  { %v123_v35 = vsel %vm14_vm2, %v367_v32, %v118_v33  ;;  %v370_v37 = vld [vmem:[%s736_s0 + $0xa] ss:$16 sm:%s137_s16]   ;;  %v135_v38 = vsel %vm6_vm0, %v369_v36, %v368_v34  ;;  %s154_s26 = smov 12  ;;  %v372_v41 = vld [vmem:[%s736_s0 + $0x9] ss:$16 sm:%s151_s25]   ;;  %s159_s2 = smov 48 }
  0x10   :  { %124 = vrot.lane.b32.xlu0 %v123_v35, %s427_s22  ;;  %v371_v39 = vld [vmem:[%s736_s0 + $0xa] ss:$16 sm:%s142_s21]   ;;  %v140_v40 = vsel %vm10_vm1, %v370_v37, %v135_v38  ;;  %s164_s3 = smov 192  ;;  %s173_s8 = smov 3 }
  0x11   :  { %v373_v42 = vld [vmem:[%s736_s0 + $0x9] ss:$16 sm:%s154_s26]   ;;  %v145_v43 = vsel %vm14_vm2, %v371_v39, %v140_v40  ;;  %s428_s9 = smov 80   ;;  %v376_v48 = vld [vmem:[%s736_s0 + $0x8] ss:$16 sm:%s173_s8]   ;;  %s176_s12 = smov 12 }
  0x12   :  { %v157_v44 = vsel %vm6_vm0, %v373_v42, %v372_v41  ;;  %v374_v45 = vld [vmem:[%s736_s0 + $0x9] ss:$16 sm:%s159_s2]   ;;  %146 = vrot.lane.b32.xlu1 %v145_v43, %s428_s9  ;;  %s181_s13 = smov 48  ;;  %s186_s18 = smov 192 }
  0x13   :  { %v375_v46 = vld [vmem:[%s736_s0 + $0x9] ss:$16 sm:%s164_s3]   ;;  %v162_v47 = vsel %vm10_vm1, %v374_v45, %v157_v44  ;;  %v377_v50 = vld [vmem:[%s736_s0 + $0x8] ss:$16 sm:%s176_s12]   ;;  %s429_s19 = smov 72   ;;  %s195_s22 = smov 3 }
  0x14   :  { %v167_v49 = vsel %vm14_vm2, %v375_v46, %v162_v47  ;;  %v378_v51 = vld [vmem:[%s736_s0 + $0x8] ss:$16 sm:%s181_s13]   ;;  %v179_v52 = vsel %vm6_vm0, %v377_v50, %v376_v48  ;;  %s198_s23 = smov 12  ;;  %v380_v55 = vld [vmem:[%s736_s0 + $0x7] ss:$16 sm:%s195_s22]   ;;  %s203_s28 = smov 48 }
  0x15   :  { %168 = vrot.lane.b32.xlu0 %v167_v49, %s429_s19  ;;  %v379_v53 = vld [vmem:[%s736_s0 + $0x8] ss:$16 sm:%s186_s18]   ;;  %v184_v54 = vsel %vm10_vm1, %v378_v51, %v179_v52  ;;  %s208_s29 = smov 192  ;;  %s217_s5 = smov 3 }
  0x16   :  { %v381_v56 = vld [vmem:[%s736_s0 + $0x7] ss:$16 sm:%s198_s23]   ;;  %v189_v57 = vsel %vm14_vm2, %v379_v53, %v184_v54  ;;  %s430_s6 = smov 64   ;;  %v384_v62 = vld [vmem:[%s736_s0 + $0x6] ss:$16 sm:%s217_s5]   ;;  %s220_s9 = smov 12 }
  0x17   :  { %v201_v58 = vsel %vm6_vm0, %v381_v56, %v380_v55  ;;  %v382_v59 = vld [vmem:[%s736_s0 + $0x7] ss:$16 sm:%s203_s28]   ;;  %190 = vrot.lane.b32.xlu1 %v189_v57, %s430_s6  ;;  %s225_s10 = smov 48  ;;  %s230_s15 = smov 192 }
  0x18   :  { %v383_v60 = vld [vmem:[%s736_s0 + $0x7] ss:$16 sm:%s208_s29]   ;;  %v206_v61 = vsel %vm10_vm1, %v382_v59, %v201_v58  ;;  %v385_v0 = vld [vmem:[%s736_s0 + $0x6] ss:$16 sm:%s220_s9]   ;;  %s431_s16 = smov 56   ;;  %s239_s19 = smov 3 }
  0x19   :  { %v211_v63 = vsel %vm14_vm2, %v383_v60, %v206_v61  ;;  %v386_v1 = vld [vmem:[%s736_s0 + $0x6] ss:$16 sm:%s225_s10]   ;;  %v223_v2 = vsel %vm6_vm0, %v385_v0, %v384_v62  ;;  %s242_s20 = smov 12  ;;  %v388_v5 = vld [vmem:[%s736_s0 + $0x5] ss:$16 sm:%s239_s19]   ;;  %s247_s25 = smov 48 }
  0x1a   :  { %212 = vrot.lane.b32.xlu0 %v211_v63, %s431_s16  ;;  %v387_v3 = vld [vmem:[%s736_s0 + $0x6] ss:$16 sm:%s230_s15]   ;;  %v228_v4 = vsel %vm10_vm1, %v386_v1, %v223_v2  ;;  %s252_s26 = smov 192  ;;  %s261_s2 = smov 3 }
  0x1b   :  { %v389_v6 = vld [vmem:[%s736_s0 + $0x5] ss:$16 sm:%s242_s20]   ;;  %v233_v7 = vsel %vm14_vm2, %v387_v3, %v228_v4  ;;  %s432_s3 = smov 48   ;;  %v392_v12 = vld [vmem:[%s736_s0 + $0x4] ss:$16 sm:%s261_s2]   ;;  %s264_s6 = smov 12 }
  0x1c   :  { %v245_v8 = vsel %vm6_vm0, %v389_v6, %v388_v5  ;;  %v390_v9 = vld [vmem:[%s736_s0 + $0x5] ss:$16 sm:%s247_s25]   ;;  %234 = vrot.lane.b32.xlu1 %v233_v7, %s432_s3  ;;  %s269_s7 = smov 48  ;;  %s274_s12 = smov 192 }
  0x1d   :  { %v391_v10 = vld [vmem:[%s736_s0 + $0x5] ss:$16 sm:%s252_s26]   ;;  %v250_v11 = vsel %vm10_vm1, %v390_v9, %v245_v8  ;;  %v393_v14 = vld [vmem:[%s736_s0 + $0x4] ss:$16 sm:%s264_s6]   ;;  %s433_s13 = smov 40   ;;  %s283_s16 = smov 3 }
  0x1e   :  { %v255_v13 = vsel %vm14_vm2, %v391_v10, %v250_v11  ;;  %v394_v15 = vld [vmem:[%s736_s0 + $0x4] ss:$16 sm:%s269_s7]   ;;  %v267_v16 = vsel %vm6_vm0, %v393_v14, %v392_v12  ;;  %s286_s17 = smov 12  ;;  %v396_v19 = vld [vmem:[%s736_s0 + $0x3] ss:$16 sm:%s283_s16]   ;;  %s291_s22 = smov 48 }
  0x1f   :  { %256 = vrot.lane.b32.xlu0 %v255_v13, %s433_s13  ;;  %v395_v17 = vld [vmem:[%s736_s0 + $0x4] ss:$16 sm:%s274_s12]   ;;  %v272_v18 = vsel %vm10_vm1, %v394_v15, %v267_v16  ;;  %s296_s23 = smov 192  ;;  %s305_s28 = smov 3 }
  0x20   :  { %v397_v20 = vld [vmem:[%s736_s0 + $0x3] ss:$16 sm:%s286_s17]   ;;  %v277_v21 = vsel %vm14_vm2, %v395_v17, %v272_v18  ;;  %s434_s29 = smov 32   ;;  %v400_v26 = vld [vmem:[%s736_s0 + $0x2] ss:$16 sm:%s305_s28]   ;;  %s308_s3 = smov 12 }
  0x21   :  { %v289_v22 = vsel %vm6_vm0, %v397_v20, %v396_v19  ;;  %v398_v23 = vld [vmem:[%s736_s0 + $0x3] ss:$16 sm:%s291_s22]   ;;  %278 = vrot.lane.b32.xlu1 %v277_v21, %s434_s29  ;;  %s313_s4 = smov 48  ;;  %s318_s9 = smov 192 }
  0x22   :  { %v399_v24 = vld [vmem:[%s736_s0 + $0x3] ss:$16 sm:%s296_s23]   ;;  %v294_v25 = vsel %vm10_vm1, %v398_v23, %v289_v22  ;;  %v401_v28 = vld [vmem:[%s736_s0 + $0x2] ss:$16 sm:%s308_s3]   ;;  %s435_s10 = smov 24   ;;  %s327_s13 = smov 3 }
  0x23   :  { %v299_v27 = vsel %vm14_vm2, %v399_v24, %v294_v25  ;;  %v402_v29 = vld [vmem:[%s736_s0 + $0x2] ss:$16 sm:%s313_s4]   ;;  %v311_v30 = vsel %vm6_vm0, %v401_v28, %v400_v26  ;;  %s330_s14 = smov 12  ;;  %v404_v33 = vld [vmem:[%s736_s0 + $0x1] ss:$16 sm:%s327_s13]   ;;  %s335_s19 = smov 48 }
  0x24   :  { %300 = vrot.lane.b32.xlu0 %v299_v27, %s435_s10  ;;  %v403_v31 = vld [vmem:[%s736_s0 + $0x2] ss:$16 sm:%s318_s9]   ;;  %v316_v32 = vsel %vm10_vm1, %v402_v29, %v311_v30  ;;  %s340_s20 = smov 192  ;;  %s2_s25 = smov 3 }
  0x25   :  { %v405_v34 = vld [vmem:[%s736_s0 + $0x1] ss:$16 sm:%s330_s14]   ;;  %v321_v35 = vsel %vm14_vm2, %v403_v31, %v316_v32  ;;  %s436_s26 = smov 16   ;;  %s4_s27 = smov 12  ;;  %v3_v40 = vld [vmem:[%s736_s0] ss:$16 sm:%s2_s25]  }
  0x26   :  { %v333_v36 = vsel %vm6_vm0, %v405_v34, %v404_v33  ;;  %v406_v37 = vld [vmem:[%s736_s0 + $0x1] ss:$16 sm:%s335_s19]   ;;  %322 = vrot.lane.b32.xlu1 %v321_v35, %s436_s26  ;;  %s8_s28 = smov 48  ;;  %s12_s2 = smov 192 }
  0x27   :  { %v407_v38 = vld [vmem:[%s736_s0 + $0x1] ss:$16 sm:%s340_s20]   ;;  %v338_v39 = vsel %vm10_vm1, %v406_v37, %v333_v36  ;;  %v5_v42 = vld [vmem:[%s736_s0] ss:$16 sm:%s4_s27]   ;;  %s437_s7 = smov 8  }
  0x28   :  { %v343_v41 = vsel %vm14_vm2, %v407_v38, %v338_v39  ;;  %v9_v43 = vld [vmem:[%s736_s0] ss:$16 sm:%s8_s28]   ;;  %v7_v44 = vsel %vm6_vm0, %v5_v42, %v3_v40  ;;  %vm302_vm0 = vcmask 261312  }
  0x29   :  { %344 = vrot.lane.b32.xlu0 %v343_v41, %s437_s7  ;;  %v13_v45 = vld [vmem:[%s736_s0] ss:$16 sm:%s12_s2]   ;;  %v11_v46 = vsel %vm10_vm1, %v9_v43, %v7_v44  ;;  %vm324_vm1 = vcmask 195712  }
  0x2a   :  { %v15_v47 = vsel %vm14_vm2, %v13_v45, %v11_v46  ;;  %vm346_vm2 = vcmask 130112  }
  0x2b   :  { %17 = vst.msk [vmem:[%s737_s1] sm:$0xff] %vm16_vm3, %v15_v47  }
  0x78   :  { %v37_v48 = vpop.permute.xlu0 %36  }
  0x79   :  { %39 = vst.msk [vmem:[%s737_s1] sm:$0xff] %vm38_vm4, %v37_v48  }
  0x7a   :  { %v81_v49 = vpop.permute.xlu1 %80  }
  0x7d   :  { %v59_v50 = vpop.permute.xlu0 %58  }
  0x7e   :  { %61 = vst.msk [vmem:[%s737_s1] sm:$0xff] %vm60_vm5, %v59_v50  }
  0x7f   :  { %83 = vst.msk [vmem:[%s737_s1] sm:$0xff] %vm82_vm6, %v81_v49   ;;  %v103_v51 = vpop.permute.xlu1 %102  }
  0x80   :  { %105 = vst.msk [vmem:[%s737_s1] sm:$0xff] %vm104_vm7, %v103_v51  }
  0x82   :  { %v125_v52 = vpop.permute.xlu0 %124  }
  0x83   :  { %127 = vst.msk [vmem:[%s737_s1] sm:$0xff] %vm126_vm8, %v125_v52  }
  0x84   :  { %v147_v53 = vpop.permute.xlu1 %146  }
  0x85   :  { %149 = vst.msk [vmem:[%s737_s1] sm:$0xff] %vm148_vm9, %v147_v53  }
  0x87   :  { %v169_v54 = vpop.permute.xlu0 %168  }
  0x88   :  { %171 = vst.msk [vmem:[%s737_s1] sm:$0xff] %vm170_vm10, %v169_v54  }
  0x89   :  { %v191_v55 = vpop.permute.xlu1 %190  }
  0x8a   :  { %193 = vst.msk [vmem:[%s737_s1] sm:$0xff] %vm192_vm11, %v191_v55  }
  0x8c   :  { %v213_v56 = vpop.permute.xlu0 %212  }
  0x8d   :  { %215 = vst.msk [vmem:[%s737_s1] sm:$0xff] %vm214_vm12, %v213_v56  }
  0x8e   :  { %v235_v57 = vpop.permute.xlu1 %234  }
  0x8f   :  { %237 = vst.msk [vmem:[%s737_s1] sm:$0xff] %vm236_vm13, %v235_v57  }
  0x91   :  { %v257_v58 = vpop.permute.xlu0 %256  }
  0x92   :  { %259 = vst.msk [vmem:[%s737_s1] sm:$0xff] %vm258_vm14, %v257_v58  }
  0x93   :  { %v279_v59 = vpop.permute.xlu1 %278  }
  0x94   :  { %281 = vst.msk [vmem:[%s737_s1] sm:$0xff] %vm280_vm15, %v279_v59  }
  0x96   :  { %v301_v60 = vpop.permute.xlu0 %300  }
  0x97   :  { %303 = vst.msk [vmem:[%s737_s1] sm:$0xff] %vm302_vm0, %v301_v60  }
  0x98   :  { %v323_v61 = vpop.permute.xlu1 %322  }
  0x99   :  { %325 = vst.msk [vmem:[%s737_s1] sm:$0xff] %vm324_vm1, %v323_v61  }
  0x9b   :  { %v345_v62 = vpop.permute.xlu0 %344  }
  0x9c   :  { %347 = vst.msk [vmem:[%s737_s1] sm:$0xff] %vm346_vm2, %v345_v62  }

// kernel: standard_block_forward.5
= control target key start
LH: loop header
LB: loop body
LE: loop exit
PB: predicated region body
PF: predicated region fallthrough
CT: control target
= control target key end

     0   :  { %v40_v4 = vlaneseq  ;;  %s190_s2 = inlined_call_operand.vmem [shape: f32[4,128], index: 2, kind: input, shape index: {}]   ;;  %s191_s3 = inlined_call_operand.vmem [shape: f32[8,128], index: 3, kind: input, shape index: {}]   ;;  %s192_s0 = inlined_call_operand.vmem [shape: f32[32,128], index: 0, kind: input, shape index: {}]   ;;  %s193_s1 = inlined_call_operand.vmem [shape: f32[32,128], index: 1, kind: input, shape index: {}]   ;;  %s194_s4 = inlined_call_operand.vmem [shape: f32[32,128], index: 4, kind: output, shape index: {}]  }
   0x1   :  { %v17_v0 = vld [vmem:[%s190_s2] sm:$0xf]  ;;  %v31_v11 = vld [vmem:[%s191_s3 + $0x4] sm:$0x1]  ;;  %v37_v18 = vld [vmem:[%s192_s0 + $0x8] sm:$0xff] }
   0x2   :  { %v18_v1 = vmul.f32 0.001953125, %v17_v0  ;;  %v41_v7 = vshrl.u32 %v40_v4, 7  ;;  %v26_v10 = vld [vmem:[%s191_s3 + $0x2] sm:$0x1]  ;;  %v33_v15 = vrot.slane %v31_v11, 5  ;;  %v66_v19 = vld [vmem:[%s193_s1 + $0x8] sm:$0xff] }
   0x3   :  { %v28_v14 = vrot.slane %v26_v10, 7  ;;  %v36_v16 = vld [vmem:[%s192_s0] sm:$0xff]  ;;  %v38_v20 = vld [vmem:[%s192_s0 + $0x10] sm:$0xff]  ;;  %v39_v24 = vld [vmem:[%s192_s0 + $0x18] sm:$0xff] }
   0x4   :  { %v19_v2 = vmul.f32 %v18_v1, %v18_v1  ;;  %v42_v8 = vsub.s32 0, %v41_v7  ;;  %v71_v9 = vsub.s32 2, %v41_v7  ;;  %v65_v17 = vld [vmem:[%s193_s1] sm:$0xff]  ;;  %v50_v21 = vsub.s32 1, %v41_v7  ;;  %v67_v23 = vld [vmem:[%s193_s1 + $0x10] sm:$0xff]  ;;  %v68_v25 = vld [vmem:[%s193_s1 + $0x18] sm:$0xff] }
   0x5   :  { %v79_v22 = vsub.s32 3, %v41_v7  ;;  %v110_v39 = vld [vmem:[%s191_s3 + $0x3] ss:$0 sm:$0xff]  ;;  %v111_v40 = vld [vmem:[%s191_s3 + $0x5] ss:$0 sm:$0xff] }
   0x6   :  { %v21_v3 = vrot.slane %v19_v2, 7  ;;  %v43_v12 = vrot.slane %v18_v1, %v42_v8  ;;  %v72_v13 = vrot.slane %v18_v1, %v71_v9 }
   0x8   :  { %v23_v5 = vsub.f32 %v18_v1, %v21_v3  ;;  %v44_v27 = vsub.f32 %v36_v16, %v43_v12  ;;  %v73_v28 = vsub.f32 %v65_v17, %v72_v13  ;;  %v45_v31 = vsub.f32 %v37_v18, %v43_v12 }
   0x9   :  { %v74_v32 = vsub.f32 %v66_v19, %v72_v13  ;;  %v46_v33 = vsub.f32 %v38_v20, %v43_v12  ;;  %v75_v34 = vsub.f32 %v67_v23, %v72_v13  ;;  %v47_v35 = vsub.f32 %v39_v24, %v43_v12 }
   0xa   :  { %v24_v6 = vadd.f32 1e-05, %v23_v5  ;;  %v76_v36 = vsub.f32 %v68_v25, %v72_v13 }
   0xc   :  { %112 = vrsqrt.f32 %v24_v6 }
  0x16   :  { %v113_v26 = vpop.eup %112 }
  0x17   :  { %v30_v29 = vmul.f32 %v113_v26, %v28_v14  ;;  %v35_v30 = vmul.f32 %v113_v26, %v33_v15 }
  0x19   :  { %v51_v37 = vrot.slane %v30_v29, %v50_v21  ;;  %v80_v38 = vrot.slane %v35_v30, %v79_v22 }
  0x1b   :  { %v52_v41 = vmul.f32 %v51_v37, %v44_v27  ;;  %v81_v42 = vmul.f32 %v80_v38, %v73_v28  ;;  %v53_v43 = vmul.f32 %v51_v37, %v45_v31  ;;  %v82_v44 = vmul.f32 %v80_v38, %v74_v32 }
  0x1c   :  { %v54_v45 = vmul.f32 %v51_v37, %v46_v33  ;;  %v83_v46 = vmul.f32 %v80_v38, %v75_v34  ;;  %v55_v47 = vmul.f32 %v51_v37, %v47_v35  ;;  %v84_v48 = vmul.f32 %v80_v38, %v76_v36 }
  0x1d   :  { %v61_v49 = vadd.f32 %v110_v39, %v52_v41  ;;  %v90_v50 = vadd.f32 %v111_v40, %v81_v42  ;;  %v62_v51 = vadd.f32 %v110_v39, %v53_v43  ;;  %v91_v52 = vadd.f32 %v111_v40, %v82_v44 }
  0x1e   :  { %v63_v53 = vadd.f32 %v110_v39, %v54_v45  ;;  %v92_v54 = vadd.f32 %v111_v40, %v83_v46  ;;  %v64_v55 = vadd.f32 %v110_v39, %v55_v47  ;;  %v93_v56 = vadd.f32 %v111_v40, %v84_v48 }
  0x1f   :  { %v94_v57 = vadd.f32 %v90_v50, %v61_v49  ;;  %v95_v58 = vadd.f32 %v91_v52, %v62_v51 }
  0x20   :  { %v96_v59 = vadd.f32 %v92_v54, %v63_v53  ;;  %v97_v60 = vadd.f32 %v93_v56, %v64_v55 }
  0x21   :  { %v98_v61 = vmax.f32 %v94_v57, 0.0  ;;  %v99_v62 = vmax.f32 %v95_v58, 0.0 }
  0x22   :  { %v100_v63 = vmax.f32 %v96_v59, 0.0  ;;  %v101_v0 = vmax.f32 %v97_v60, 0.0 }
  0x23   :  { %102 = vst [vmem:[%s194_s4] sm:$0xff] %v98_v61  ;;  %103 = vst [vmem:[%s194_s4 + $0x8] sm:$0xff] %v99_v62 }
  0x24   :  { %104 = vst [vmem:[%s194_s4 + $0x10] sm:$0xff] %v100_v63  ;;  %105 = vst [vmem:[%s194_s4 + $0x18] sm:$0xff] %v101_v0 }

// kernel: standard_block_forward.3
= control target key start
LH: loop header
LB: loop body
LE: loop exit
PB: predicated region body
PF: predicated region fallthrough
CT: control target
= control target key end

     0   :  { %s4154_s12 = smov 0   ;;  %s4887_s0 = inlined_call_operand.vmem [shape: f32[2,18,18,4], index: 0, kind: input, shape index: {}]   ;;  %s4888_s1 = inlined_call_operand.vmem [shape: bf16[9,4,8], index: 1, kind: input, shape index: {}]   ;;  %s4889_s2 = inlined_call_operand.vmem [shape: f32[2,16,16,8], index: 2, kind: output, shape index: {0}]   ;;  %s4890_s3 = inlined_call_operand.vmem [shape: f32[2,8], index: 3, kind: output, shape index: {1}]  }
   0x1 LB: > { %s3032_s13 = sadd.s32 4294967295, %s4131_s12   ;;  %p3036_p0 = scmp.ge.s32.totalorder %s4131_s12, 1  ;;  %s4131_s12 = sphi %s4154_s12, %s14_s12  }
   0x2   : > { %p135_p1 = scmp.lt.s32.totalorder %s4131_s12, 3 }
   0x4   : > { %p136_p2 = pnand %p3036_p0, %p135_p1 }
   0x5   : > { %p159_p3 = scmp.lt.s32.totalorder (!%p136_p2), %s3032_s13, 1  ;;  %p3040_p4 = scmp.ne.s32.totalorder (!%p136_p2), %s3032_s13, 0 }
   0x6   : > { %139 = sbr.rel (%p136_p2) target bundleno = 548 (0x224), region = 28 }
   0xd   : > { %s160_s14 = scalar_select %p159_p3, %s3032_s13, 1 }
   0xe   : > { %173 = sbr.rel (%p3040_p4) target bundleno = 21 (0x15), region = 32  ;;  %vm174_vm0 = vcmask (!%p3040_p4), 58368   ;;  %v4133_v0 = vmov (!%p3040_p4), 0.0  }
   0xf   : > { %s4115_s15 = smul.u32 432, %s160_s14  ;;  %s3387_s16 = sshll.u32 %s160_s14, 8  ;;  %175 = vst.msk [vmem:[%s4890_s3] sm:$0x3] (!%p3040_p4), %vm174_vm0, %v4133_v0 }
  0x10   : > { %s4165_s19 = scalar_lea.vmem %s4889_s2, %s3387_s16 }
  0x11   : > { %s4170_s22 = scalar_lea.vmem %s4887_s0, %s4115_s15 }
  0x15 PF: > { %v3041_v1 = vld [vmem:[%s4888_s1 + $0x2] sm:$0x3]  ;;  %vm324_vm1 = vcmask 1041408   ;;  %v4181_v2 = vld [vmem:[%s4888_s1 + $0x8] sm:$0x3]  ;;  %vm275_vm2 = vcmask 31744  }
  0x16   : > { %v225_v3 = vld [vmem:[%s4170_s22 + $0x1] sm:$0xff]  ;;  %4105 = vmatprep.subr.msk.bf16.mxu1 %vm324_vm1, %v3041_v1  ;;  %4109 = vmatprep.subr.msk.bf16.mxu0 %vm324_vm1, %v4181_v2  ;;  %v326_v4 = vsel %vm324_vm1, %v3041_v1, 0  ;;  %v4190_v5 = vsel %vm324_vm1, %v4181_v2, 0  ;;  %v226_v6 = vld [vmem:[%s4170_s22 + $0x9] sm:$0xff]  ;;  %v3140_v7 = vld [vmem:[%s4170_s22 + $0x19] sm:$0xff]  ;;  %vm2761_vm3 = vcmask 64512  }
  0x17   : > { %v3141_v8 = vld [vmem:[%s4170_s22 + $0x21] sm:$0xff]  ;;  %3542 = vmatpush3.bf16.msra.mxu1 %v326_v4  ;;  %3678 = vmatpush3.bf16.msra.mxu0 %v4190_v5  ;;  %v257_v9 = vpack.c.bf16 %v226_v6, %v225_v3  ;;  %v3142_v12 = vld [vmem:[%s4170_s22 + $0x31] sm:$0xff]  ;;  %v3143_v13 = vld [vmem:[%s4170_s22 + $0x39] sm:$0xff]  ;;  %vm2865_vm4 = vcmask 57344  }
  0x18   : > { %v1322_v10 = vpack.c.bf16 %v3141_v8, %v3140_v7  ;;  %v224_v11 = vld [vmem:[%s4888_s1] sm:$0x3]  ;;  %v4202_v14 = vpack.c.bf16 %v3143_v13, %v3142_v12  ;;  %v3221_v15 = vld [vmem:[%s4888_s1 + $0xa] sm:$0x3]  ;;  %v3145_v18 = vld [vmem:[%s4170_s22 + $0x51] sm:$0xff] }
  0x19   : > { %4106 = vmatprep.subr.msk.bf16.mxu1 %vm324_vm1, %v224_v11  ;;  %v538_v16 = vsel %vm324_vm1, %v224_v11, 0  ;;  %v3144_v17 = vld [vmem:[%s4170_s22 + $0x49] sm:$0xff]  ;;  %3543 = vmatprep.mubr.msk.bf16.mxu1 %vm275_vm2, %v257_v9  ;;  %v1683_v19 = vsel %vm324_vm1, %v3221_v15, 0  ;;  %v3146_v21 = vld [vmem:[%s4170_s22 + $0x61] sm:$0xff]  ;;  %v3148_v23 = vld [vmem:[%s4170_s22 + $0x79] sm:$0xff] }
  0x1a   : > { %3679 = vmatprep.mubr.msk.bf16.mxu0 %vm275_vm2, %v1322_v10  ;;  %v4213_v20 = vpack.c.bf16 %v3145_v18, %v3144_v17  ;;  %3544 = vmatmul.mubr.msk.bf16.vlgmr.msra.gmra.mrb[0].mxu1 %vm275_vm2, %v1322_v10  ;;  %v3147_v22 = vld [vmem:[%s4170_s22 + $0x69] sm:$0xff]  ;;  %v3149_v24 = vld [vmem:[%s4170_s22 + $0x81] sm:$0xff]  ;;  %v3150_v28 = vld [vmem:[%s4170_s22 + $0x91] sm:$0xff] }
  0x1b   : > { %3680 = vmatmul.mubr.msk.bf16.vlgmr.msra.gmra.mrb[0].mxu0 %vm275_vm2, %v4202_v14  ;;  %4111 = vmatprep.subr.msk.bf16.mxu0 %vm324_vm1, %v3221_v15  ;;  %v4227_v25 = vpack.c.bf16 %v3147_v22, %v3146_v21  ;;  %v3270_v26 = vld [vmem:[%s4888_s1 + $0xc] sm:$0x3]  ;;  %v4232_v27 = vpack.c.bf16 %v3149_v24, %v3148_v23  ;;  %v3151_v29 = vld [vmem:[%s4170_s22 + $0x99] sm:$0xff]  ;;  %v3153_v31 = vld [vmem:[%s4170_s22 + $0xb1] sm:$0xff] }
  0x1c   : > { %3576 = vmatpush3.bf16.msra.mxu1 %v538_v16  ;;  %3712 = vmatpush3.bf16.msra.mxu0 %v1683_v19  ;;  %v3152_v30 = vld [vmem:[%s4170_s22 + $0xa9] sm:$0xff]  ;;  %v4247_v32 = vpack.c.bf16 %v3151_v29, %v3150_v28  ;;  %v4254_v34 = vld [vmem:[%s4888_s1 + $0x4] sm:$0x3]  ;;  %v3189_v37 = vld [vmem:[%s4170_s22 + $0x1a] sm:$0xff]  ;;  %v1978_v52 = vsel %vm324_vm1, %v3270_v26, 0 }
  0x1d   : > { %3547 = vmatprep.mubr.msk.bf16.mxu1 %vm275_vm2, %v4202_v14  ;;  %3683 = vmatprep.mubr.msk.bf16.mxu0 %vm275_vm2, %v4213_v20  ;;  %v4249_v33 = vpack.c.bf16 %v3153_v31, %v3152_v30  ;;  %v3154_v35 = vld [vmem:[%s4170_s22 + $0xc1] sm:$0xff]  ;;  %v3155_v36 = vld [vmem:[%s4170_s22 + $0xc9] sm:$0xff]  ;;  %v243_v41 = vld [vmem:[%s4170_s22 + $0xd9] sm:$0xff] }
  0x1e   : > { %4112 = vmatprep.subr.msk.bf16.mxu0 %vm324_vm1, %v3270_v26  ;;  %4107 = vmatprep.subr.msk.bf16.mxu1 %vm324_vm1, %v4254_v34  ;;  %v3190_v38 = vld [vmem:[%s4170_s22 + $0x22] sm:$0xff]  ;;  %v4270_v39 = vpack.c.bf16 %v3155_v36, %v3154_v35  ;;  %v3191_v43 = vld [vmem:[%s4170_s22 + $0x32] sm:$0xff]  ;;  %v3192_v44 = vld [vmem:[%s4170_s22 + $0x3a] sm:$0xff] }
  0x1f   : > { %v4272_v40 = vpack.c.bf16 %v3190_v38, %v3189_v37  ;;  %v244_v42 = vld [vmem:[%s4170_s22 + $0xe1] sm:$0xff]  ;;  %v245_v45 = vld [vmem:[%s4170_s22 + $0xf1] sm:$0xff]  ;;  %v246_v46 = vld [vmem:[%s4170_s22 + $0xf9] sm:$0xff]  ;;  %v4292_v50 = vpack.c.bf16 %v3192_v44, %v3191_v43 }
  0x20   : > { %v3193_v47 = vld [vmem:[%s4170_s22 + $0x4a] sm:$0xff]  ;;  %v3194_v48 = vld [vmem:[%s4170_s22 + $0x52] sm:$0xff]  ;;  %v4290_v49 = vpack.c.bf16 %v244_v42, %v243_v41  ;;  %v4294_v51 = vpack.c.bf16 %v246_v46, %v245_v45  ;;  %v3195_v57 = vld [vmem:[%s4170_s22 + $0x62] sm:$0xff] }
  0x21   : > { %v4297_v53 = vpack.c.bf16 %v3194_v48, %v3193_v47  ;;  %v4302_v54 = vld [vmem:[%s4888_s1 + $0xe] sm:$0x3]  ;;  %v248_v56 = vld [vmem:[%s4170_s22 + $0x111] sm:$0xff]  ;;  %v249_v59 = vld [vmem:[%s4170_s22 + $0x121] sm:$0xff] }
  0x22   : > { %3548 = vmatmul.mubr.msk.bf16.gmra.mrb[4].mxu1 %vm275_vm2, %v4213_v20  ;;  %v247_v55 = vld [vmem:[%s4170_s22 + $0x109] sm:$0xff]  ;;  %v3197_v61 = vld [vmem:[%s4170_s22 + $0x7a] sm:$0xff]  ;;  %v3199_v7 = vld [vmem:[%s4170_s22 + $0x92] sm:$0xff] }
  0x23   : > { %3684 = vmatmul.mubr.msk.bf16.gmra.mrb[4].mxu0 %vm275_vm2, %v4227_v25  ;;  %3551 = vmatprep.mubr.msk.bf16.mxu1 %vm275_vm2, %v4227_v25  ;;  %v3196_v58 = vld [vmem:[%s4170_s22 + $0x6a] sm:$0xff]  ;;  %v3198_v62 = vld [vmem:[%s4170_s22 + $0x82] sm:$0xff]  ;;  %v4322_v63 = vpack.c.bf16 %v248_v56, %v247_v55  ;;  %v251_v4 = vld [vmem:[%s4170_s22 + $0x139] sm:$0xff] }
  0x24   : > { %3687 = vmatprep.mubr.msk.bf16.mxu0 %vm275_vm2, %v4232_v27  ;;  %v250_v60 = vld [vmem:[%s4170_s22 + $0x129] sm:$0xff]  ;;  %v4324_v0 = vpack.c.bf16 %v3196_v58, %v3195_v57  ;;  %v4328_v3 = vpack.c.bf16 %v3198_v62, %v3197_v61  ;;  %v252_v6 = vld [vmem:[%s4170_s22 + $0x141] sm:$0xff]  ;;  %v253_v9 = vld [vmem:[%s4170_s22 + $0x151] sm:$0xff] }
  0x25   : > { %v4326_v1 = vpack.c.bf16 %v250_v60, %v249_v59  ;;  %v3200_v8 = vld [vmem:[%s4170_s22 + $0x9a] sm:$0xff]  ;;  %v3201_v11 = vld [vmem:[%s4170_s22 + $0xaa] sm:$0xff]  ;;  %v3202_v12 = vld [vmem:[%s4170_s22 + $0xb2] sm:$0xff]  ;;  %v4346_v13 = vpack.c.bf16 %v252_v6, %v251_v4 }
  0x26   : > { %v254_v10 = vld [vmem:[%s4170_s22 + $0x159] sm:$0xff]  ;;  %v4348_v15 = vpack.c.bf16 %v3200_v8, %v3199_v7  ;;  %v4352_v17 = vpack.c.bf16 %v3202_v12, %v3201_v11  ;;  %v255_v18 = vld [vmem:[%s4170_s22 + $0x169] sm:$0xff]  ;;  %v256_v19 = vld [vmem:[%s4170_s22 + $0x171] sm:$0xff] }
  0x27   : > { %v4350_v16 = vpack.c.bf16 %v254_v10, %v253_v9  ;;  %v3203_v21 = vld [vmem:[%s4170_s22 + $0xc2] sm:$0xff]  ;;  %v3204_v22 = vld [vmem:[%s4170_s22 + $0xca] sm:$0xff]  ;;  %v3205_v26 = vld [vmem:[%s4170_s22 + $0xda] sm:$0xff]  ;;  %v4370_v29 = vpack.c.bf16 %v256_v19, %v255_v18 }
  0x28   : > { %v176_v23 = vld [vmem:[%s4170_s22] sm:$0xff]  ;;  %v177_v24 = vld [vmem:[%s4170_s22 + $0x8] sm:$0xff]  ;;  %v4372_v30 = vpack.c.bf16 %v3204_v22, %v3203_v21  ;;  %v178_v36 = vld [vmem:[%s4170_s22 + $0x18] sm:$0xff] }
  0x29   : > { %v3206_v28 = vld [vmem:[%s4170_s22 + $0xe2] sm:$0xff]  ;;  %v208_v31 = vpack.c.bf16 %v177_v24, %v176_v23  ;;  %v3207_v38 = vld [vmem:[%s4170_s22 + $0xf2] sm:$0xff]  ;;  %v3208_v41 = vld [vmem:[%s4170_s22 + $0xfa] sm:$0xff] }
  0x2a   : > { %3552 = vmatmul.mubr.msk.bf16.gmra.mrb[8].mxu1 %vm275_vm2, %v4232_v27  ;;  %v4374_v35 = vpack.c.bf16 %v3206_v28, %v3205_v26  ;;  %v179_v37 = vld [vmem:[%s4170_s22 + $0x20] sm:$0xff]  ;;  %v180_v42 = vld [vmem:[%s4170_s22 + $0x30] sm:$0xff]  ;;  %v181_v43 = vld [vmem:[%s4170_s22 + $0x38] sm:$0xff]  ;;  %v4393_v47 = vpack.c.bf16 %v3208_v41, %v3207_v38 }
  0x2b   : > { %3688 = vmatmul.mubr.msk.bf16.gmra.mrb[8].mxu0 %vm275_vm2, %v4247_v32  ;;  %3555 = vmatprep.mubr.msk.bf16.mxu1 %vm275_vm2, %v4247_v32  ;;  %v3209_v44 = vld [vmem:[%s4170_s22 + $0x10a] sm:$0xff]  ;;  %v3210_v45 = vld [vmem:[%s4170_s22 + $0x112] sm:$0xff]  ;;  %v4391_v46 = vpack.c.bf16 %v179_v37, %v178_v36  ;;  %v4395_v48 = vpack.c.bf16 %v181_v43, %v180_v42  ;;  %v4404_v56 = vld [vmem:[%s4888_s1 + $0x6] sm:$0x3] }
  0x2c   : > { %3691 = vmatprep.mubr.msk.bf16.mxu0 %vm275_vm2, %v4249_v33  ;;  %v4399_v55 = vpack.c.bf16 %v3210_v45, %v3209_v44  ;;  %v182_v57 = vld [vmem:[%s4170_s22 + $0x48] sm:$0xff]  ;;  %v183_v58 = vld [vmem:[%s4170_s22 + $0x50] sm:$0xff]  ;;  %v184_v60 = vld [vmem:[%s4170_s22 + $0x60] sm:$0xff] }
  0x2d   : > { %v3212_v59 = vld [vmem:[%s4170_s22 + $0x12a] sm:$0xff]  ;;  %v3213_v62 = vld [vmem:[%s4170_s22 + $0x13a] sm:$0xff]  ;;  %v3214_v4 = vld [vmem:[%s4170_s22 + $0x142] sm:$0xff]  ;;  %v4424_v6 = vpack.c.bf16 %v183_v58, %v182_v57 }
  0x2e   : > { %v185_v61 = vld [vmem:[%s4170_s22 + $0x68] sm:$0xff]  ;;  %v4430_v9 = vpack.c.bf16 %v3214_v4, %v3213_v62  ;;  %v186_v10 = vld [vmem:[%s4170_s22 + $0x78] sm:$0xff]  ;;  %v187_v11 = vld [vmem:[%s4170_s22 + $0x80] sm:$0xff]  ;;  %v2272_v62 = vsel %vm324_vm1, %v4302_v54, 0 }
  0x2f   : > { %v4428_v8 = vpack.c.bf16 %v185_v61, %v184_v60  ;;  %v3215_v12 = vld [vmem:[%s4170_s22 + $0x152] sm:$0xff]  ;;  %v3216_v18 = vld [vmem:[%s4170_s22 + $0x15a] sm:$0xff]  ;;  %v3217_v22 = vld [vmem:[%s4170_s22 + $0x16a] sm:$0xff]  ;;  %v4448_v24 = vpack.c.bf16 %v187_v11, %v186_v10 }
  0x30   : > { %v188_v19 = vld [vmem:[%s4170_s22 + $0x90] sm:$0xff]  ;;  %v189_v21 = vld [vmem:[%s4170_s22 + $0x98] sm:$0xff]  ;;  %v4450_v26 = vpack.c.bf16 %v3216_v18, %v3215_v12  ;;  %v190_v36 = vld [vmem:[%s4170_s22 + $0xa8] sm:$0xff] }
  0x31   : > { %v3218_v23 = vld [vmem:[%s4170_s22 + $0x172] sm:$0xff]  ;;  %v4452_v28 = vpack.c.bf16 %v189_v21, %v188_v19  ;;  %v3219_v38 = vld [vmem:[%s4170_s22 + $0x182] sm:$0xff]  ;;  %v3220_v41 = vld [vmem:[%s4170_s22 + $0x18a] sm:$0xff] }
  0x32   : > { %3556 = vmatmul.mubr.msk.bf16.gmra.mrb[12].mxu1 %vm275_vm2, %v4249_v33  ;;  %v191_v37 = vld [vmem:[%s4170_s22 + $0xb0] sm:$0xff]  ;;  %v192_v42 = vld [vmem:[%s4170_s22 + $0xc0] sm:$0xff]  ;;  %v193_v43 = vld [vmem:[%s4170_s22 + $0xc8] sm:$0xff]  ;;  %v4472_v45 = vpack.c.bf16 %v3220_v41, %v3219_v38 }
  0x33   : > { %3692 = vmatmul.mubr.msk.bf16.gmra.mrb[12].mxu0 %vm275_vm2, %v4270_v39  ;;  %3559 = vmatprep.mubr.msk.bf16.mxu1 %vm275_vm2, %v4270_v39  ;;  %v4470_v44 = vpack.c.bf16 %v191_v37, %v190_v36  ;;  %v194_v57 = vld [vmem:[%s4170_s22 + $0xd8] sm:$0xff]  ;;  %v195_v58 = vld [vmem:[%s4170_s22 + $0xe0] sm:$0xff]  ;;  %v3368_v4 = vld [vmem:[%s4888_s1 + $0x10] sm:$0x3] }
  0x34   : > { %3713 = vmatprep.mubr.msk.bf16.mxu0 %vm275_vm2, %v4272_v40  ;;  %v4488_v60 = vpack.c.bf16 %v195_v58, %v194_v57  ;;  %v198_v10 = vld [vmem:[%s4170_s22 + $0x108] sm:$0xff]  ;;  %v200_v11 = vld [vmem:[%s4170_s22 + $0x120] sm:$0xff]  ;;  %v202_v21 = vld [vmem:[%s4170_s22 + $0x138] sm:$0xff] }
  0x35   : > { %v201_v12 = vld [vmem:[%s4170_s22 + $0x128] sm:$0xff]  ;;  %v205_v36 = vld [vmem:[%s4170_s22 + $0x158] sm:$0xff] }
  0x36   : > { %v4512_v19 = vpack.c.bf16 %v201_v12, %v200_v11  ;;  %v206_v41 = vld [vmem:[%s4170_s22 + $0x168] sm:$0xff]  ;;  %v2566_v11 = vsel %vm324_vm1, %v3368_v4, 0 }
  0x37   : > { %v702_v57 = vld [vmem:[%s4170_s22 + $0xa] sm:$0xff] }
  0x3a   : > { %3560 = vmatmul.mubr.msk.bf16.gmra.mrb[16].mxu1 %vm275_vm2, %v4290_v49 }
  0x3b   : > { %3714 = vmatmul.mubr.msk.bf16.vlgmr.msra.gmra.mrb[0].mxu0 %vm275_vm2, %v4292_v50  ;;  %3563 = vmatprep.mubr.msk.bf16.mxu1 %vm275_vm2, %v4294_v51 }
  0x3c   : > { %3746 = vmatpush3.bf16.msra.mxu0 %v1978_v52  ;;  %3717 = vmatprep.mubr.msk.bf16.mxu0 %vm275_vm2, %v4297_v53  ;;  %v800_v52 = vsel %vm324_vm1, %v4254_v34, 0  ;;  %v3211_v34 = vld [vmem:[%s4170_s22 + $0x122] sm:$0xff] }
  0x3d   : > { %4113 = vmatprep.subr.msk.bf16.mxu0 %vm324_vm1, %v4302_v54  ;;  %v4426_v7 = vpack.c.bf16 %v3212_v59, %v3211_v34  ;;  %v196_v34 = vld [vmem:[%s4170_s22 + $0xf0] sm:$0xff]  ;;  %v197_v59 = vld [vmem:[%s4170_s22 + $0xf8] sm:$0xff] }
  0x3e   : > { %v4490_v61 = vpack.c.bf16 %v197_v59, %v196_v34  ;;  %v199_v54 = vld [vmem:[%s4170_s22 + $0x110] sm:$0xff]  ;;  %v1095_v59 = vsel %vm324_vm1, %v4404_v56, 0 }
  0x3f   : > { %v4510_v18 = vpack.c.bf16 %v199_v54, %v198_v10  ;;  %v3269_v10 = vld [vmem:[%s4170_s22 + $0x1a0] sm:$0xff] }
  0x42   : > { %3564 = vmatmul.mubr.msk.bf16.gmra.mrb[20].mxu1 %vm275_vm2, %v4322_v63 }
  0x43   : > { %3718 = vmatmul.mubr.msk.bf16.gmra.mrb[4].mxu0 %vm275_vm2, %v4324_v0  ;;  %3567 = vmatprep.mubr.msk.bf16.mxu1 %vm275_vm2, %v4326_v1 }
  0x44   : > { %3721 = vmatprep.mubr.msk.bf16.mxu0 %vm275_vm2, %v4328_v3 }
  0x4a   : > { %3568 = vmatmul.mubr.msk.bf16.gmra.mrb[24].mxu1 %vm275_vm2, %v4346_v13 }
  0x4b   : > { %3722 = vmatmul.mubr.msk.bf16.gmra.mrb[8].mxu0 %vm275_vm2, %v4348_v15  ;;  %3571 = vmatprep.mubr.msk.bf16.mxu1 %vm275_vm2, %v4350_v16 }
  0x4c   : > { %3725 = vmatprep.mubr.msk.bf16.mxu0 %vm275_vm2, %v4352_v17 }
  0x52   : > { %3572 = vmatmul.mubr.msk.bf16.gmra.mrb[28].mxu1 %vm275_vm2, %v4370_v29 }
  0x53   : > { %3726 = vmatmul.mubr.msk.bf16.gmra.mrb[12].mxu0 %vm275_vm2, %v4372_v30  ;;  %3577 = vmatprep.mubr.msk.bf16.mxu1 %vm275_vm2, %v208_v31  ;;  %v4454_v31 = vpack.c.bf16 %v3218_v23, %v3217_v22  ;;  %v203_v22 = vld [vmem:[%s4170_s22 + $0x140] sm:$0xff]  ;;  %v204_v23 = vld [vmem:[%s4170_s22 + $0x150] sm:$0xff] }
  0x54   : > { %3729 = vmatprep.mubr.msk.bf16.mxu0 %vm275_vm2, %v4374_v35  ;;  %v4526_v37 = vpack.c.bf16 %v203_v22, %v202_v21  ;;  %v4528_v38 = vpack.c.bf16 %v205_v36, %v204_v23 }
  0x5a   : > { %3578 = vmatmul.mubr.msk.bf16.vlgmr.msra.gmra.mrb[0].mxu1 %vm275_vm2, %v4391_v46 }
  0x5b   : > { %3730 = vmatmul.mubr.msk.bf16.gmra.mrb[16].mxu0 %vm275_vm2, %v4393_v47  ;;  %3610 = vmatpush3.bf16.msra.mxu1 %v800_v52  ;;  %v4474_v52 = vpack.c.bf16 %v193_v43, %v192_v42  ;;  %v207_v42 = vld [vmem:[%s4170_s22 + $0x170] sm:$0xff]  ;;  %v701_v43 = vld [vmem:[%s4170_s22 + $0x2] sm:$0xff] }
  0x5c   : > { %3581 = vmatprep.mubr.msk.bf16.mxu1 %vm275_vm2, %v4395_v48  ;;  %3733 = vmatprep.mubr.msk.bf16.mxu0 %vm275_vm2, %v4399_v55  ;;  %v4542_v58 = vpack.c.bf16 %v207_v42, %v206_v41  ;;  %v733_v34 = vpack.c.bf16 %v702_v57, %v701_v43 }
  0x5d   : > { %4108 = vmatprep.subr.msk.bf16.mxu1 %vm324_vm1, %v4404_v56  ;;  %v3267_v56 = vld [vmem:[%s4170_s22 + $0x188] sm:$0xff] }
  0x62   : > { %3582 = vmatmul.mubr.msk.bf16.gmra.mrb[4].mxu1 %vm275_vm2, %v4424_v6 }
  0x63   : > { %3734 = vmatmul.mubr.msk.bf16.gmra.mrb[20].mxu0 %vm275_vm2, %v4426_v7  ;;  %3585 = vmatprep.mubr.msk.bf16.mxu1 %vm275_vm2, %v4428_v8 }
  0x64   : > { %3737 = vmatprep.mubr.msk.bf16.mxu0 %vm275_vm2, %v4430_v9 }
  0x6a   : > { %3586 = vmatmul.mubr.msk.bf16.gmra.mrb[8].mxu1 %vm275_vm2, %v4448_v24 }
  0x6b   : > { %3738 = vmatmul.mubr.msk.bf16.gmra.mrb[24].mxu0 %vm275_vm2, %v4450_v26  ;;  %3589 = vmatprep.mubr.msk.bf16.mxu1 %vm275_vm2, %v4452_v28 }
  0x6c   : > { %3741 = vmatprep.mubr.msk.bf16.mxu0 %vm275_vm2, %v4454_v31 }
  0x72   : > { %3590 = vmatmul.mubr.msk.bf16.gmra.mrb[12].mxu1 %vm275_vm2, %v4470_v44 }
  0x73   : > { %3742 = vmatmul.mubr.msk.bf16.gmra.mrb[28].mxu0 %vm275_vm2, %v4472_v45  ;;  %3593 = vmatprep.mubr.msk.bf16.mxu1 %vm275_vm2, %v4474_v52 }
  0x74   : > { %3747 = vmatprep.mubr.msk.bf16.mxu0 %vm275_vm2, %v4395_v48 }
  0x7a   : > { %3594 = vmatmul.mubr.msk.bf16.gmra.mrb[16].mxu1 %vm275_vm2, %v4488_v60 }
  0x7b   : > { %3748 = vmatmul.mubr.msk.bf16.vlgmr.msra.gmra.mrb[0].mxu0 %vm275_vm2, %v4424_v6  ;;  %3597 = vmatprep.mubr.msk.bf16.mxu1 %vm275_vm2, %v4490_v61 }
  0x7c   : > { %3780 = vmatpush3.bf16.msra.mxu0 %v2272_v62  ;;  %3751 = vmatprep.mubr.msk.bf16.mxu0 %vm275_vm2, %v4428_v8 }
  0x7d   : > { %4114 = vmatprep.subr.msk.bf16.mxu0 %vm324_vm1, %v3368_v4 }
  0x82   : > { %3598 = vmatmul.mubr.msk.bf16.gmra.mrb[20].mxu1 %vm275_vm2, %v4510_v18 }
  0x83   : > { %3752 = vmatmul.mubr.msk.bf16.gmra.mrb[4].mxu0 %vm275_vm2, %v4448_v24  ;;  %3601 = vmatprep.mubr.msk.bf16.mxu1 %vm275_vm2, %v4512_v19 }
  0x84   : > { %3755 = vmatprep.mubr.msk.bf16.mxu0 %vm275_vm2, %v4452_v28 }
  0x8a   : > { %3602 = vmatmul.mubr.msk.bf16.gmra.mrb[24].mxu1 %vm275_vm2, %v4526_v37 }
  0x8b   : > { %3756 = vmatmul.mubr.msk.bf16.gmra.mrb[8].mxu0 %vm275_vm2, %v4470_v44  ;;  %3605 = vmatprep.mubr.msk.bf16.mxu1 %vm275_vm2, %v4528_v38 }
  0x8c   : > { %3759 = vmatprep.mubr.msk.bf16.mxu0 %vm275_vm2, %v4474_v52 }
  0x92   : > { %3606 = vmatmul.mubr.msk.bf16.gmra.mrb[28].mxu1 %vm275_vm2, %v4542_v58 }
  0x93   : > { %3760 = vmatmul.mubr.msk.bf16.gmra.mrb[12].mxu0 %vm275_vm2, %v4488_v60  ;;  %3611 = vmatprep.mubr.msk.bf16.mxu1 %vm275_vm2, %v733_v34 }
  0x94   : > { %3763 = vmatprep.mubr.msk.bf16.mxu0 %vm275_vm2, %v4490_v61 }
  0x9a   : > { %3612 = vmatmul.mubr.msk.bf16.vlgmr.msra.gmra.mrb[0].mxu1 %vm275_vm2, %v4272_v40  ;;  %v3266_v40 = vld [vmem:[%s4170_s22 + $0x180] sm:$0xff] }
  0x9b   : > { %3764 = vmatmul.mubr.msk.bf16.gmra.mrb[16].mxu0 %vm275_vm2, %v4510_v18  ;;  %3644 = vmatpush3.bf16.msra.mxu1 %v1095_v59  ;;  %v4573_v62 = vpack.c.bf16 %v3267_v56, %v3266_v40 }
  0x9c   : > { %3615 = vmatprep.mubr.msk.bf16.mxu1 %vm275_vm2, %v4292_v50  ;;  %3767 = vmatprep.mubr.msk.bf16.mxu0 %vm275_vm2, %v4512_v19 }
  0x9d   : > { %4110 = vmatprep.subr.msk.bf16.mxu1 %vm324_vm1, %v4181_v2  ;;  %v3268_v2 = vld [vmem:[%s4170_s22 + $0x198] sm:$0xff] }
  0x9e   : > { %v1926_v54 = vpack.c.bf16 %v3269_v10, %v3268_v2 }
  0xa2   : > { %3616 = vmatmul.mubr.msk.bf16.gmra.mrb[4].mxu1 %vm275_vm2, %v4297_v53 }
  0xa3   : > { %3768 = vmatmul.mubr.msk.bf16.gmra.mrb[20].mxu0 %vm275_vm2, %v4526_v37  ;;  %3619 = vmatprep.mubr.msk.bf16.mxu1 %vm275_vm2, %v4324_v0 }
  0xa4   : > { %3771 = vmatprep.mubr.msk.bf16.mxu0 %vm275_vm2, %v4528_v38 }
  0xaa   : > { %3620 = vmatmul.mubr.msk.bf16.gmra.mrb[8].mxu1 %vm275_vm2, %v4328_v3 }
  0xab   : > { %3772 = vmatmul.mubr.msk.bf16.gmra.mrb[24].mxu0 %vm275_vm2, %v4542_v58  ;;  %3623 = vmatprep.mubr.msk.bf16.mxu1 %vm275_vm2, %v4348_v15 }
  0xac   : > { %3775 = vmatprep.mubr.msk.bf16.mxu0 %vm275_vm2, %v4573_v62 }
  0xb2   : > { %3624 = vmatmul.mubr.msk.bf16.gmra.mrb[12].mxu1 %vm275_vm2, %v4352_v17 }
  0xb3   : > { %3776 = vmatmul.mubr.msk.bf16.gmra.mrb[28].mxu0 %vm275_vm2, %v1926_v54  ;;  %3627 = vmatprep.mubr.msk.bf16.mxu1 %vm275_vm2, %v4372_v30 }
  0xb4   : > { %3781 = vmatprep.mubr.msk.bf16.mxu0 %vm275_vm2, %v4202_v14  ;;  %v3315_v14 = vld [vmem:[%s4170_s22 + $0x181] sm:$0xff] }
  0xba   : > { %3628 = vmatmul.mubr.msk.bf16.gmra.mrb[16].mxu1 %vm275_vm2, %v4374_v35 }
  0xbb   : > { %3782 = vmatmul.mubr.msk.bf16.vlgmr.msra.gmra.mrb[0].mxu0 %vm275_vm2, %v4213_v20  ;;  %3631 = vmatprep.mubr.msk.bf16.mxu1 %vm275_vm2, %v4393_v47 }
  0xbc   : > { %3814 = vmatpush3.bf16.msra.mxu0 %v2566_v11  ;;  %3785 = vmatprep.mubr.msk.bf16.mxu0 %vm275_vm2, %v4227_v25  ;;  %v3317_v25 = vld [vmem:[%s4170_s22 + $0x199] sm:$0xff] }
  0xc2   : > { %3632 = vmatmul.mubr.msk.bf16.gmra.mrb[20].mxu1 %vm275_vm2, %v4399_v55 }
  0xc3   : > { %3786 = vmatmul.mubr.msk.bf16.gmra.mrb[4].mxu0 %vm275_vm2, %v4232_v27  ;;  %3635 = vmatprep.mubr.msk.bf16.mxu1 %vm275_vm2, %v4426_v7  ;;  %v3318_v27 = vld [vmem:[%s4170_s22 + $0x1a1] sm:$0xff] }
  0xc4   : > { %3789 = vmatprep.mubr.msk.bf16.mxu0 %vm275_vm2, %v4247_v32  ;;  %v2220_v32 = vpack.c.bf16 %v3318_v27, %v3317_v25 }
  0xca   : > { %3636 = vmatmul.mubr.msk.bf16.gmra.mrb[24].mxu1 %vm275_vm2, %v4430_v9 }
  0xcb   : > { %3790 = vmatmul.mubr.msk.bf16.gmra.mrb[8].mxu0 %vm275_vm2, %v4249_v33  ;;  %3639 = vmatprep.mubr.msk.bf16.mxu1 %vm275_vm2, %v4450_v26  ;;  %v3366_v33 = vld [vmem:[%s4170_s22 + $0x19a] sm:$0xff] }
  0xcc   : > { %3793 = vmatprep.mubr.msk.bf16.mxu0 %vm275_vm2, %v4270_v39  ;;  %v3367_v39 = vld [vmem:[%s4170_s22 + $0x1a2] sm:$0xff] }
  0xd2   : > { %3640 = vmatmul.mubr.msk.bf16.gmra.mrb[28].mxu1 %vm275_vm2, %v4454_v31 }
  0xd3   : > { %3794 = vmatmul.mubr.msk.bf16.gmra.mrb[12].mxu0 %vm275_vm2, %v4290_v49  ;;  %3645 = vmatprep.mubr.msk.bf16.mxu1 %vm275_vm2, %v4391_v46 }
  0xd4   : > { %3797 = vmatprep.mubr.msk.bf16.mxu0 %vm275_vm2, %v4294_v51 }
  0xda   : > { %3646 = vmatmul.mubr.msk.bf16.vlgmr.msra.gmra.mrb[0].mxu1 %vm275_vm2, %v4395_v48 }
  0xdb   : > { %3798 = vmatmul.mubr.msk.bf16.gmra.mrb[16].mxu0 %vm275_vm2, %v4322_v63  ;;  %3848 = vmatpush3.bf16.msra.mxu1 %v4190_v5  ;;  %v3316_v5 = vld [vmem:[%s4170_s22 + $0x189] sm:$0xff] }
  0xdc   : > { %3649 = vmatprep.mubr.msk.bf16.mxu1 %vm275_vm2, %v4424_v6  ;;  %3801 = vmatprep.mubr.msk.bf16.mxu0 %vm275_vm2, %v4326_v1  ;;  %v2219_v20 = vpack.c.bf16 %v3316_v5, %v3315_v14 }
  0xe2   : > { %3650 = vmatmul.mubr.msk.bf16.gmra.mrb[4].mxu1 %vm275_vm2, %v4428_v8 }
  0xe3   : > { %3802 = vmatmul.mubr.msk.bf16.gmra.mrb[20].mxu0 %vm275_vm2, %v4346_v13  ;;  %3653 = vmatprep.mubr.msk.bf16.mxu1 %vm275_vm2, %v4448_v24 }
  0xe4   : > { %3805 = vmatprep.mubr.msk.bf16.mxu0 %vm275_vm2, %v4350_v16 }
  0xea   : > { %3654 = vmatmul.mubr.msk.bf16.gmra.mrb[8].mxu1 %vm275_vm2, %v4452_v28 }
  0xeb   : > { %3806 = vmatmul.mubr.msk.bf16.gmra.mrb[24].mxu0 %vm275_vm2, %v4370_v29  ;;  %3657 = vmatprep.mubr.msk.bf16.mxu1 %vm275_vm2, %v4470_v44 }
  0xec   : > { %3809 = vmatprep.mubr.msk.bf16.mxu0 %vm275_vm2, %v2219_v20 }
  0xf2   : > { %3658 = vmatmul.mubr.msk.bf16.gmra.mrb[12].mxu1 %vm275_vm2, %v4474_v52 }
  0xf3   : > { %3810 = vmatmul.mubr.msk.bf16.gmra.mrb[28].mxu0 %vm275_vm2, %v2220_v32  ;;  %3661 = vmatprep.mubr.msk.bf16.mxu1 %vm275_vm2, %v4488_v60 }
  0xf4   : > { %3815 = vmatprep.mubr.msk.bf16.mxu0 %vm275_vm2, %v4292_v50 }
  0xfa   : > { %3662 = vmatmul.mubr.msk.bf16.gmra.mrb[16].mxu1 %vm275_vm2, %v4490_v61 }
  0xfb   : > { %3816 = vmatmul.mubr.msk.bf16.vlgmr.msra.gmra.mrb[0].mxu0 %vm275_vm2, %v4297_v53  ;;  %3665 = vmatprep.mubr.msk.bf16.mxu1 %vm275_vm2, %v4510_v18 }
  0xfc   : > { %3819 = vmatprep.mubr.msk.bf16.mxu0 %vm275_vm2, %v4324_v0 }
 0x102   : > { %3666 = vmatmul.mubr.msk.bf16.gmra.mrb[20].mxu1 %vm275_vm2, %v4512_v19 }
 0x103   : > { %3820 = vmatmul.mubr.msk.bf16.gmra.mrb[4].mxu0 %vm275_vm2, %v4328_v3  ;;  %3669 = vmatprep.mubr.msk.bf16.mxu1 %vm275_vm2, %v4526_v37 }
 0x104   : > { %3823 = vmatprep.mubr.msk.bf16.mxu0 %vm275_vm2, %v4348_v15 }
 0x10a   : > { %3670 = vmatmul.mubr.msk.bf16.gmra.mrb[24].mxu1 %vm275_vm2, %v4528_v38 }
 0x10b   : > { %3824 = vmatmul.mubr.msk.bf16.gmra.mrb[8].mxu0 %vm275_vm2, %v4352_v17  ;;  %3673 = vmatprep.mubr.msk.bf16.mxu1 %vm275_vm2, %v4542_v58 }
 0x10c   : > { %3827 = vmatprep.mubr.msk.bf16.mxu0 %vm275_vm2, %v4372_v30 }
 0x112   : > { %3674 = vmatmul.mubr.msk.bf16.gmra.mrb[28].mxu1 %vm275_vm2, %v4573_v62 }
 0x113   : > { %3828 = vmatmul.mubr.msk.bf16.gmra.mrb[12].mxu0 %vm275_vm2, %v4374_v35  ;;  %3695 = vmatprep.mubr.msk.bf16.mxu1 %vm275_vm2, %v4290_v49  ;;  %v2514_v49 = vpack.c.bf16 %v3367_v39, %v3366_v33 }
 0x114   : > { %3831 = vmatprep.mubr.msk.bf16.mxu0 %vm275_vm2, %v4393_v47 }
 0x11a   : > { %3696 = vmatmul.mubr.msk.bf16.vlgmr.msra.gmra.mrb[16].mxu1 %vm275_vm2, %v4294_v51 }
 0x11b   : > { %3832 = vmatmul.mubr.msk.bf16.gmra.mrb[16].mxu0 %vm275_vm2, %v4399_v55  ;;  %3699 = vmatprep.mubr.msk.bf16.mxu1 %vm275_vm2, %v4322_v63 }
 0x11c   : > { %3835 = vmatprep.mubr.msk.bf16.mxu0 %vm275_vm2, %v4426_v7 }
 0x122   : > { %3700 = vmatmul.mubr.msk.bf16.gmra.mrb[20].mxu1 %vm275_vm2, %v4326_v1 }
 0x123   : > { %3836 = vmatmul.mubr.msk.bf16.gmra.mrb[20].mxu0 %vm275_vm2, %v4430_v9  ;;  %3703 = vmatprep.mubr.msk.bf16.mxu1 %vm275_vm2, %v4346_v13 }
 0x124   : > { %3839 = vmatprep.mubr.msk.bf16.mxu0 %vm275_vm2, %v4450_v26 }
 0x12a   : > { %3704 = vmatmul.mubr.msk.bf16.gmra.mrb[24].mxu1 %vm275_vm2, %v4350_v16 }
 0x12b   : > { %3840 = vmatmul.mubr.msk.bf16.gmra.mrb[24].mxu0 %vm275_vm2, %v4454_v31  ;;  %3707 = vmatprep.mubr.msk.bf16.mxu1 %vm275_vm2, %v4370_v29 }
 0x12c   : > { %3843 = vmatprep.mubr.msk.bf16.mxu0 %vm275_vm2, %v4472_v45 }
 0x132   : > { %3708 = vmatmul.mubr.msk.bf16.gmra.mrb[28].mxu1 %vm275_vm2, %v2219_v20 }
 0x133   : > { %3844 = vmatmul.mubr.msk.bf16.gmra.mrb[28].mxu0 %vm275_vm2, %v2514_v49 }
 0x1ad   : > { %v3647_v50 = vpop.f32.mrb[0].mxu1 }
 0x1ae   : > { %v1131_v51 = vpop.f32.mrb[1].mxu1 }
 0x1af   : > { %v3648_v53 = vpop.f32.mrb[2].mxu1 }
 0x1b0   : > { %v1134_v63 = vpop.f32.mrb[3].mxu1 }
 0x1b5   : > { %v3651_v0 = vpop.f32.mrb[4].mxu1 }
 0x1b6   : > { %v1147_v1 = vpop.f32.mrb[5].mxu1 }
 0x1b7   : > { %v3652_v3 = vpop.f32.mrb[6].mxu1 }
 0x1b8   : > { %v1150_v13 = vpop.f32.mrb[7].mxu1 }
 0x1bd   : > { %v4720_v15 = vpop.f32.mrb[8].mxu1 }
 0x1be   : > { %v4722_v16 = vpop.f32.mrb[9].mxu1 }
 0x1bf   : > { %v4724_v17 = vpop.f32.mrb[10].mxu1 }
 0x1c0   : > { %v4726_v29 = vpop.f32.mrb[11].mxu1 }
 0x1c5   : > { %v4728_v30 = vpop.f32.mrb[12].mxu1 }
 0x1c6   : > { %v4730_v35 = vpop.f32.mrb[13].mxu1 }
 0x1c7   : > { %v4732_v46 = vpop.f32.mrb[14].mxu1 }
 0x1c8   : > { %v4734_v47 = vpop.f32.mrb[15].mxu1 }
 0x1ce   : > { %v3817_v48 = vpop.f32.mrb[0].mxu0 }
 0x1cf   : > { %v3849_v55 = vadd.f32 %v3817_v48, %v3647_v50  ;;  %v2602_v6 = vpop.f32.mrb[1].mxu0 }
 0x1d0   : > { %v3850_v7 = vadd.f32 %v2602_v6, %v1131_v51  ;;  %v3818_v8 = vpop.f32.mrb[2].mxu0 }
 0x1d1   : > { %2764 = vst.msk [vmem:[%s4165_s19 + $0x10] sm:$0xff] %vm2761_vm3, %v3849_v55  ;;  %v3851_v9 = vadd.f32 %v3818_v8, %v3648_v53  ;;  %v2605_v24 = vpop.f32.mrb[3].mxu0  ;;  %v2870_v31 = vmul.f32 %v3849_v55, %v3849_v55  ;;  %v2798_v4 = vsel %vm2761_vm3, %v3849_v55, 0.0 }
 0x1d2   : > { %2762 = vst.msk [vmem:[%s4165_s19] sm:$0xff] %vm2761_vm3, %v3850_v7  ;;  %v2868_v26 = vmul.f32 %v3850_v7, %v3850_v7  ;;  %v3852_v28 = vadd.f32 %v2605_v24, %v1134_v63  ;;  %v2795_v44 = vsel %vm2761_vm3, %v3850_v7, 0.0 }
 0x1d3   : > { %2765 = vst.msk [vmem:[%s4165_s19 + $0x18] sm:$0xff] %vm2761_vm3, %v3851_v9  ;;  %v2871_v60 = vmul.f32 %v3851_v9, %v3851_v9  ;;  %v2903_v37 = vsel %vm2761_vm3, %v2870_v31, 0.0  ;;  %v2800_v38 = vsel %vm2761_vm3, %v3851_v9, 0.0 }
 0x1d4   : > { %2763 = vst.msk [vmem:[%s4165_s19 + $0x8] sm:$0xff] %vm2761_vm3, %v3852_v28  ;;  %v2796_v45 = vsel %vm2761_vm3, %v3852_v28, 0.0  ;;  %v2869_v52 = vmul.f32 %v3852_v28, %v3852_v28  ;;  %v2900_v12 = vsel %vm2761_vm3, %v2868_v26, 0.0 }
 0x1d5   : > { %v2797_v61 = vadd.f32 %v2796_v45, %v2795_v44  ;;  %v2905_v43 = vsel %vm2761_vm3, %v2871_v60, 0.0 }
 0x1d6   : > { %v2901_v18 = vsel %vm2761_vm3, %v2869_v52, 0.0  ;;  %v3821_v19 = vpop.f32.mrb[4].mxu0 }
 0x1d7   : > { %v2799_v21 = vadd.f32 %v2798_v4, %v2797_v61  ;;  %v2902_v22 = vadd.f32 %v2901_v18, %v2900_v12  ;;  %v3853_v23 = vadd.f32 %v3821_v19, %v3651_v0  ;;  %v2618_v36 = vpop.f32.mrb[5].mxu0 }
 0x1d8   : > { %v3854_v41 = vadd.f32 %v2618_v36, %v1147_v1  ;;  %v3822_v42 = vpop.f32.mrb[6].mxu0 }
 0x1d9   : > { %v2904_v57 = vadd.f32 %v2903_v37, %v2902_v22  ;;  %2768 = vst.msk [vmem:[%s4165_s19 + $0x30] sm:$0xff] %vm2761_vm3, %v3853_v23  ;;  %v2801_v58 = vadd.f32 %v2800_v38, %v2799_v21  ;;  %v2621_v34 = vpop.f32.mrb[7].mxu0  ;;  %v3855_v56 = vadd.f32 %v3822_v42, %v3652_v3  ;;  %v2874_v14 = vmul.f32 %v3853_v23, %v3853_v23 }
 0x1da   : > { %2766 = vst.msk [vmem:[%s4165_s19 + $0x20] sm:$0xff] %vm2761_vm3, %v3854_v41  ;;  %v2802_v59 = vsel %vm2761_vm3, %v3854_v41, 0.0  ;;  %v2872_v40 = vmul.f32 %v3854_v41, %v3854_v41  ;;  %v3856_v62 = vadd.f32 %v2621_v34, %v1150_v13  ;;  %v2806_v27 = vsel %vm2761_vm3, %v3853_v23, 0.0 }
 0x1db   : > { %v2803_v2 = vadd.f32 %v2802_v59, %v2801_v58  ;;  %v2906_v10 = vadd.f32 %v2905_v43, %v2904_v57  ;;  %2769 = vst.msk [vmem:[%s4165_s19 + $0x38] sm:$0xff] %vm2761_vm3, %v3855_v56  ;;  %v2875_v33 = vmul.f32 %v3855_v56, %v3855_v56  ;;  %v2808_v53 = vsel %vm2761_vm3, %v3855_v56, 0.0 }
 0x1dc   : > { %v2907_v54 = vsel %vm2761_vm3, %v2872_v40, 0.0  ;;  %2767 = vst.msk [vmem:[%s4165_s19 + $0x28] sm:$0xff] %vm2761_vm3, %v3856_v62  ;;  %v2804_v11 = vsel %vm2761_vm3, %v3856_v62, 0.0  ;;  %v2873_v25 = vmul.f32 %v3856_v62, %v3856_v62  ;;  %v2911_v3 = vsel %vm2761_vm3, %v2874_v14, 0.0 }
 0x1dd   : > { %v2908_v5 = vadd.f32 %v2907_v54, %v2906_v10  ;;  %v2805_v20 = vadd.f32 %v2804_v11, %v2803_v2 }
 0x1de   : > { %v3825_v32 = vpop.f32.mrb[8].mxu0  ;;  %v2909_v49 = vsel %vm2761_vm3, %v2873_v25, 0.0 }
 0x1df   : > { %v2807_v39 = vadd.f32 %v2806_v27, %v2805_v20  ;;  %v3857_v50 = vadd.f32 %v3825_v32, %v4720_v15  ;;  %v2634_v51 = vpop.f32.mrb[9].mxu0  ;;  %v2910_v63 = vadd.f32 %v2909_v49, %v2908_v5 }
 0x1e0   : > { %v3858_v0 = vadd.f32 %v2634_v51, %v4722_v16  ;;  %v3826_v1 = vpop.f32.mrb[10].mxu0  ;;  %v2913_v16 = vsel %vm2761_vm3, %v2875_v33, 0.0 }
 0x1e1   : > { %2772 = vst.msk [vmem:[%s4165_s19 + $0x50] sm:$0xff] %vm2761_vm3, %v3857_v50  ;;  %v2809_v13 = vadd.f32 %v2808_v53, %v2807_v39  ;;  %v3859_v48 = vadd.f32 %v3826_v1, %v4724_v17  ;;  %v2637_v55 = vpop.f32.mrb[11].mxu0  ;;  %v2912_v6 = vadd.f32 %v2911_v3, %v2910_v63  ;;  %v2878_v31 = vmul.f32 %v3857_v50, %v3857_v50 }
 0x1e2   : > { %2770 = vst.msk [vmem:[%s4165_s19 + $0x40] sm:$0xff] %vm2761_vm3, %v3858_v0  ;;  %v2810_v15 = vsel %vm2761_vm3, %v3858_v0, 0.0  ;;  %v2876_v7 = vmul.f32 %v3858_v0, %v3858_v0  ;;  %v3860_v8 = vadd.f32 %v2637_v55, %v4726_v29  ;;  %v2814_v45 = vsel %vm2761_vm3, %v3857_v50, 0.0 }
 0x1e3   : > { %v2811_v9 = vadd.f32 %v2810_v15, %v2809_v13  ;;  %2773 = vst.msk [vmem:[%s4165_s19 + $0x58] sm:$0xff] %vm2761_vm3, %v3859_v48  ;;  %v2914_v24 = vadd.f32 %v2913_v16, %v2912_v6  ;;  %v2879_v61 = vmul.f32 %v3859_v48, %v3859_v48  ;;  %v2816_v19 = vsel %vm2761_vm3, %v3859_v48, 0.0 }
 0x1e4   : > { %v2915_v26 = vsel %vm2761_vm3, %v2876_v7, 0.0  ;;  %2771 = vst.msk [vmem:[%s4165_s19 + $0x48] sm:$0xff] %vm2761_vm3, %v3860_v8  ;;  %v2812_v17 = vsel %vm2761_vm3, %v3860_v8, 0.0  ;;  %v2877_v28 = vmul.f32 %v3860_v8, %v3860_v8  ;;  %v2919_v36 = vsel %vm2761_vm3, %v2878_v31, 0.0 }
 0x1e5   : > { %v2813_v44 = vadd.f32 %v2812_v17, %v2811_v9  ;;  %v2916_v52 = vadd.f32 %v2915_v26, %v2914_v24 }
 0x1e6   : > { %v2917_v29 = vsel %vm2761_vm3, %v2877_v28, 0.0  ;;  %v3829_v60 = vpop.f32.mrb[12].mxu0 }
 0x1e7   : > { %v2815_v4 = vadd.f32 %v2814_v45, %v2813_v44  ;;  %v3861_v12 = vadd.f32 %v3829_v60, %v4728_v30  ;;  %v2650_v18 = vpop.f32.mrb[13].mxu0  ;;  %v2918_v21 = vadd.f32 %v2917_v29, %v2916_v52 }
 0x1e8   : > { %v3862_v22 = vadd.f32 %v2650_v18, %v4730_v35  ;;  %v3830_v23 = vpop.f32.mrb[14].mxu0  ;;  %v2921_v35 = vsel %vm2761_vm3, %v2879_v61, 0.0 }
 0x1e9   : > { %2776 = vst.msk [vmem:[%s4165_s19 + $0x70] sm:$0xff] %vm2761_vm3, %v3861_v12  ;;  %v2817_v37 = vadd.f32 %v2816_v19, %v2815_v4  ;;  %v3863_v38 = vadd.f32 %v3830_v23, %v4732_v46  ;;  %v2653_v41 = vpop.f32.mrb[15].mxu0  ;;  %v2920_v42 = vadd.f32 %v2919_v36, %v2918_v21  ;;  %v2882_v56 = vmul.f32 %v3861_v12, %v3861_v12 }
 0x1ea   : > { %2774 = vst.msk [vmem:[%s4165_s19 + $0x60] sm:$0xff] %vm2761_vm3, %v3862_v22  ;;  %v2818_v30 = vsel %vm2761_vm3, %v3862_v22, 0.0  ;;  %v2880_v43 = vmul.f32 %v3862_v22, %v3862_v22  ;;  %v3864_v57 = vadd.f32 %v2653_v41, %v4734_v47  ;;  %v2822_v2 = vsel %vm2761_vm3, %v3861_v12, 0.0 }
 0x1eb   : > { %v2819_v58 = vadd.f32 %v2818_v30, %v2817_v37  ;;  %2777 = vst.msk [vmem:[%s4165_s19 + $0x78] sm:$0xff] %vm2761_vm3, %v3863_v38  ;;  %v2922_v34 = vadd.f32 %v2921_v35, %v2920_v42  ;;  %v2883_v14 = vmul.f32 %v3863_v38, %v3863_v38  ;;  %v2824_v32 = vsel %vm2761_vm3, %v3863_v38, 0.0 }
 0x1ec   : > { %v2923_v59 = vsel %vm2761_vm3, %v2880_v43, 0.0  ;;  %2775 = vst.msk [vmem:[%s4165_s19 + $0x68] sm:$0xff] %vm2761_vm3, %v3864_v57  ;;  %v2820_v46 = vsel %vm2761_vm3, %v3864_v57, 0.0  ;;  %v2881_v40 = vmul.f32 %v3864_v57, %v3864_v57  ;;  %v2927_v51 = vsel %vm2761_vm3, %v2882_v56, 0.0 }
 0x1ed   : > { %v2821_v62 = vadd.f32 %v2820_v46, %v2819_v58  ;;  %v2924_v10 = vadd.f32 %v2923_v59, %v2922_v34  ;;  %v3697_v54 = vpop.f32.mrb[16].mxu1  ;;  %v2929_v6 = vsel %vm2761_vm3, %v2883_v14, 0.0 }
 0x1ee   : > { %v2925_v47 = vsel %vm2761_vm3, %v2881_v40, 0.0  ;;  %v3833_v11 = vpop.f32.mrb[16].mxu0  ;;  %v1489_v25 = vpop.f32.mrb[17].mxu1 }
 0x1ef   : > { %v2823_v5 = vadd.f32 %v2822_v2, %v2821_v62  ;;  %v3865_v20 = vadd.f32 %v3833_v11, %v3697_v54  ;;  %v2666_v27 = vpop.f32.mrb[17].mxu0  ;;  %v2926_v33 = vadd.f32 %v2925_v47, %v2924_v10  ;;  %v3698_v49 = vpop.f32.mrb[18].mxu1 }
 0x1f0   : > { %v3866_v39 = vadd.f32 %v2666_v27, %v1489_v25  ;;  %v3834_v50 = vpop.f32.mrb[18].mxu0  ;;  %v1492_v0 = vpop.f32.mrb[19].mxu1 }
 0x1f1   : > { %2780 = vst.msk [vmem:[%s4165_s19 + $0x90] sm:$0xff] %vm2761_vm3, %v3865_v20  ;;  %v2825_v53 = vadd.f32 %v2824_v32, %v2823_v5  ;;  %v3867_v63 = vadd.f32 %v3834_v50, %v3698_v49  ;;  %v2669_v1 = vpop.f32.mrb[19].mxu0  ;;  %v2928_v3 = vadd.f32 %v2927_v51, %v2926_v33  ;;  %v2886_v24 = vmul.f32 %v3865_v20, %v3865_v20 }
 0x1f2   : > { %2778 = vst.msk [vmem:[%s4165_s19 + $0x80] sm:$0xff] %vm2761_vm3, %v3866_v39  ;;  %v2826_v13 = vsel %vm2761_vm3, %v3866_v39, 0.0  ;;  %v2884_v48 = vmul.f32 %v3866_v39, %v3866_v39  ;;  %v3868_v55 = vadd.f32 %v2669_v1, %v1492_v0  ;;  %v2830_v17 = vsel %vm2761_vm3, %v3865_v20, 0.0 }
 0x1f3   : > { %v2827_v15 = vadd.f32 %v2826_v13, %v2825_v53  ;;  %2781 = vst.msk [vmem:[%s4165_s19 + $0x98] sm:$0xff] %vm2761_vm3, %v3867_v63  ;;  %v2930_v7 = vadd.f32 %v2929_v6, %v2928_v3  ;;  %v2887_v52 = vmul.f32 %v3867_v63, %v3867_v63  ;;  %v2832_v12 = vsel %vm2761_vm3, %v3867_v63, 0.0 }
 0x1f4   : > { %v2931_v8 = vsel %vm2761_vm3, %v2884_v48, 0.0  ;;  %2779 = vst.msk [vmem:[%s4165_s19 + $0x88] sm:$0xff] %vm2761_vm3, %v3868_v55  ;;  %v2828_v16 = vsel %vm2761_vm3, %v3868_v55, 0.0  ;;  %v2885_v9 = vmul.f32 %v3868_v55, %v3868_v55  ;;  %v2935_v23 = vsel %vm2761_vm3, %v2886_v24, 0.0 }
 0x1f5   : > { %v2829_v26 = vadd.f32 %v2828_v16, %v2827_v15  ;;  %v2932_v28 = vadd.f32 %v2931_v8, %v2930_v7  ;;  %v3701_v44 = vpop.f32.mrb[20].mxu1  ;;  %v2937_v35 = vsel %vm2761_vm3, %v2887_v52, 0.0 }
 0x1f6   : > { %v2933_v31 = vsel %vm2761_vm3, %v2885_v9, 0.0  ;;  %v3837_v45 = vpop.f32.mrb[20].mxu0  ;;  %v1505_v61 = vpop.f32.mrb[21].mxu1 }
 0x1f7   : > { %v2831_v29 = vadd.f32 %v2830_v17, %v2829_v26  ;;  %v3869_v60 = vadd.f32 %v3837_v45, %v3701_v44  ;;  %v2682_v4 = vpop.f32.mrb[21].mxu0  ;;  %v2934_v18 = vadd.f32 %v2933_v31, %v2932_v28  ;;  %v3702_v21 = vpop.f32.mrb[22].mxu1 }
 0x1f8   : > { %v3870_v19 = vadd.f32 %v2682_v4, %v1505_v61  ;;  %v3838_v22 = vpop.f32.mrb[22].mxu0  ;;  %v1508_v38 = vpop.f32.mrb[23].mxu1 }
 0x1f9   : > { %2784 = vst.msk [vmem:[%s4165_s19 + $0xb0] sm:$0xff] %vm2761_vm3, %v3869_v60  ;;  %v2833_v36 = vadd.f32 %v2832_v12, %v2831_v29  ;;  %v3871_v37 = vadd.f32 %v3838_v22, %v3702_v21  ;;  %v2685_v41 = vpop.f32.mrb[23].mxu0  ;;  %v2936_v42 = vadd.f32 %v2935_v23, %v2934_v18  ;;  %v2890_v56 = vmul.f32 %v3869_v60, %v3869_v60 }
 0x1fa   : > { %2782 = vst.msk [vmem:[%s4165_s19 + $0xa0] sm:$0xff] %vm2761_vm3, %v3870_v19  ;;  %v2834_v30 = vsel %vm2761_vm3, %v3870_v19, 0.0  ;;  %v2888_v43 = vmul.f32 %v3870_v19, %v3870_v19  ;;  %v3872_v57 = vadd.f32 %v2685_v41, %v1508_v38  ;;  %v2838_v2 = vsel %vm2761_vm3, %v3869_v60, 0.0 }
 0x1fb   : > { %v2835_v58 = vadd.f32 %v2834_v30, %v2833_v36  ;;  %2785 = vst.msk [vmem:[%s4165_s19 + $0xb8] sm:$0xff] %vm2761_vm3, %v3871_v37  ;;  %v2938_v34 = vadd.f32 %v2937_v35, %v2936_v42  ;;  %v2891_v14 = vmul.f32 %v3871_v37, %v3871_v37  ;;  %v2840_v32 = vsel %vm2761_vm3, %v3871_v37, 0.0 }
 0x1fc   : > { %v2939_v59 = vsel %vm2761_vm3, %v2888_v43, 0.0  ;;  %2783 = vst.msk [vmem:[%s4165_s19 + $0xa8] sm:$0xff] %vm2761_vm3, %v3872_v57  ;;  %v2836_v46 = vsel %vm2761_vm3, %v3872_v57, 0.0  ;;  %v2889_v40 = vmul.f32 %v3872_v57, %v3872_v57  ;;  %v2943_v51 = vsel %vm2761_vm3, %v2890_v56, 0.0 }
 0x1fd   : > { %v2837_v62 = vadd.f32 %v2836_v46, %v2835_v58  ;;  %v2940_v10 = vadd.f32 %v2939_v59, %v2938_v34  ;;  %v3705_v54 = vpop.f32.mrb[24].mxu1  ;;  %v2945_v6 = vsel %vm2761_vm3, %v2891_v14, 0.0 }
 0x1fe   : > { %v2941_v47 = vsel %vm2761_vm3, %v2889_v40, 0.0  ;;  %v3841_v11 = vpop.f32.mrb[24].mxu0  ;;  %v1521_v25 = vpop.f32.mrb[25].mxu1 }
 0x1ff   : > { %v2839_v5 = vadd.f32 %v2838_v2, %v2837_v62  ;;  %v3873_v20 = vadd.f32 %v3841_v11, %v3705_v54  ;;  %v2698_v27 = vpop.f32.mrb[25].mxu0  ;;  %v2942_v33 = vadd.f32 %v2941_v47, %v2940_v10  ;;  %v3706_v49 = vpop.f32.mrb[26].mxu1 }
 0x200   : > { %v3874_v39 = vadd.f32 %v2698_v27, %v1521_v25  ;;  %v3842_v50 = vpop.f32.mrb[26].mxu0  ;;  %v1524_v0 = vpop.f32.mrb[27].mxu1 }
 0x201   : > { %2788 = vst.msk [vmem:[%s4165_s19 + $0xd0] sm:$0xff] %vm2761_vm3, %v3873_v20  ;;  %v2841_v53 = vadd.f32 %v2840_v32, %v2839_v5  ;;  %v3875_v63 = vadd.f32 %v3842_v50, %v3706_v49  ;;  %v2701_v1 = vpop.f32.mrb[27].mxu0  ;;  %v2944_v3 = vadd.f32 %v2943_v51, %v2942_v33  ;;  %v2894_v24 = vmul.f32 %v3873_v20, %v3873_v20 }
 0x202   : > { %2786 = vst.msk [vmem:[%s4165_s19 + $0xc0] sm:$0xff] %vm2761_vm3, %v3874_v39  ;;  %v2842_v13 = vsel %vm2761_vm3, %v3874_v39, 0.0  ;;  %v2892_v48 = vmul.f32 %v3874_v39, %v3874_v39  ;;  %v3876_v55 = vadd.f32 %v2701_v1, %v1524_v0  ;;  %v2846_v17 = vsel %vm2761_vm3, %v3873_v20, 0.0 }
 0x203   : > { %v2843_v15 = vadd.f32 %v2842_v13, %v2841_v53  ;;  %2789 = vst.msk [vmem:[%s4165_s19 + $0xd8] sm:$0xff] %vm2761_vm3, %v3875_v63  ;;  %v2946_v7 = vadd.f32 %v2945_v6, %v2944_v3  ;;  %v2895_v52 = vmul.f32 %v3875_v63, %v3875_v63  ;;  %v2848_v12 = vsel %vm2761_vm3, %v3875_v63, 0.0  ;;  %v2794_v3 = vld [vmem:[%s4890_s3] sm:$0x1] }
 0x204   : > { %v2947_v8 = vsel %vm2761_vm3, %v2892_v48, 0.0  ;;  %2787 = vst.msk [vmem:[%s4165_s19 + $0xc8] sm:$0xff] %vm2761_vm3, %v3876_v55  ;;  %v2844_v16 = vsel %vm2761_vm3, %v3876_v55, 0.0  ;;  %v2893_v9 = vmul.f32 %v3876_v55, %v3876_v55  ;;  %v2951_v23 = vsel %vm2761_vm3, %v2894_v24, 0.0 }
 0x205   : > { %v2845_v26 = vadd.f32 %v2844_v16, %v2843_v15  ;;  %v2948_v28 = vadd.f32 %v2947_v8, %v2946_v7  ;;  %v3709_v44 = vpop.f32.mrb[28].mxu1  ;;  %v2953_v58 = vsel %vm2761_vm3, %v2895_v52, 0.0  ;;  %v2867_v15 = vld [vmem:[%s4890_s3 + $0x1] sm:$0x1] }
 0x206   : > { %v2949_v31 = vsel %vm2761_vm3, %v2893_v9, 0.0  ;;  %v3845_v45 = vpop.f32.mrb[28].mxu0  ;;  %v1537_v61 = vpop.f32.mrb[29].mxu1 }
 0x207   : > { %v2847_v29 = vadd.f32 %v2846_v17, %v2845_v26  ;;  %v3877_v60 = vadd.f32 %v3845_v45, %v3709_v44  ;;  %v2714_v4 = vpop.f32.mrb[29].mxu0  ;;  %v2950_v18 = vadd.f32 %v2949_v31, %v2948_v28  ;;  %v3710_v21 = vpop.f32.mrb[30].mxu1 }
 0x208   : > { %v3878_v19 = vadd.f32 %v2714_v4, %v1537_v61  ;;  %v3846_v22 = vpop.f32.mrb[30].mxu0  ;;  %v1540_v41 = vpop.f32.mrb[31].mxu1 }
 0x209   : > { %2792 = vst.msk [vmem:[%s4165_s19 + $0xf0] sm:$0xff] %vm2761_vm3, %v3877_v60  ;;  %v2898_v36 = vmul.f32 %v3877_v60, %v3877_v60  ;;  %v2849_v37 = vadd.f32 %v2848_v12, %v2847_v29  ;;  %v3879_v38 = vadd.f32 %v3846_v22, %v3710_v21  ;;  %v2717_v42 = vpop.f32.mrb[31].mxu0  ;;  %v2952_v30 = vadd.f32 %v2951_v23, %v2950_v18 }
 0x20a   : > { %2790 = vst.msk [vmem:[%s4165_s19 + $0xe0] sm:$0xff] %vm2761_vm3, %v3878_v19  ;;  %v2850_v43 = vsel %vm2761_vm3, %v3878_v19, 0.0  ;;  %v2896_v57 = vmul.f32 %v3878_v19, %v3878_v19  ;;  %v3880_v35 = vadd.f32 %v2717_v42, %v1540_v41  ;;  %v2854_v54 = vsel %vm2761_vm3, %v3877_v60, 0.0 }
 0x20b   : > { %v2959_v34 = vsel %vm2761_vm3, %v2898_v36, 0.0  ;;  %v2851_v59 = vadd.f32 %v2850_v43, %v2849_v37  ;;  %2793 = vst.msk [vmem:[%s4165_s19 + $0xf8] sm:$0xff] %vm2761_vm3, %v3879_v38  ;;  %v2899_v46 = vmul.f32 %v3879_v38, %v3879_v38  ;;  %v2954_v40 = vadd.f32 %v2953_v58, %v2952_v30 }
 0x20c   : > { %v2955_v56 = vsel %vm2761_vm3, %v2896_v57, 0.0  ;;  %2791 = vst.msk [vmem:[%s4165_s19 + $0xe8] sm:$0xff] %vm2761_vm3, %v3880_v35  ;;  %v2852_v62 = vsel %vm2761_vm3, %v3880_v35, 0.0  ;;  %v2897_v2 = vmul.f32 %v3880_v35, %v3880_v35  ;;  %v2856_v20 = vsel %vm2761_vm3, %v3879_v38, 0.0 }
 0x20d   : > { %v2961_v10 = vsel %vm2761_vm3, %v2899_v46, 0.0  ;;  %v2853_v47 = vadd.f32 %v2852_v62, %v2851_v59  ;;  %v2956_v11 = vadd.f32 %v2955_v56, %v2954_v40 }
 0x20e   : > { %v2957_v14 = vsel %vm2761_vm3, %v2897_v2, 0.0 }
 0x20f   : > { %v2855_v5 = vadd.f32 %v2854_v54, %v2853_v47  ;;  %v2958_v25 = vadd.f32 %v2957_v14, %v2956_v11 }
 0x211   : > { %v2857_v27 = vadd.f32 %v2856_v20, %v2855_v5  ;;  %v2960_v32 = vadd.f32 %v2959_v34, %v2958_v25 }
 0x213   : > { %v2858_v33 = vrot.slane %v2857_v27, 4  ;;  %v2962_v39 = vadd.f32 %v2961_v10, %v2960_v32 }
 0x215   : > { %v2859_v49 = vadd.f32 %v2858_v33, %v2857_v27  ;;  %v2963_v50 = vrot.slane %v2962_v39, 4 }
 0x217   : > { %v2860_v51 = vrot.slane %v2859_v49, 2  ;;  %v2964_v53 = vadd.f32 %v2963_v50, %v2962_v39 }
 0x219   : > { %v2861_v63 = vadd.f32 %v2860_v51, %v2859_v49  ;;  %v2965_v0 = vrot.slane %v2964_v53, 2 }
 0x21b   : > { %v2862_v1 = vrot.slane %v2861_v63, 1  ;;  %v2966_v13 = vadd.f32 %v2965_v0, %v2964_v53 }
 0x21d   : > { %v2863_v48 = vadd.f32 %v2862_v1, %v2861_v63  ;;  %v2967_v55 = vrot.slane %v2966_v13, 1 }
 0x21f   : > { %v2864_v6 = vadd.f32 %v2863_v48, %v2794_v3  ;;  %v2968_v7 = vadd.f32 %v2967_v55, %v2966_v13 }
 0x221   : > { %2866 = vst.msk [vmem:[%s4890_s3] sm:$0x1] %vm2865_vm4, %v2864_v6  ;;  %v2969_v8 = vadd.f32 %v2968_v7, %v2867_v15 }
 0x223   : > { %2970 = vst.msk [vmem:[%s4890_s3 + $0x1] sm:$0x1] %vm2865_vm4, %v2969_v8 }
 0x224 PF: > { %s14_s12 = sadd.s32 1, %s4131_s12  }
 0x225   : > { %p11_p5 = scmp.ge.s32.totalorder %s14_s12, 4  }
 0x227   :  { %13 = sbr.rel (!%p11_p5) target bundleno = 1 (0x1), region = 80 }

// kernel: standard_block_forward.4
= control target key start
LH: loop header
LB: loop body
LE: loop exit
PB: predicated region body
PF: predicated region fallthrough
CT: control target
= control target key end

     0   :  { %s5051_s27 = smov 0   ;;  %s6479_s0 = inlined_call_operand.vmem [shape: f32[2,16,16,8], index: 0, kind: input, shape index: {}]   ;;  %s6480_s1 = inlined_call_operand.vmem [shape: f32[2,18,18,4], index: 1, kind: input, shape index: {}]   ;;  %s6481_s2 = inlined_call_operand.vmem [shape: f32[2,8], index: 2, kind: input, shape index: {}]   ;;  %s6482_s3 = inlined_call_operand.vmem [shape: f32[8,8], index: 3, kind: input, shape index: {}]   ;;  %s6483_s4 = inlined_call_operand.vmem [shape: bf16[9,8,8], index: 4, kind: input, shape index: {}]   ;;  %s6484_s5 = inlined_call_operand.vmem [shape: bf16[4,8], index: 5, kind: input, shape index: {}]   ;;  %s6485_s6 = inlined_call_operand.vmem [shape: f32[2,16,16,8], index: 6, kind: output, shape index: {0}]   ;;  %s6486_s7 = inlined_call_operand.vmem [shape: f32[2,16,16,8], index: 7, kind: output, shape index: {1}]   ;;  %s6487_s8 = inlined_call_operand.vmem [shape: f32[4,8], index: 8, kind: output, shape index: {2}]  }
   0x1 LB: > { %s3990_s28 = sadd.s32 4294967295, %s5003_s27   ;;  %p3994_p0 = scmp.ge.s32.totalorder %s5003_s27, 1  ;;  %s5003_s27 = sphi %s5051_s27, %s19_s27  }
   0x2   : > { %p272_p1 = scmp.lt.s32.totalorder %s5003_s27, 3 }
   0x4   : > { %p273_p2 = pnand %p3994_p0, %p272_p1 }
   0x5   : > { %p316_p3 = scmp.lt.s32.totalorder (!%p273_p2), %s3990_s28, 1  ;;  %p4002_p4 = scmp.ne.s32.totalorder (!%p273_p2), %s3990_s28, 0 }
   0x6   : > { %276 = sbr.rel (%p273_p2) target bundleno = 662 (0x296), region = 44 }
   0xd   : > { %s317_s29 = scalar_select %p316_p3, %s3990_s28, 1 }
   0xe   : > { %340 = sbr.rel (%p4002_p4) target bundleno = 43 (0x2b), region = 48  ;;  %vm341_vm0 = vcmask (!%p4002_p4), 64512   ;;  %vm344_vm1 = vcmask (!%p4002_p4), 58368   ;;  %vm397_vm2 = vcmask (!%p4002_p4), 60416   ;;  %v5005_v0 = vmov (!%p4002_p4), 0.0  }
   0xf   : > { %s4206_s30 = sshll.u32 %s317_s29, 8  ;;  %s4985_s9 = smul.u32 432, %s317_s29  ;;  %342 = vst.msk [vmem:[#allocation2] sm:$0xff] (!%p4002_p4), %vm341_vm0, %v5005_v0  ;;  %343 = vst.msk [vmem:[#allocation2 + $0x8] sm:$0xff] (!%p4002_p4), %vm341_vm0, %v5005_v0 }
  0x10   : > { %s5062_s12 = scalar_lea.vmem %s6479_s0, %s4206_s30  ;;  %s5067_s15 = scalar_lea.vmem %s6485_s6, %s4206_s30  ;;  %346 = vst.msk [vmem:[#allocation2 + $0x18] sm:$0xff] (!%p4002_p4), %vm341_vm0, %v5005_v0  ;;  %347 = vst.msk [vmem:[#allocation2 + $0x20] sm:$0xff] (!%p4002_p4), %vm341_vm0, %v5005_v0 }
  0x11   : > { %s5072_s18 = scalar_lea.vmem %s6480_s1, %s4985_s9  ;;  %s5077_s21 = scalar_lea.vmem %s6486_s7, %s4206_s30  ;;  %349 = vst.msk [vmem:[#allocation2 + $0x30] sm:$0xff] (!%p4002_p4), %vm341_vm0, %v5005_v0  ;;  %350 = vst.msk [vmem:[#allocation2 + $0x38] sm:$0xff] (!%p4002_p4), %vm341_vm0, %v5005_v0 }
  0x12   : > { %352 = vst.msk [vmem:[#allocation2 + $0x48] sm:$0xff] (!%p4002_p4), %vm341_vm0, %v5005_v0  ;;  %353 = vst.msk [vmem:[#allocation2 + $0x50] sm:$0xff] (!%p4002_p4), %vm341_vm0, %v5005_v0 }
  0x13   : > { %355 = vst.msk [vmem:[#allocation2 + $0x60] sm:$0xff] (!%p4002_p4), %vm341_vm0, %v5005_v0  ;;  %356 = vst.msk [vmem:[#allocation2 + $0x68] sm:$0xff] (!%p4002_p4), %vm341_vm0, %v5005_v0 }
  0x14   : > { %358 = vst.msk [vmem:[#allocation2 + $0x78] sm:$0xff] (!%p4002_p4), %vm341_vm0, %v5005_v0  ;;  %359 = vst.msk [vmem:[#allocation2 + $0x80] sm:$0xff] (!%p4002_p4), %vm341_vm0, %v5005_v0 }
  0x15   : > { %361 = vst.msk [vmem:[#allocation2 + $0x90] sm:$0xff] %vm341_vm0, %v5005_v0  ;;  %362 = vst.msk [vmem:[#allocation2 + $0x98] sm:$0xff] %vm341_vm0, %v5005_v0 }
  0x16   : > { %364 = vst.msk [vmem:[#allocation2 + $0xa8] sm:$0xff] %vm341_vm0, %v5005_v0  ;;  %365 = vst.msk [vmem:[#allocation2 + $0xb0] sm:$0xff] %vm341_vm0, %v5005_v0 }
  0x17   : > { %367 = vst.msk [vmem:[#allocation2 + $0xc0] sm:$0xff] %vm341_vm0, %v5005_v0  ;;  %368 = vst.msk [vmem:[#allocation2 + $0xc8] sm:$0xff] %vm341_vm0, %v5005_v0 }
  0x18   : > { %370 = vst.msk [vmem:[#allocation2 + $0xd8] sm:$0xff] %vm341_vm0, %v5005_v0  ;;  %371 = vst.msk [vmem:[#allocation2 + $0xe0] sm:$0xff] %vm341_vm0, %v5005_v0 }
  0x19   : > { %373 = vst.msk [vmem:[#allocation2 + $0xf0] sm:$0xff] %vm341_vm0, %v5005_v0  ;;  %374 = vst.msk [vmem:[#allocation2 + $0xf8] sm:$0xff] %vm341_vm0, %v5005_v0 }
  0x1a   : > { %376 = vst.msk [vmem:[#allocation2 + $0x108] sm:$0xff] %vm341_vm0, %v5005_v0  ;;  %377 = vst.msk [vmem:[#allocation2 + $0x110] sm:$0xff] %vm341_vm0, %v5005_v0 }
  0x1b   : > { %379 = vst.msk [vmem:[#allocation2 + $0x120] sm:$0xff] %vm341_vm0, %v5005_v0  ;;  %380 = vst.msk [vmem:[#allocation2 + $0x128] sm:$0xff] %vm341_vm0, %v5005_v0 }
  0x1c   : > { %382 = vst.msk [vmem:[#allocation2 + $0x138] sm:$0xff] %vm341_vm0, %v5005_v0  ;;  %383 = vst.msk [vmem:[#allocation2 + $0x140] sm:$0xff] %vm341_vm0, %v5005_v0 }
  0x1d   : > { %385 = vst.msk [vmem:[#allocation2 + $0x150] sm:$0xff] %vm341_vm0, %v5005_v0  ;;  %386 = vst.msk [vmem:[#allocation2 + $0x158] sm:$0xff] %vm341_vm0, %v5005_v0 }
  0x1e   : > { %388 = vst.msk [vmem:[#allocation2 + $0x168] sm:$0xff] %vm341_vm0, %v5005_v0  ;;  %389 = vst.msk [vmem:[#allocation2 + $0x170] sm:$0xff] %vm341_vm0, %v5005_v0 }
  0x1f   : > { %391 = vst.msk [vmem:[#allocation2 + $0x180] sm:$0xff] %vm341_vm0, %v5005_v0  ;;  %392 = vst.msk [vmem:[#allocation2 + $0x188] sm:$0xff] %vm341_vm0, %v5005_v0 }
  0x20   : > { %394 = vst.msk [vmem:[#allocation2 + $0x198] sm:$0xff] %vm341_vm0, %v5005_v0  ;;  %395 = vst.msk [vmem:[#allocation2 + $0x1a0] sm:$0xff] %vm341_vm0, %v5005_v0 }
  0x21   : > { %345 = vst.msk [vmem:[#allocation2 + $0x10] sm:$0x3] %vm344_vm1, %v5005_v0  ;;  %348 = vst.msk [vmem:[#allocation2 + $0x28] sm:$0x3] %vm344_vm1, %v5005_v0 }
  0x22   : > { %351 = vst.msk [vmem:[#allocation2 + $0x40] sm:$0x3] %vm344_vm1, %v5005_v0  ;;  %354 = vst.msk [vmem:[#allocation2 + $0x58] sm:$0x3] %vm344_vm1, %v5005_v0 }
  0x23   : > { %357 = vst.msk [vmem:[#allocation2 + $0x70] sm:$0x3] %vm344_vm1, %v5005_v0  ;;  %360 = vst.msk [vmem:[#allocation2 + $0x88] sm:$0x3] %vm344_vm1, %v5005_v0 }
  0x24   : > { %363 = vst.msk [vmem:[#allocation2 + $0xa0] sm:$0x3] %vm344_vm1, %v5005_v0  ;;  %366 = vst.msk [vmem:[#allocation2 + $0xb8] sm:$0x3] %vm344_vm1, %v5005_v0 }
  0x25   : > { %369 = vst.msk [vmem:[#allocation2 + $0xd0] sm:$0x3] %vm344_vm1, %v5005_v0  ;;  %372 = vst.msk [vmem:[#allocation2 + $0xe8] sm:$0x3] %vm344_vm1, %v5005_v0 }
  0x26   : > { %375 = vst.msk [vmem:[#allocation2 + $0x100] sm:$0x3] %vm344_vm1, %v5005_v0  ;;  %378 = vst.msk [vmem:[#allocation2 + $0x118] sm:$0x3] %vm344_vm1, %v5005_v0 }
  0x27   : > { %381 = vst.msk [vmem:[#allocation2 + $0x130] sm:$0x3] %vm344_vm1, %v5005_v0  ;;  %384 = vst.msk [vmem:[#allocation2 + $0x148] sm:$0x3] %vm344_vm1, %v5005_v0 }
  0x28   : > { %387 = vst.msk [vmem:[#allocation2 + $0x160] sm:$0x3] %vm344_vm1, %v5005_v0  ;;  %390 = vst.msk [vmem:[#allocation2 + $0x178] sm:$0x3] %vm344_vm1, %v5005_v0 }
  0x29   : > { %393 = vst.msk [vmem:[#allocation2 + $0x190] sm:$0x3] %vm344_vm1, %v5005_v0  ;;  %396 = vst.msk [vmem:[#allocation2 + $0x1a8] sm:$0x3] %vm344_vm1, %v5005_v0 }
  0x2a   : > { %398 = vst.msk [vmem:[%s6487_s8] sm:$0xf] %vm397_vm2, %v5005_v0 }
  0x2b PF: > { %v4004_v1 = vld [vmem:[%s6483_s4 + $0x4] sm:$0xf]  ;;  %vm767_vm3 = vcmask 1043456   ;;  %v4071_v2 = vld [vmem:[%s6483_s4 + $0x10] sm:$0xf]  ;;  %vm587_vm4 = vcmask 64512   ;;  %v446_v10 = vlaneseq }
  0x2c   : > { %4975 = vmatprep.subr.msk.bf16.mxu1 %vm767_vm3, %v4004_v1  ;;  %4979 = vmatprep.subr.msk.bf16.mxu0 %vm767_vm3, %v4071_v2  ;;  %v769_v3 = vsel %vm767_vm3, %v4004_v1, 0  ;;  %v1831_v4 = vsel %vm767_vm3, %v4071_v2, 0  ;;  %v669_v5 = vld [vmem:[#allocation2 + $0x1] sm:$0xff]  ;;  %v670_v6 = vld [vmem:[#allocation2 + $0x9] sm:$0xff]  ;;  %v4088_v11 = vld [vmem:[%s6483_s4 + $0x14] sm:$0xf] }
  0x2d   : > { %v399_v7 = vld [vmem:[%s6481_s2] sm:$0x3]  ;;  %4380 = vmatpush3.bf16.msra.mxu1 %v769_v3  ;;  %4516 = vmatpush3.bf16.msra.mxu0 %v1831_v4  ;;  %v701_v8 = vpack.c.bf16 %v670_v6, %v669_v5  ;;  %v5159_v15 = vshrl.u32 %v446_v10, 7  ;;  %v5169_v21 = vld [vmem:[%s5062_s12 + $0x8] sm:$0xff]  ;;  %v5172_v22 = vld [vmem:[%s5062_s12 + $0x10] sm:$0xff]  ;;  %v5205_v35 = vsel %vm767_vm3, %v4088_v11, 0 }
  0x2e   : > { %v400_v9 = vmul.f32 0.001953125, %v399_v7  ;;  %4980 = vmatprep.subr.msk.bf16.mxu0 %vm767_vm3, %v4088_v11  ;;  %v668_v13 = vld [vmem:[%s6483_s4] sm:$0xf]  ;;  %v5177_v24 = vld [vmem:[%s5062_s12 + $0x18] sm:$0xff]  ;;  %v5183_v26 = vld [vmem:[%s5062_s12 + $0x28] sm:$0xff]  ;;  %vm3334_vm5 = vcmask 1041408  }
  0x2f   : > { %4381 = vmatprep.mubr.msk.bf16.mxu1 %vm587_vm4, %v701_v8  ;;  %4976 = vmatprep.subr.msk.bf16.mxu1 %vm767_vm3, %v668_v13  ;;  %v448_v18 = vsub.s32 0, %v5159_v15  ;;  %v408_v19 = vld [vmem:[%s6482_s3] sm:$0x1]  ;;  %v5186_v27 = vld [vmem:[%s5062_s12 + $0x30] sm:$0xff]  ;;  %v5189_v28 = vld [vmem:[%s5062_s12 + $0x38] sm:$0xff]  ;;  %v484_v34 = vsub.s32 1, %v5159_v15 }
  0x30   : > { %v401_v12 = vmul.f32 %v400_v9, %v400_v9  ;;  %v5166_v20 = vld [vmem:[%s5062_s12] sm:$0xff]  ;;  %v410_v30 = vrot.slane %v408_v19, 7  ;;  %v5195_v31 = vld [vmem:[%s5062_s12 + $0x48] sm:$0xff]  ;;  %v5198_v32 = vld [vmem:[%s5062_s12 + $0x50] sm:$0xff]  ;;  %v5208_v36 = vsel %vm767_vm3, %v668_v13, 0  ;;  %vm3285_vm6 = vcmask 31744  }
  0x31   : > { %v5174_v23 = vrot.slane %v400_v9, %v448_v18  ;;  %v5180_v25 = vld [vmem:[%s5062_s12 + $0x20] sm:$0xff]  ;;  %v5201_v33 = vld [vmem:[%s5062_s12 + $0x58] sm:$0xff]  ;;  %v5214_v38 = vld [vmem:[%s5062_s12 + $0x68] sm:$0xff]  ;;  %vm3602_vm7 = vcmask 57344  }
  0x32   : > { %v403_v14 = vrot.slane %v401_v12, 7  ;;  %v5192_v29 = vld [vmem:[%s5062_s12 + $0x40] sm:$0xff]  ;;  %v5217_v39 = vld [vmem:[%s5062_s12 + $0x70] sm:$0xff]  ;;  %v5228_v44 = vld [vmem:[%s5062_s12 + $0x78] sm:$0xff] }
  0x33   : > { %v5211_v37 = vld [vmem:[%s5062_s12 + $0x60] sm:$0xff]  ;;  %v450_v40 = vsub.f32 %v5166_v20, %v5174_v23  ;;  %v451_v41 = vsub.f32 %v5169_v21, %v5174_v23  ;;  %v452_v42 = vsub.f32 %v5172_v22, %v5174_v23  ;;  %v453_v43 = vsub.f32 %v5177_v24, %v5174_v23  ;;  %v5234_v46 = vld [vmem:[%s5062_s12 + $0x88] sm:$0xff]  ;;  %v5245_v51 = vld [vmem:[%s5062_s12 + $0x90] sm:$0xff] }
  0x34   : > { %v405_v16 = vsub.f32 %v400_v9, %v403_v14  ;;  %v5231_v45 = vld [vmem:[%s5062_s12 + $0x80] sm:$0xff]  ;;  %v454_v47 = vsub.f32 %v5180_v25, %v5174_v23  ;;  %v455_v48 = vsub.f32 %v5183_v26, %v5174_v23  ;;  %v456_v49 = vsub.f32 %v5186_v27, %v5174_v23  ;;  %v5248_v52 = vld [vmem:[%s5062_s12 + $0x98] sm:$0xff]  ;;  %v5262_v58 = vld [vmem:[%s5062_s12 + $0xa8] sm:$0xff] }
  0x35   : > { %v457_v50 = vsub.f32 %v5189_v28, %v5174_v23  ;;  %v5251_v53 = vld [vmem:[%s5062_s12 + $0xa0] sm:$0xff]  ;;  %v458_v54 = vsub.f32 %v5192_v29, %v5174_v23  ;;  %v459_v55 = vsub.f32 %v5195_v31, %v5174_v23  ;;  %v460_v56 = vsub.f32 %v5198_v32, %v5174_v23  ;;  %v5265_v59 = vld [vmem:[%s5062_s12 + $0xb0] sm:$0xff]  ;;  %v5268_v60 = vld [vmem:[%s5062_s12 + $0xb8] sm:$0xff] }
  0x36   : > { %v406_v17 = vadd.f32 1e-05, %v405_v16  ;;  %v461_v57 = vsub.f32 %v5201_v33, %v5174_v23  ;;  %v462_v62 = vsub.f32 %v5211_v37, %v5174_v23  ;;  %v463_v63 = vsub.f32 %v5214_v38, %v5174_v23  ;;  %v5279_v2 = vld [vmem:[%s5062_s12 + $0xc0] sm:$0xff]  ;;  %v5282_v3 = vld [vmem:[%s5062_s12 + $0xc8] sm:$0xff]  ;;  %v5285_v4 = vld [vmem:[%s5062_s12 + $0xd0] sm:$0xff] }
  0x37   : > { %v464_v0 = vsub.f32 %v5217_v39, %v5174_v23  ;;  %v465_v1 = vsub.f32 %v5228_v44, %v5174_v23  ;;  %v466_v6 = vsub.f32 %v5231_v45, %v5174_v23  ;;  %v467_v7 = vsub.f32 %v5234_v46, %v5174_v23  ;;  %v5294_v9 = vld [vmem:[%s5062_s12 + $0xd8] sm:$0xff]  ;;  %v5297_v10 = vld [vmem:[%s5062_s12 + $0xe0] sm:$0xff]  ;;  %v5300_v11 = vld [vmem:[%s5062_s12 + $0xe8] sm:$0xff] }
  0x38   : > { %4995 = vrsqrt.f32 %v406_v17  ;;  %v468_v8 = vsub.f32 %v5245_v51, %v5174_v23  ;;  %v469_v12 = vsub.f32 %v5248_v52, %v5174_v23  ;;  %v470_v13 = vsub.f32 %v5251_v53, %v5174_v23  ;;  %v5321_v20 = vld [vmem:[%s6482_s3 + $0x1] ss:$0 sm:$0xff] }
  0x39   : > { %v471_v14 = vsub.f32 %v5262_v58, %v5174_v23  ;;  %v472_v15 = vsub.f32 %v5265_v59, %v5174_v23 }
  0x42   : > { %v4996_v61 = vpop.eup %4995 }
  0x43   : > { %v412_v5 = vmul.f32 %v4996_v61, %v410_v30 }
  0x45   : > { %v5310_v16 = vrot.slane %v412_v5, %v484_v34 }
  0x47   : > { %v486_v26 = vmul.f32 %v5310_v16, %v450_v40  ;;  %v487_v27 = vmul.f32 %v5310_v16, %v451_v41  ;;  %v488_v28 = vmul.f32 %v5310_v16, %v452_v42  ;;  %v489_v30 = vmul.f32 %v5310_v16, %v453_v43 }
  0x48   : > { %v490_v34 = vmul.f32 %v5310_v16, %v454_v47  ;;  %v491_v61 = vmul.f32 %v5310_v16, %v455_v48  ;;  %v492_v5 = vmul.f32 %v5310_v16, %v456_v49  ;;  %v493_v22 = vmul.f32 %v5310_v16, %v457_v50 }
  0x49   : > { %v522_v24 = vadd.f32 %v5321_v20, %v486_v26  ;;  %v523_v25 = vadd.f32 %v5321_v20, %v487_v27  ;;  %v524_v40 = vadd.f32 %v5321_v20, %v488_v28  ;;  %v525_v41 = vadd.f32 %v5321_v20, %v489_v30 }
  0x4a   : > { %v526_v42 = vadd.f32 %v5321_v20, %v490_v34  ;;  %v527_v43 = vadd.f32 %v5321_v20, %v491_v61  ;;  %v528_v47 = vadd.f32 %v5321_v20, %v492_v5  ;;  %v529_v48 = vadd.f32 %v5321_v20, %v493_v22 }
  0x4b   : > { %v554_v21 = vmax.f32 %v522_v24, 0.0  ;;  %v555_v49 = vmax.f32 %v523_v25, 0.0  ;;  %v556_v19 = vmax.f32 %v524_v40, 0.0  ;;  %v557_v50 = vmax.f32 %v525_v41, 0.0  ;;  %v5416_v40 = vld [vmem:[%s5062_s12 + $0xf0] sm:$0xff] }
  0x4c   : > { %v558_v18 = vmax.f32 %v526_v42, 0.0  ;;  %v559_v26 = vmax.f32 %v527_v43, 0.0  ;;  %v560_v17 = vmax.f32 %v528_v47, 0.0  ;;  %v561_v27 = vmax.f32 %v529_v48, 0.0 }
  0x4d   : > { %588 = vst.msk [vmem:[#allocation2 + $0x19] sm:$0xff] %vm587_vm4, %v554_v21  ;;  %589 = vst.msk [vmem:[#allocation2 + $0x21] sm:$0xff] %vm587_vm4, %v555_v49  ;;  %v494_v22 = vmul.f32 %v5310_v16, %v458_v54  ;;  %v495_v24 = vmul.f32 %v5310_v16, %v459_v55  ;;  %v496_v21 = vmul.f32 %v5310_v16, %v460_v56 }
  0x4e   : > { %590 = vst.msk [vmem:[#allocation2 + $0x31] sm:$0xff] %vm587_vm4, %v556_v19  ;;  %591 = vst.msk [vmem:[#allocation2 + $0x39] sm:$0xff] %vm587_vm4, %v557_v50  ;;  %v497_v19 = vmul.f32 %v5310_v16, %v461_v57  ;;  %v498_v29 = vmul.f32 %v5310_v16, %v462_v62  ;;  %v499_v31 = vmul.f32 %v5310_v16, %v463_v63 }
  0x4f   : > { %592 = vst.msk [vmem:[#allocation2 + $0x49] sm:$0xff] %vm587_vm4, %v558_v18  ;;  %593 = vst.msk [vmem:[#allocation2 + $0x51] sm:$0xff] %vm587_vm4, %v559_v26  ;;  %v500_v32 = vmul.f32 %v5310_v16, %v464_v0  ;;  %v501_v33 = vmul.f32 %v5310_v16, %v465_v1  ;;  %v530_v54 = vadd.f32 %v5321_v20, %v494_v22 }
  0x50   : > { %594 = vst.msk [vmem:[#allocation2 + $0x61] sm:$0xff] %vm587_vm4, %v560_v17  ;;  %595 = vst.msk [vmem:[#allocation2 + $0x69] sm:$0xff] %vm587_vm4, %v561_v27  ;;  %v531_v37 = vadd.f32 %v5321_v20, %v495_v24  ;;  %v532_v55 = vadd.f32 %v5321_v20, %v496_v21  ;;  %v533_v38 = vadd.f32 %v5321_v20, %v497_v19  ;;  %v5450_v27 = vld [vmem:[%s6483_s4 + $0x18] sm:$0xf] }
  0x51   : > { %v534_v56 = vadd.f32 %v5321_v20, %v498_v29  ;;  %v535_v57 = vadd.f32 %v5321_v20, %v499_v31  ;;  %v536_v39 = vadd.f32 %v5321_v20, %v500_v32  ;;  %v537_v62 = vadd.f32 %v5321_v20, %v501_v33  ;;  %v445_v29 = vld [vmem:[%s5062_s12 + $0xf8] sm:$0xff]  ;;  %v5460_v31 = vld [vmem:[%s6483_s4 + $0x8] sm:$0xf] }
  0x52   : > { %v562_v63 = vmax.f32 %v530_v54, 0.0  ;;  %v563_v44 = vmax.f32 %v531_v37, 0.0  ;;  %v564_v0 = vmax.f32 %v532_v55, 0.0  ;;  %v565_v1 = vmax.f32 %v533_v38, 0.0 }
  0x53   : > { %v566_v17 = vmax.f32 %v534_v56, 0.0  ;;  %v567_v18 = vmax.f32 %v535_v57, 0.0  ;;  %v568_v25 = vmax.f32 %v536_v39, 0.0  ;;  %v569_v28 = vmax.f32 %v537_v62, 0.0 }
  0x54   : > { %596 = vst.msk [vmem:[#allocation2 + $0x79] sm:$0xff] %vm587_vm4, %v562_v63  ;;  %597 = vst.msk [vmem:[#allocation2 + $0x81] sm:$0xff] %vm587_vm4, %v563_v44  ;;  %v502_v30 = vmul.f32 %v5310_v16, %v466_v6  ;;  %v503_v34 = vmul.f32 %v5310_v16, %v467_v7  ;;  %v504_v61 = vmul.f32 %v5310_v16, %v468_v8  ;;  %v671_v45 = vld [vmem:[#allocation2 + $0x19] sm:$0xff]  ;;  %v672_v41 = vld [vmem:[#allocation2 + $0x21] sm:$0xff] }
  0x55   : > { %598 = vst.msk [vmem:[#allocation2 + $0x91] sm:$0xff] %vm587_vm4, %v564_v0  ;;  %599 = vst.msk [vmem:[#allocation2 + $0x99] sm:$0xff] %vm587_vm4, %v565_v1  ;;  %v505_v5 = vmul.f32 %v5310_v16, %v469_v12  ;;  %v1734_v6 = vld [vmem:[#allocation2 + $0x31] sm:$0xff]  ;;  %v506_v46 = vmul.f32 %v5310_v16, %v470_v13  ;;  %v507_v51 = vmul.f32 %v5310_v16, %v471_v14  ;;  %v1735_v42 = vld [vmem:[#allocation2 + $0x39] sm:$0xff] }
  0x56   : > { %600 = vst.msk [vmem:[#allocation2 + $0xa9] sm:$0xff] %vm587_vm4, %v566_v17  ;;  %601 = vst.msk [vmem:[#allocation2 + $0xb1] sm:$0xff] %vm587_vm4, %v567_v18  ;;  %v508_v52 = vmul.f32 %v5310_v16, %v472_v15  ;;  %v6488_v7 = vsub.f32 %v5268_v60, %v5174_v23  ;;  %v702_v12 = vpack.c.bf16 %v672_v41, %v671_v45  ;;  %v675_v53 = vld [vmem:[#allocation2 + $0x49] sm:$0xff]  ;;  %v676_v43 = vld [vmem:[#allocation2 + $0x51] sm:$0xff] }
  0x57   : > { %602 = vst.msk [vmem:[#allocation2 + $0xc1] sm:$0xff] %vm587_vm4, %v568_v25  ;;  %603 = vst.msk [vmem:[#allocation2 + $0xc9] sm:$0xff] %vm587_vm4, %v569_v28  ;;  %v538_v13 = vadd.f32 %v5321_v20, %v502_v30  ;;  %v539_v58 = vadd.f32 %v5321_v20, %v503_v34  ;;  %v540_v14 = vadd.f32 %v5321_v20, %v504_v61  ;;  %v1738_v32 = vld [vmem:[#allocation2 + $0x61] sm:$0xff]  ;;  %v1739_v33 = vld [vmem:[#allocation2 + $0x69] sm:$0xff] }
  0x58   : > { %v509_v8 = vmul.f32 %v5310_v16, %v6488_v7  ;;  %v1765_v47 = vpack.c.bf16 %v1735_v42, %v1734_v6  ;;  %v704_v48 = vpack.c.bf16 %v676_v43, %v675_v53  ;;  %v541_v59 = vadd.f32 %v5321_v20, %v505_v5  ;;  %4382 = vmatmul.mubr.msk.bf16.vlgmr.msra.gmra.mrb[0].mxu1 %vm587_vm4, %v702_v12 }
  0x59   : > { %v542_v15 = vadd.f32 %v5321_v20, %v506_v46  ;;  %4517 = vmatprep.mubr.msk.bf16.mxu0 %vm587_vm4, %v702_v12  ;;  %v570_v60 = vmax.f32 %v538_v13, 0.0  ;;  %v571_v49 = vmax.f32 %v539_v58, 0.0  ;;  %v572_v50 = vmax.f32 %v540_v14, 0.0  ;;  %4414 = vmatpush3.bf16.msra.mxu1 %v5208_v36 }
  0x5a   : > { %v480_v26 = vsub.f32 %v5416_v40, %v5174_v23  ;;  %4518 = vmatmul.mubr.msk.bf16.vlgmr.msra.gmra.mrb[0].mxu0 %vm587_vm4, %v1765_v47  ;;  %v573_v22 = vmax.f32 %v541_v59, 0.0  ;;  %v543_v24 = vadd.f32 %v5321_v20, %v507_v51  ;;  %v544_v19 = vadd.f32 %v5321_v20, %v508_v52  ;;  %4385 = vmatprep.mubr.msk.bf16.mxu1 %vm587_vm4, %v1765_v47 }
  0x5b   : > { %v574_v21 = vmax.f32 %v542_v15, 0.0  ;;  %4550 = vmatpush3.bf16.msra.mxu0 %v5205_v35  ;;  %604 = vst.msk [vmem:[#allocation2 + $0xd9] sm:$0xff] %vm587_vm4, %v570_v60  ;;  %605 = vst.msk [vmem:[#allocation2 + $0xe1] sm:$0xff] %vm587_vm4, %v571_v49  ;;  %v545_v36 = vadd.f32 %v5321_v20, %v509_v8  ;;  %v6489_v54 = vsub.f32 %v5279_v2, %v5174_v23  ;;  %4521 = vmatprep.mubr.msk.bf16.mxu0 %vm587_vm4, %v704_v48  ;;  %v679_v38 = vld [vmem:[#allocation2 + $0x79] sm:$0xff]  ;;  %v680_v56 = vld [vmem:[#allocation2 + $0x81] sm:$0xff] }
  0x5c   : > { %606 = vst.msk [vmem:[#allocation2 + $0xf1] sm:$0xff] %vm587_vm4, %v572_v50  ;;  %v6490_v35 = vsub.f32 %v5282_v3, %v5174_v23  ;;  %607 = vst.msk [vmem:[#allocation2 + $0xf9] sm:$0xff] %vm587_vm4, %v573_v22  ;;  %v575_v57 = vmax.f32 %v543_v24, 0.0  ;;  %v576_v39 = vmax.f32 %v544_v19, 0.0  ;;  %v6491_v2 = vsub.f32 %v5285_v4, %v5174_v23  ;;  %4981 = vmatprep.subr.msk.bf16.mxu0 %vm767_vm3, %v5450_v27  ;;  %v1742_v51 = vld [vmem:[#allocation2 + $0x91] sm:$0xff]  ;;  %v1743_v52 = vld [vmem:[#allocation2 + $0x99] sm:$0xff] }
  0x5d   : > { %v510_v37 = vmul.f32 %v5310_v16, %v6489_v54  ;;  %608 = vst.msk [vmem:[#allocation2 + $0x109] sm:$0xff] %vm587_vm4, %v574_v21  ;;  %v6492_v3 = vsub.f32 %v5294_v9, %v5174_v23  ;;  %v577_v44 = vmax.f32 %v545_v36, 0.0  ;;  %v481_v17 = vsub.f32 %v445_v29, %v5174_v23  ;;  %4977 = vmatprep.subr.msk.bf16.mxu1 %vm767_vm3, %v5460_v31  ;;  %v684_v12 = vld [vmem:[#allocation2 + $0xb1] sm:$0xff] }
  0x5e   : > { %v511_v55 = vmul.f32 %v5310_v16, %v6490_v35  ;;  %v512_v62 = vmul.f32 %v5310_v16, %v6491_v2  ;;  %v1767_v4 = vpack.c.bf16 %v1739_v33, %v1738_v32  ;;  %609 = vst.msk [vmem:[#allocation2 + $0x111] sm:$0xff] %vm587_vm4, %v575_v57  ;;  %610 = vst.msk [vmem:[#allocation2 + $0x121] sm:$0xff] %vm587_vm4, %v576_v39  ;;  %v1747_v14 = vld [vmem:[#allocation2 + $0xc9] sm:$0xff]  ;;  %v620_v57 = vld [vmem:[#allocation2] sm:$0xff] }
  0x5f   : > { %v513_v63 = vmul.f32 %v5310_v16, %v6492_v3  ;;  %v546_v0 = vadd.f32 %v5321_v20, %v510_v37  ;;  %v706_v25 = vpack.c.bf16 %v680_v56, %v679_v38  ;;  %611 = vst.msk [vmem:[#allocation2 + $0x129] sm:$0xff] %vm587_vm4, %v577_v44  ;;  %v6493_v34 = vsub.f32 %v5297_v10, %v5174_v23  ;;  %v2026_v3 = vld [vmem:[#allocation2 + $0x1a] sm:$0xff] }
  0x60   : > { %v547_v1 = vadd.f32 %v5321_v20, %v511_v55  ;;  %v548_v9 = vadd.f32 %v5321_v20, %v512_v62  ;;  %v6494_v45 = vsub.f32 %v5300_v11, %v5174_v23  ;;  %v516_v6 = vmul.f32 %v5310_v16, %v480_v26  ;;  %4386 = vmatmul.mubr.msk.bf16.gmra.mrb[4].mxu1 %vm587_vm4, %v704_v48  ;;  %v621_v62 = vld [vmem:[#allocation2 + $0x8] sm:$0xff] }
  0x61   : > { %v549_v18 = vadd.f32 %v5321_v20, %v513_v63  ;;  %v578_v28 = vmax.f32 %v546_v0, 0.0  ;;  %v514_v61 = vmul.f32 %v5310_v16, %v6493_v34  ;;  %v517_v10 = vmul.f32 %v5310_v16, %v481_v17  ;;  %4389 = vmatprep.mubr.msk.bf16.mxu1 %vm587_vm4, %v1767_v4  ;;  %v2027_v63 = vld [vmem:[#allocation2 + $0x22] sm:$0xff]  ;;  %v622_v17 = vld [vmem:[#allocation2 + $0x18] sm:$0xff]  ;;  %v2030_v34 = vld [vmem:[#allocation2 + $0x4a] sm:$0xff] }
  0x62   : > { %v579_v30 = vmax.f32 %v547_v1, 0.0  ;;  %v580_v5 = vmax.f32 %v548_v9, 0.0  ;;  %v515_v41 = vmul.f32 %v5310_v16, %v6494_v45  ;;  %4522 = vmatmul.mubr.msk.bf16.gmra.mrb[4].mxu0 %vm587_vm4, %v1767_v4  ;;  %v552_v11 = vadd.f32 %v5321_v20, %v516_v6  ;;  %v683_v16 = vld [vmem:[#allocation2 + $0xa9] sm:$0xff]  ;;  %v687_v47 = vld [vmem:[#allocation2 + $0xd9] sm:$0xff]  ;;  %v688_v48 = vld [vmem:[#allocation2 + $0xe1] sm:$0xff] }
  0x63   : > { %v581_v40 = vmax.f32 %v549_v18, 0.0  ;;  %612 = vst.msk [vmem:[#allocation2 + $0x139] sm:$0xff] %vm587_vm4, %v578_v28  ;;  %v550_v46 = vadd.f32 %v5321_v20, %v514_v61  ;;  %4525 = vmatprep.mubr.msk.bf16.mxu0 %vm587_vm4, %v706_v25  ;;  %v553_v8 = vadd.f32 %v5321_v20, %v517_v10  ;;  %v1769_v13 = vpack.c.bf16 %v1743_v52, %v1742_v51  ;;  %v1750_v60 = vld [vmem:[#allocation2 + $0xf1] sm:$0xff]  ;;  %v1751_v49 = vld [vmem:[#allocation2 + $0xf9] sm:$0xff]  ;;  %v629_v52 = vld [vmem:[#allocation2 + $0x68] sm:$0xff] }
  0x64   : > { %613 = vst.msk [vmem:[#allocation2 + $0x141] sm:$0xff] %vm587_vm4, %v579_v30  ;;  %614 = vst.msk [vmem:[#allocation2 + $0x151] sm:$0xff] %vm587_vm4, %v580_v5  ;;  %v551_v23 = vadd.f32 %v5321_v20, %v515_v41  ;;  %v584_v53 = vmax.f32 %v552_v11, 0.0  ;;  %v5524_v58 = vpack.c.bf16 %v684_v12, %v683_v16  ;;  %v1746_v20 = vld [vmem:[#allocation2 + $0xc1] sm:$0xff]  ;;  %v5534_v15 = vpack.c.bf16 %v688_v48, %v687_v47  ;;  %v691_v50 = vld [vmem:[#allocation2 + $0x109] sm:$0xff] }
  0x65   : > { %615 = vst.msk [vmem:[#allocation2 + $0x159] sm:$0xff] %vm587_vm4, %v581_v40  ;;  %v582_v7 = vmax.f32 %v550_v46, 0.0  ;;  %v585_v43 = vmax.f32 %v553_v8, 0.0  ;;  %v5532_v59 = vpack.c.bf16 %v1747_v14, %v1746_v20  ;;  %v692_v26 = vld [vmem:[#allocation2 + $0x111] sm:$0xff]  ;;  %v5544_v22 = vpack.c.bf16 %v1751_v49, %v1750_v60  ;;  %v1754_v21 = vld [vmem:[#allocation2 + $0x121] sm:$0xff] }
  0x66   : > { %v583_v42 = vmax.f32 %v551_v23, 0.0  ;;  %618 = vst.msk [vmem:[#allocation2 + $0x181] sm:$0xff] %vm587_vm4, %v584_v53  ;;  %v5546_v24 = vpack.c.bf16 %v692_v26, %v691_v50  ;;  %v1755_v19 = vld [vmem:[#allocation2 + $0x129] sm:$0xff]  ;;  %v652_v0 = vpack.c.bf16 %v621_v62, %v620_v57  ;;  %v5582_v1 = vpack.c.bf16 %v2027_v63, %v2026_v3  ;;  %v623_v4 = vld [vmem:[#allocation2 + $0x20] sm:$0xff]  ;;  %v2028_v9 = vld [vmem:[#allocation2 + $0x32] sm:$0xff] }
  0x67   : > { %616 = vst.msk [vmem:[#allocation2 + $0x169] sm:$0xff] %vm587_vm4, %v582_v7  ;;  %619 = vst.msk [vmem:[#allocation2 + $0x189] sm:$0xff] %vm587_vm4, %v585_v43  ;;  %v5556_v33 = vpack.c.bf16 %v1755_v19, %v1754_v21  ;;  %v2029_v18 = vld [vmem:[#allocation2 + $0x3a] sm:$0xff]  ;;  %v5591_v30 = vpack.c.bf16 %v623_v4, %v622_v17  ;;  %v2031_v61 = vld [vmem:[#allocation2 + $0x52] sm:$0xff]  ;;  %v1243_v40 = vsel %vm767_vm3, %v5460_v31, 0  ;;  %v2420_v41 = vsel %vm767_vm3, %v5450_v27, 0 }
  0x68   : > { %617 = vst.msk [vmem:[#allocation2 + $0x171] sm:$0xff] %vm587_vm4, %v583_v42  ;;  %4390 = vmatmul.mubr.msk.bf16.gmra.mrb[8].mxu1 %vm587_vm4, %v706_v25  ;;  %v624_v25 = vld [vmem:[#allocation2 + $0x30] sm:$0xff]  ;;  %v625_v28 = vld [vmem:[#allocation2 + $0x38] sm:$0xff]  ;;  %v5593_v5 = vpack.c.bf16 %v2029_v18, %v2028_v9  ;;  %v5601_v6 = vpack.c.bf16 %v2031_v61, %v2030_v34  ;;  %v626_v46 = vld [vmem:[#allocation2 + $0x48] sm:$0xff] }
  0x69   : > { %4393 = vmatprep.mubr.msk.bf16.mxu1 %vm587_vm4, %v1769_v13  ;;  %v5597_v45 = vpack.c.bf16 %v625_v28, %v624_v25  ;;  %v5608_v10 = vld [vmem:[%s6483_s4 + $0x1c] sm:$0xf]  ;;  %v627_v31 = vld [vmem:[#allocation2 + $0x50] sm:$0xff]  ;;  %v2032_v23 = vld [vmem:[#allocation2 + $0x62] sm:$0xff] }
  0x6a   : > { %4526 = vmatmul.mubr.msk.bf16.gmra.mrb[8].mxu0 %vm587_vm4, %v1769_v13  ;;  %v695_v29 = vld [vmem:[#allocation2 + $0x139] sm:$0xff]  ;;  %v5615_v27 = vld [vmem:[%s6483_s4 + $0xc] sm:$0xf]  ;;  %v2035_v8 = vld [vmem:[#allocation2 + $0x82] sm:$0xff]  ;;  %v5623_v16 = vpack.c.bf16 %v627_v31, %v626_v46 }
  0x6b   : > { %4529 = vmatprep.mubr.msk.bf16.mxu0 %vm587_vm4, %v5524_v58  ;;  %v696_v32 = vld [vmem:[#allocation2 + $0x141] sm:$0xff]  ;;  %v1758_v54 = vld [vmem:[#allocation2 + $0x151] sm:$0xff] }
  0x6c   : > { %v5558_v36 = vpack.c.bf16 %v696_v32, %v695_v29  ;;  %v1759_v37 = vld [vmem:[#allocation2 + $0x159] sm:$0xff]  ;;  %v2033_v11 = vld [vmem:[#allocation2 + $0x6a] sm:$0xff] }
  0x6d   : > { %v5568_v38 = vpack.c.bf16 %v1759_v37, %v1758_v54  ;;  %v1762_v39 = vld [vmem:[#allocation2 + $0x181] sm:$0xff]  ;;  %v5627_v12 = vpack.c.bf16 %v2033_v11, %v2032_v23  ;;  %v630_v43 = vld [vmem:[#allocation2 + $0x78] sm:$0xff]  ;;  %v632_v47 = vld [vmem:[#allocation2 + $0x90] sm:$0xff] }
  0x6e   : > { %v699_v35 = vld [vmem:[#allocation2 + $0x169] sm:$0xff]  ;;  %v628_v51 = vld [vmem:[#allocation2 + $0x60] sm:$0xff]  ;;  %v2036_v20 = vld [vmem:[#allocation2 + $0x92] sm:$0xff] }
  0x6f   : > { %v700_v55 = vld [vmem:[#allocation2 + $0x171] sm:$0xff]  ;;  %v1763_v2 = vld [vmem:[#allocation2 + $0x189] sm:$0xff]  ;;  %v2034_v7 = vld [vmem:[#allocation2 + $0x7a] sm:$0xff]  ;;  %v5629_v42 = vpack.c.bf16 %v629_v52, %v628_v51 }
  0x70   : > { %4394 = vmatmul.mubr.msk.bf16.gmra.mrb[12].mxu1 %vm587_vm4, %v5524_v58  ;;  %v5570_v56 = vpack.c.bf16 %v700_v55, %v699_v35  ;;  %v5580_v44 = vpack.c.bf16 %v1763_v2, %v1762_v39  ;;  %v5631_v53 = vpack.c.bf16 %v2035_v8, %v2034_v7  ;;  %v631_v13 = vld [vmem:[#allocation2 + $0x80] sm:$0xff]  ;;  %v633_v48 = vld [vmem:[#allocation2 + $0x98] sm:$0xff]  ;;  %v2038_v60 = vld [vmem:[#allocation2 + $0xaa] sm:$0xff] }
  0x71   : > { %4397 = vmatprep.mubr.msk.bf16.mxu1 %vm587_vm4, %v5532_v59  ;;  %v2037_v14 = vld [vmem:[#allocation2 + $0x9a] sm:$0xff]  ;;  %v2039_v49 = vld [vmem:[#allocation2 + $0xb2] sm:$0xff]  ;;  %v5641_v50 = vpack.c.bf16 %v631_v13, %v630_v43  ;;  %v5645_v21 = vpack.c.bf16 %v633_v48, %v632_v47  ;;  %v634_v29 = vld [vmem:[#allocation2 + $0xa8] sm:$0xff] }
  0x72   : > { %4530 = vmatmul.mubr.msk.bf16.gmra.mrb[12].mxu0 %vm587_vm4, %v5532_v59  ;;  %v5643_v26 = vpack.c.bf16 %v2037_v14, %v2036_v20  ;;  %v5647_v19 = vpack.c.bf16 %v2039_v49, %v2038_v60  ;;  %v635_v32 = vld [vmem:[#allocation2 + $0xb0] sm:$0xff]  ;;  %v2040_v54 = vld [vmem:[#allocation2 + $0xc2] sm:$0xff]  ;;  %v2042_v57 = vld [vmem:[#allocation2 + $0xda] sm:$0xff] }
  0x73   : > { %4533 = vmatprep.mubr.msk.bf16.mxu0 %vm587_vm4, %v5534_v15  ;;  %v2041_v37 = vld [vmem:[#allocation2 + $0xca] sm:$0xff]  ;;  %v636_v35 = vld [vmem:[#allocation2 + $0xc0] sm:$0xff]  ;;  %v5657_v2 = vpack.c.bf16 %v635_v32, %v634_v29  ;;  %v2044_v4 = vld [vmem:[#allocation2 + $0xf2] sm:$0xff] }
  0x74   : > { %v637_v55 = vld [vmem:[#allocation2 + $0xc8] sm:$0xff]  ;;  %v5659_v62 = vpack.c.bf16 %v2041_v37, %v2040_v54  ;;  %v639_v17 = vld [vmem:[#allocation2 + $0xe0] sm:$0xff]  ;;  %v640_v18 = vld [vmem:[#allocation2 + $0xf0] sm:$0xff] }
  0x75   : > { %v2043_v39 = vld [vmem:[#allocation2 + $0xe2] sm:$0xff]  ;;  %v5661_v3 = vpack.c.bf16 %v637_v55, %v636_v35  ;;  %v2045_v9 = vld [vmem:[#allocation2 + $0xfa] sm:$0xff]  ;;  %v2046_v28 = vld [vmem:[#allocation2 + $0x10a] sm:$0xff] }
  0x76   : > { %v5663_v63 = vpack.c.bf16 %v2043_v39, %v2042_v57  ;;  %v641_v25 = vld [vmem:[#allocation2 + $0xf8] sm:$0xff]  ;;  %v642_v31 = vld [vmem:[#allocation2 + $0x108] sm:$0xff]  ;;  %v643_v23 = vld [vmem:[#allocation2 + $0x110] sm:$0xff] }
  0x77   : > { %v2047_v34 = vld [vmem:[#allocation2 + $0x112] sm:$0xff]  ;;  %v2048_v11 = vld [vmem:[#allocation2 + $0x122] sm:$0xff]  ;;  %v2049_v51 = vld [vmem:[#allocation2 + $0x12a] sm:$0xff]  ;;  %v5689_v13 = vpack.c.bf16 %v643_v23, %v642_v31 }
  0x78   : > { %4398 = vmatmul.mubr.msk.bf16.gmra.mrb[16].mxu1 %vm587_vm4, %v5534_v15  ;;  %v5679_v46 = vpack.c.bf16 %v2047_v34, %v2046_v28  ;;  %v644_v52 = vld [vmem:[#allocation2 + $0x120] sm:$0xff]  ;;  %v645_v7 = vld [vmem:[#allocation2 + $0x128] sm:$0xff]  ;;  %v5691_v20 = vpack.c.bf16 %v2049_v51, %v2048_v11  ;;  %v646_v48 = vld [vmem:[#allocation2 + $0x138] sm:$0xff]  ;;  %v1537_v11 = vsel %vm767_vm3, %v5615_v27, 0  ;;  %v2714_v51 = vsel %vm767_vm3, %v5608_v10, 0 }
  0x79   : > { %4401 = vmatprep.mubr.msk.bf16.mxu1 %vm587_vm4, %v5544_v22  ;;  %v2050_v8 = vld [vmem:[#allocation2 + $0x13a] sm:$0xff]  ;;  %v2051_v43 = vld [vmem:[#allocation2 + $0x142] sm:$0xff]  ;;  %v5693_v14 = vpack.c.bf16 %v645_v7, %v644_v52  ;;  %v2052_v49 = vld [vmem:[#allocation2 + $0x152] sm:$0xff] }
  0x7a   : > { %4534 = vmatmul.mubr.msk.bf16.gmra.mrb[16].mxu0 %vm587_vm4, %v5544_v22  ;;  %v5695_v47 = vpack.c.bf16 %v2051_v43, %v2050_v8  ;;  %v647_v60 = vld [vmem:[#allocation2 + $0x140] sm:$0xff]  ;;  %v648_v32 = vld [vmem:[#allocation2 + $0x150] sm:$0xff]  ;;  %v649_v54 = vld [vmem:[#allocation2 + $0x158] sm:$0xff] }
  0x7b   : > { %4537 = vmatprep.mubr.msk.bf16.mxu0 %vm587_vm4, %v5546_v24  ;;  %v2053_v29 = vld [vmem:[#allocation2 + $0x15a] sm:$0xff]  ;;  %v2054_v37 = vld [vmem:[#allocation2 + $0x16a] sm:$0xff]  ;;  %v2055_v35 = vld [vmem:[#allocation2 + $0x172] sm:$0xff]  ;;  %v5705_v55 = vpack.c.bf16 %v647_v60, %v646_v48  ;;  %v5709_v39 = vpack.c.bf16 %v649_v54, %v648_v32 }
  0x7c   : > { %v5707_v57 = vpack.c.bf16 %v2053_v29, %v2052_v49  ;;  %v1145_v28 = vld [vmem:[#allocation2 + $0xa] sm:$0xff]  ;;  %v4139_v52 = vld [vmem:[%s6483_s4 + $0x20] sm:$0xf]  ;;  %v2351_v8 = vld [vmem:[#allocation2 + $0x198] sm:$0xff] }
  0x7d   : > { %v3284_v7 = vld [vmem:[%s6484_s5] sm:$0x3]  ;;  %v2615_v48 = vld [vmem:[#allocation2 + $0x31] sm:$0xff]  ;;  %v2617_v32 = vld [vmem:[#allocation2 + $0x49] sm:$0xff] }
  0x7e   : > { %v2352_v43 = vld [vmem:[#allocation2 + $0x1a0] sm:$0xff]  ;;  %v2618_v54 = vld [vmem:[#allocation2 + $0x51] sm:$0xff] }
  0x7f   : > { %v2616_v60 = vld [vmem:[#allocation2 + $0x39] sm:$0xff]  ;;  %v2368_v49 = vpack.c.bf16 %v2352_v43, %v2351_v8  ;;  %v4179_v8 = vld [vmem:[%s5072_s18 + $0x129] sm:$0xff]  ;;  %v4181_v43 = vld [vmem:[%s5072_s18 + $0x141] sm:$0xff] }
  0x80   : > { %4402 = vmatmul.mubr.msk.bf16.gmra.mrb[20].mxu1 %vm587_vm4, %v5546_v24  ;;  %v2647_v29 = vpack.c.bf16 %v2616_v60, %v2615_v48 }
  0x81   : > { %4405 = vmatprep.mubr.msk.bf16.mxu1 %vm587_vm4, %v5556_v33 }
  0x82   : > { %4538 = vmatmul.mubr.msk.bf16.gmra.mrb[20].mxu0 %vm587_vm4, %v5556_v33 }
  0x83   : > { %4541 = vmatprep.mubr.msk.bf16.mxu0 %vm587_vm4, %v5558_v36 }
  0x88   : > { %4406 = vmatmul.mubr.msk.bf16.gmra.mrb[24].mxu1 %vm587_vm4, %v5558_v36 }
  0x89   : > { %4409 = vmatprep.mubr.msk.bf16.mxu1 %vm587_vm4, %v5568_v38 }
  0x8a   : > { %4542 = vmatmul.mubr.msk.bf16.gmra.mrb[24].mxu0 %vm587_vm4, %v5568_v38 }
  0x8b   : > { %4545 = vmatprep.mubr.msk.bf16.mxu0 %vm587_vm4, %v5570_v56 }
  0x90   : > { %4410 = vmatmul.mubr.msk.bf16.gmra.mrb[28].mxu1 %vm587_vm4, %v5570_v56 }
  0x91   : > { %4415 = vmatprep.mubr.msk.bf16.mxu1 %vm587_vm4, %v652_v0  ;;  %v638_v0 = vld [vmem:[#allocation2 + $0xd8] sm:$0xff] }
  0x92   : > { %4546 = vmatmul.mubr.msk.bf16.gmra.mrb[28].mxu0 %vm587_vm4, %v5580_v44  ;;  %v5673_v61 = vpack.c.bf16 %v639_v17, %v638_v0  ;;  %v5711_v0 = vpack.c.bf16 %v2055_v35, %v2054_v37  ;;  %v650_v17 = vld [vmem:[#allocation2 + $0x168] sm:$0xff] }
  0x93   : > { %4551 = vmatprep.mubr.msk.bf16.mxu0 %vm587_vm4, %v5582_v1  ;;  %v2619_v37 = vld [vmem:[#allocation2 + $0x61] sm:$0xff]  ;;  %v2620_v35 = vld [vmem:[#allocation2 + $0x69] sm:$0xff] }
  0x98   : > { %4416 = vmatmul.mubr.msk.bf16.vlgmr.msra.gmra.mrb[0].mxu1 %vm587_vm4, %v5591_v30 }
  0x99   : > { %4448 = vmatpush3.bf16.msra.mxu1 %v1243_v40  ;;  %4419 = vmatprep.mubr.msk.bf16.mxu1 %vm587_vm4, %v5597_v45  ;;  %v5675_v40 = vpack.c.bf16 %v2045_v9, %v2044_v4  ;;  %v651_v4 = vld [vmem:[#allocation2 + $0x170] sm:$0xff]  ;;  %v1144_v9 = vld [vmem:[#allocation2 + $0x2] sm:$0xff] }
  0x9a   : > { %4552 = vmatmul.mubr.msk.bf16.vlgmr.msra.gmra.mrb[0].mxu0 %vm587_vm4, %v5593_v5  ;;  %4978 = vmatprep.subr.msk.bf16.mxu1 %vm767_vm3, %v5615_v27  ;;  %v5721_v34 = vpack.c.bf16 %v651_v4, %v650_v17  ;;  %v1176_v23 = vpack.c.bf16 %v1145_v28, %v1144_v9  ;;  %v2648_v17 = vpack.c.bf16 %v2618_v54, %v2617_v32  ;;  %v3336_v4 = vsel %vm3334_vm5, %v3284_v7, 0  ;;  %v2623_v28 = vld [vmem:[#allocation2 + $0x91] sm:$0xff] }
  0x9b   : > { %4584 = vmatpush3.bf16.msra.mxu0 %v2420_v41  ;;  %4555 = vmatprep.mubr.msk.bf16.mxu0 %vm587_vm4, %v5601_v6  ;;  %v5677_v41 = vpack.c.bf16 %v641_v25, %v640_v18  ;;  %v2056_v18 = vld [vmem:[#allocation2 + $0x182] sm:$0xff]  ;;  %v2057_v25 = vld [vmem:[#allocation2 + $0x18a] sm:$0xff]  ;;  %v3008_v9 = vsel %vm767_vm3, %v4139_v52, 0 }
  0x9c   : > { %4982 = vmatprep.subr.msk.bf16.mxu0 %vm767_vm3, %v5608_v10  ;;  %v5723_v31 = vpack.c.bf16 %v2057_v25, %v2056_v18  ;;  %v2350_v10 = vld [vmem:[#allocation2 + $0x188] sm:$0xff]  ;;  %v2649_v18 = vpack.c.bf16 %v2620_v35, %v2619_v37  ;;  %v2939_v35 = vld [vmem:[#allocation2 + $0x19a] sm:$0xff] }
  0x9d   : > { %v2622_v25 = vld [vmem:[#allocation2 + $0x81] sm:$0xff] }
  0x9e   : > { %v4186_v37 = vld [vmem:[%s5072_s18 + $0x181] sm:$0xff] }
  0xa0   : > { %4420 = vmatmul.mubr.msk.bf16.gmra.mrb[4].mxu1 %vm587_vm4, %v5623_v16 }
  0xa1   : > { %4423 = vmatprep.mubr.msk.bf16.mxu1 %vm587_vm4, %v5629_v42 }
  0xa2   : > { %4556 = vmatmul.mubr.msk.bf16.gmra.mrb[4].mxu0 %vm587_vm4, %v5627_v12 }
  0xa3   : > { %4559 = vmatprep.mubr.msk.bf16.mxu0 %vm587_vm4, %v5631_v53 }
  0xa8   : > { %4424 = vmatmul.mubr.msk.bf16.gmra.mrb[8].mxu1 %vm587_vm4, %v5641_v50 }
  0xa9   : > { %4427 = vmatprep.mubr.msk.bf16.mxu1 %vm587_vm4, %v5645_v21 }
  0xaa   : > { %4560 = vmatmul.mubr.msk.bf16.gmra.mrb[8].mxu0 %vm587_vm4, %v5643_v26 }
  0xab   : > { %4563 = vmatprep.mubr.msk.bf16.mxu0 %vm587_vm4, %v5647_v19 }
  0xb0   : > { %4428 = vmatmul.mubr.msk.bf16.gmra.mrb[12].mxu1 %vm587_vm4, %v5657_v2 }
  0xb1   : > { %4431 = vmatprep.mubr.msk.bf16.mxu1 %vm587_vm4, %v5661_v3 }
  0xb2   : > { %4564 = vmatmul.mubr.msk.bf16.gmra.mrb[12].mxu0 %vm587_vm4, %v5659_v62 }
  0xb3   : > { %4567 = vmatprep.mubr.msk.bf16.mxu0 %vm587_vm4, %v5663_v63 }
  0xb8   : > { %4432 = vmatmul.mubr.msk.bf16.gmra.mrb[16].mxu1 %vm587_vm4, %v5673_v61 }
  0xb9   : > { %4435 = vmatprep.mubr.msk.bf16.mxu1 %vm587_vm4, %v5677_v41 }
  0xba   : > { %4568 = vmatmul.mubr.msk.bf16.gmra.mrb[16].mxu0 %vm587_vm4, %v5675_v40 }
  0xbb   : > { %4571 = vmatprep.mubr.msk.bf16.mxu0 %vm587_vm4, %v5679_v46 }
  0xc0   : > { %4436 = vmatmul.mubr.msk.bf16.gmra.mrb[20].mxu1 %vm587_vm4, %v5689_v13 }
  0xc1   : > { %4439 = vmatprep.mubr.msk.bf16.mxu1 %vm587_vm4, %v5693_v14 }
  0xc2   : > { %4572 = vmatmul.mubr.msk.bf16.gmra.mrb[20].mxu0 %vm587_vm4, %v5691_v20 }
  0xc3   : > { %4575 = vmatprep.mubr.msk.bf16.mxu0 %vm587_vm4, %v5695_v47 }
  0xc8   : > { %4440 = vmatmul.mubr.msk.bf16.gmra.mrb[24].mxu1 %vm587_vm4, %v5705_v55 }
  0xc9   : > { %4443 = vmatprep.mubr.msk.bf16.mxu1 %vm587_vm4, %v5709_v39 }
  0xca   : > { %4576 = vmatmul.mubr.msk.bf16.gmra.mrb[24].mxu0 %vm587_vm4, %v5707_v57 }
  0xcb   : > { %4579 = vmatprep.mubr.msk.bf16.mxu0 %vm587_vm4, %v5711_v0 }
  0xd0   : > { %4444 = vmatmul.mubr.msk.bf16.gmra.mrb[28].mxu1 %vm587_vm4, %v5721_v34 }
  0xd1   : > { %4449 = vmatprep.mubr.msk.bf16.mxu1 %vm587_vm4, %v1176_v23  ;;  %v2624_v23 = vld [vmem:[#allocation2 + $0x99] sm:$0xff] }
  0xd2   : > { %4580 = vmatmul.mubr.msk.bf16.gmra.mrb[28].mxu0 %vm587_vm4, %v5723_v31 }
  0xd3   : > { %4585 = vmatprep.mubr.msk.bf16.mxu0 %vm587_vm4, %v5597_v45 }
  0xd8   : > { %4450 = vmatmul.mubr.msk.bf16.vlgmr.msra.gmra.mrb[0].mxu1 %vm587_vm4, %v5582_v1  ;;  %v2349_v1 = vld [vmem:[#allocation2 + $0x180] sm:$0xff] }
  0xd9   : > { %4482 = vmatpush3.bf16.msra.mxu1 %v1537_v11  ;;  %4453 = vmatprep.mubr.msk.bf16.mxu1 %vm587_vm4, %v5593_v5  ;;  %v5792_v27 = vpack.c.bf16 %v2350_v10, %v2349_v1  ;;  %v4177_v1 = vld [vmem:[%s5072_s18 + $0x111] sm:$0xff] }
  0xda   : > { %4586 = vmatmul.mubr.msk.bf16.vlgmr.msra.gmra.mrb[0].mxu0 %vm587_vm4, %v5623_v16  ;;  %4984 = vmatprep.subr.msk.bf16.mxu1 %vm3334_vm5, %v3284_v7  ;;  %v4175_v7 = vld [vmem:[%s5072_s18 + $0xf9] sm:$0xff] }
  0xdb   : > { %4618 = vmatpush3.bf16.msra.mxu0 %v2714_v51  ;;  %4589 = vmatprep.mubr.msk.bf16.mxu0 %vm587_vm4, %v5629_v42  ;;  %v2651_v51 = vpack.c.bf16 %v2624_v23, %v2623_v28 }
  0xdc   : > { %4983 = vmatprep.subr.msk.bf16.mxu0 %vm767_vm3, %v4139_v52 }
  0xe0   : > { %4454 = vmatmul.mubr.msk.bf16.gmra.mrb[4].mxu1 %vm587_vm4, %v5601_v6 }
  0xe1   : > { %4457 = vmatprep.mubr.msk.bf16.mxu1 %vm587_vm4, %v5627_v12 }
  0xe2   : > { %4590 = vmatmul.mubr.msk.bf16.gmra.mrb[4].mxu0 %vm587_vm4, %v5641_v50 }
  0xe3   : > { %4593 = vmatprep.mubr.msk.bf16.mxu0 %vm587_vm4, %v5645_v21 }
  0xe8   : > { %4458 = vmatmul.mubr.msk.bf16.gmra.mrb[8].mxu1 %vm587_vm4, %v5631_v53 }
  0xe9   : > { %4461 = vmatprep.mubr.msk.bf16.mxu1 %vm587_vm4, %v5643_v26 }
  0xea   : > { %4594 = vmatmul.mubr.msk.bf16.gmra.mrb[8].mxu0 %vm587_vm4, %v5657_v2 }
  0xeb   : > { %4597 = vmatprep.mubr.msk.bf16.mxu0 %vm587_vm4, %v5661_v3 }
  0xf0   : > { %4462 = vmatmul.mubr.msk.bf16.gmra.mrb[12].mxu1 %vm587_vm4, %v5647_v19 }
  0xf1   : > { %4465 = vmatprep.mubr.msk.bf16.mxu1 %vm587_vm4, %v5659_v62 }
  0xf2   : > { %4598 = vmatmul.mubr.msk.bf16.gmra.mrb[12].mxu0 %vm587_vm4, %v5673_v61 }
  0xf3   : > { %4601 = vmatprep.mubr.msk.bf16.mxu0 %vm587_vm4, %v5677_v41 }
  0xf8   : > { %4466 = vmatmul.mubr.msk.bf16.gmra.mrb[16].mxu1 %vm587_vm4, %v5663_v63 }
  0xf9   : > { %4469 = vmatprep.mubr.msk.bf16.mxu1 %vm587_vm4, %v5675_v40 }
  0xfa   : > { %4602 = vmatmul.mubr.msk.bf16.gmra.mrb[16].mxu0 %vm587_vm4, %v5689_v13 }
  0xfb   : > { %4605 = vmatprep.mubr.msk.bf16.mxu0 %vm587_vm4, %v5693_v14 }
 0x100   : > { %4470 = vmatmul.mubr.msk.bf16.gmra.mrb[20].mxu1 %vm587_vm4, %v5679_v46 }
 0x101   : > { %4473 = vmatprep.mubr.msk.bf16.mxu1 %vm587_vm4, %v5691_v20 }
 0x102   : > { %4606 = vmatmul.mubr.msk.bf16.gmra.mrb[20].mxu0 %vm587_vm4, %v5705_v55 }
 0x103   : > { %4609 = vmatprep.mubr.msk.bf16.mxu0 %vm587_vm4, %v5709_v39 }
 0x108   : > { %4474 = vmatmul.mubr.msk.bf16.gmra.mrb[24].mxu1 %vm587_vm4, %v5695_v47 }
 0x109   : > { %4477 = vmatprep.mubr.msk.bf16.mxu1 %vm587_vm4, %v5707_v57 }
 0x10a   : > { %4610 = vmatmul.mubr.msk.bf16.gmra.mrb[24].mxu0 %vm587_vm4, %v5721_v34 }
 0x10b   : > { %4613 = vmatprep.mubr.msk.bf16.mxu0 %vm587_vm4, %v5792_v27 }
 0x110   : > { %4478 = vmatmul.mubr.msk.bf16.gmra.mrb[28].mxu1 %vm587_vm4, %v5711_v0 }
 0x111   : > { %4483 = vmatprep.mubr.msk.bf16.mxu1 %vm587_vm4, %v5591_v30  ;;  %v2621_v30 = vld [vmem:[#allocation2 + $0x79] sm:$0xff] }
 0x112   : > { %4614 = vmatmul.mubr.msk.bf16.gmra.mrb[28].mxu0 %vm587_vm4, %v2368_v49  ;;  %v2650_v11 = vpack.c.bf16 %v2622_v25, %v2621_v30  ;;  %v4183_v49 = vld [vmem:[%s5072_s18 + $0x159] sm:$0xff] }
 0x113   : > { %4619 = vmatprep.mubr.msk.bf16.mxu0 %vm587_vm4, %v2647_v29  ;;  %v4184_v29 = vld [vmem:[%s5072_s18 + $0x169] sm:$0xff] }
 0x118   : > { %4484 = vmatmul.mubr.msk.bf16.vlgmr.msra.gmra.mrb[0].mxu1 %vm587_vm4, %v5597_v45 }
 0x119   : > { %4686 = vmatpush3.bf16.msra.mxu1 %v3336_v4  ;;  %4487 = vmatprep.mubr.msk.bf16.mxu1 %vm587_vm4, %v5623_v16 }
 0x11a   : > { %4620 = vmatmul.mubr.msk.bf16.vlgmr.msra.gmra.mrb[0].mxu0 %vm587_vm4, %v2648_v17  ;;  %v2940_v17 = vld [vmem:[#allocation2 + $0x1a2] sm:$0xff] }
 0x11b   : > { %4652 = vmatpush3.bf16.msra.mxu0 %v3008_v9  ;;  %4623 = vmatprep.mubr.msk.bf16.mxu0 %vm587_vm4, %v2649_v18 }
 0x120   : > { %4488 = vmatmul.mubr.msk.bf16.gmra.mrb[4].mxu1 %vm587_vm4, %v5629_v42  ;;  %v4162_v42 = vld [vmem:[%s5072_s18 + $0x61] sm:$0xff] }
 0x121   : > { %4491 = vmatprep.mubr.msk.bf16.mxu1 %vm587_vm4, %v5641_v50  ;;  %v4163_v50 = vld [vmem:[%s5072_s18 + $0x69] sm:$0xff] }
 0x122   : > { %4624 = vmatmul.mubr.msk.bf16.gmra.mrb[4].mxu0 %vm587_vm4, %v2650_v11 }
 0x123   : > { %4627 = vmatprep.mubr.msk.bf16.mxu0 %vm587_vm4, %v2651_v51 }
 0x128   : > { %4492 = vmatmul.mubr.msk.bf16.gmra.mrb[8].mxu1 %vm587_vm4, %v5645_v21  ;;  %v4165_v21 = vld [vmem:[%s5072_s18 + $0x81] sm:$0xff] }
 0x129   : > { %4495 = vmatprep.mubr.msk.bf16.mxu1 %vm587_vm4, %v5657_v2  ;;  %v3271_v2 = vpack.c.bf16 %v4163_v50, %v4162_v42 }
 0x12a   : > { %4628 = vmatmul.mubr.msk.bf16.gmra.mrb[8].mxu0 %vm587_vm4, %v5524_v58  ;;  %v2645_v58 = vld [vmem:[#allocation2 + $0x199] sm:$0xff] }
 0x12b   : > { %4631 = vmatprep.mubr.msk.bf16.mxu0 %vm587_vm4, %v5532_v59  ;;  %v2646_v59 = vld [vmem:[#allocation2 + $0x1a1] sm:$0xff] }
 0x130   : > { %4496 = vmatmul.mubr.msk.bf16.gmra.mrb[12].mxu1 %vm587_vm4, %v5661_v3 }
 0x131   : > { %4499 = vmatprep.mubr.msk.bf16.mxu1 %vm587_vm4, %v5673_v61  ;;  %v4167_v61 = vld [vmem:[%s5072_s18 + $0x99] sm:$0xff] }
 0x132   : > { %4632 = vmatmul.mubr.msk.bf16.gmra.mrb[12].mxu0 %vm587_vm4, %v5534_v15  ;;  %v4156_v15 = vld [vmem:[%s5072_s18 + $0x19] sm:$0xff] }
 0x133   : > { %4635 = vmatprep.mubr.msk.bf16.mxu0 %vm587_vm4, %v5544_v22  ;;  %v4157_v22 = vld [vmem:[%s5072_s18 + $0x21] sm:$0xff] }
 0x138   : > { %4500 = vmatmul.mubr.msk.bf16.gmra.mrb[16].mxu1 %vm587_vm4, %v5677_v41  ;;  %v4169_v41 = vld [vmem:[%s5072_s18 + $0xb1] sm:$0xff] }
 0x139   : > { %4503 = vmatprep.mubr.msk.bf16.mxu1 %vm587_vm4, %v5689_v13 }
 0x13a   : > { %4636 = vmatmul.mubr.msk.bf16.gmra.mrb[16].mxu0 %vm587_vm4, %v5546_v24  ;;  %v2662_v24 = vpack.c.bf16 %v2646_v59, %v2645_v58 }
 0x13b   : > { %4639 = vmatprep.mubr.msk.bf16.mxu0 %vm587_vm4, %v5556_v33  ;;  %v3268_v33 = vpack.c.bf16 %v4157_v22, %v4156_v15 }
 0x140   : > { %4504 = vmatmul.mubr.msk.bf16.gmra.mrb[20].mxu1 %vm587_vm4, %v5693_v14 }
 0x141   : > { %4507 = vmatprep.mubr.msk.bf16.mxu1 %vm587_vm4, %v5705_v55  ;;  %v4171_v55 = vld [vmem:[%s5072_s18 + $0xc9] sm:$0xff] }
 0x142   : > { %4640 = vmatmul.mubr.msk.bf16.gmra.mrb[20].mxu0 %vm587_vm4, %v5558_v36  ;;  %v4158_v36 = vld [vmem:[%s5072_s18 + $0x31] sm:$0xff] }
 0x143   : > { %4643 = vmatprep.mubr.msk.bf16.mxu0 %vm587_vm4, %v5568_v38  ;;  %v4159_v38 = vld [vmem:[%s5072_s18 + $0x39] sm:$0xff] }
 0x144   : > { %v3269_v45 = vpack.c.bf16 %v4159_v38, %v4158_v36 }
 0x148   : > { %4508 = vmatmul.mubr.msk.bf16.gmra.mrb[24].mxu1 %vm587_vm4, %v5709_v39  ;;  %v4173_v39 = vld [vmem:[%s5072_s18 + $0xe1] sm:$0xff] }
 0x149   : > { %4511 = vmatprep.mubr.msk.bf16.mxu1 %vm587_vm4, %v5721_v34 }
 0x14a   : > { %4644 = vmatmul.mubr.msk.bf16.gmra.mrb[24].mxu0 %vm587_vm4, %v5570_v56  ;;  %v4160_v56 = vld [vmem:[%s5072_s18 + $0x49] sm:$0xff] }
 0x14b   : > { %4647 = vmatprep.mubr.msk.bf16.mxu0 %vm587_vm4, %v5580_v44  ;;  %v4161_v44 = vld [vmem:[%s5072_s18 + $0x51] sm:$0xff] }
 0x14c   : > { %v3270_v16 = vpack.c.bf16 %v4161_v44, %v4160_v56 }
 0x150   : > { %4512 = vmatmul.mubr.msk.bf16.gmra.mrb[28].mxu1 %vm587_vm4, %v5792_v27 }
 0x151   : > { %4687 = vmatprep.mubr.msk.bf16.mxu1 %vm3285_vm6, %v3268_v33 }
 0x152   : > { %4648 = vmatmul.mubr.msk.bf16.gmra.mrb[28].mxu0 %vm587_vm4, %v2662_v24 }
 0x153   : > { %4653 = vmatprep.mubr.msk.bf16.mxu0 %vm587_vm4, %v5593_v5  ;;  %v4164_v5 = vld [vmem:[%s5072_s18 + $0x79] sm:$0xff] }
 0x154   : > { %v3272_v3 = vpack.c.bf16 %v4165_v21, %v4164_v5 }
 0x158   : > { %4688 = vmatmul.mubr.msk.bf16.vlgmr.msra.gmra.mrb[32].mxu1 %vm3285_vm6, %v3269_v45 }
 0x159   : > { %4691 = vmatprep.mubr.msk.bf16.mxu1 %vm3285_vm6, %v3270_v16 }
 0x15a   : > { %4654 = vmatmul.mubr.msk.bf16.vlgmr.msra.gmra.mrb[0].mxu0 %vm587_vm4, %v5601_v6  ;;  %v4166_v6 = vld [vmem:[%s5072_s18 + $0x91] sm:$0xff] }
 0x15b   : > { %4657 = vmatprep.mubr.msk.bf16.mxu0 %vm587_vm4, %v5627_v12  ;;  %v4168_v12 = vld [vmem:[%s5072_s18 + $0xa9] sm:$0xff]  ;;  %v3273_v13 = vpack.c.bf16 %v4167_v61, %v4166_v6 }
 0x15c   : > { %v3274_v14 = vpack.c.bf16 %v4169_v41, %v4168_v12 }
 0x160   : > { %4692 = vmatmul.mubr.msk.bf16.gmra.mrb[36].mxu1 %vm3285_vm6, %v3271_v2 }
 0x161   : > { %4695 = vmatprep.mubr.msk.bf16.mxu1 %vm3285_vm6, %v3272_v3 }
 0x162   : > { %4658 = vmatmul.mubr.msk.bf16.gmra.mrb[4].mxu0 %vm587_vm4, %v5631_v53  ;;  %v4170_v53 = vld [vmem:[%s5072_s18 + $0xc1] sm:$0xff] }
 0x163   : > { %4661 = vmatprep.mubr.msk.bf16.mxu0 %vm587_vm4, %v5643_v26  ;;  %v4172_v26 = vld [vmem:[%s5072_s18 + $0xd9] sm:$0xff]  ;;  %v3275_v34 = vpack.c.bf16 %v4171_v55, %v4170_v53 }
 0x164   : > { %v3276_v52 = vpack.c.bf16 %v4173_v39, %v4172_v26 }
 0x168   : > { %4696 = vmatmul.mubr.msk.bf16.gmra.mrb[40].mxu1 %vm3285_vm6, %v3273_v13 }
 0x169   : > { %4699 = vmatprep.mubr.msk.bf16.mxu1 %vm3285_vm6, %v3274_v14 }
 0x16a   : > { %4662 = vmatmul.mubr.msk.bf16.gmra.mrb[8].mxu0 %vm587_vm4, %v5647_v19  ;;  %v4174_v19 = vld [vmem:[%s5072_s18 + $0xf1] sm:$0xff] }
 0x16b   : > { %4665 = vmatprep.mubr.msk.bf16.mxu0 %vm587_vm4, %v5659_v62  ;;  %v4176_v62 = vld [vmem:[%s5072_s18 + $0x109] sm:$0xff]  ;;  %v3277_v10 = vpack.c.bf16 %v4175_v7, %v4174_v19 }
 0x16c   : > { %v3278_v27 = vpack.c.bf16 %v4177_v1, %v4176_v62 }
 0x170   : > { %4700 = vmatmul.mubr.msk.bf16.gmra.mrb[44].mxu1 %vm3285_vm6, %v3275_v34 }
 0x171   : > { %4703 = vmatprep.mubr.msk.bf16.mxu1 %vm3285_vm6, %v3276_v52 }
 0x172   : > { %4666 = vmatmul.mubr.msk.bf16.gmra.mrb[12].mxu0 %vm587_vm4, %v5663_v63  ;;  %v4178_v63 = vld [vmem:[%s5072_s18 + $0x121] sm:$0xff] }
 0x173   : > { %4669 = vmatprep.mubr.msk.bf16.mxu0 %vm587_vm4, %v5675_v40  ;;  %v4180_v40 = vld [vmem:[%s5072_s18 + $0x139] sm:$0xff]  ;;  %v3279_v48 = vpack.c.bf16 %v4179_v8, %v4178_v63 }
 0x174   : > { %v3280_v60 = vpack.c.bf16 %v4181_v43, %v4180_v40 }
 0x178   : > { %4704 = vmatmul.mubr.msk.bf16.gmra.mrb[48].mxu1 %vm3285_vm6, %v3277_v10 }
 0x179   : > { %4707 = vmatprep.mubr.msk.bf16.mxu1 %vm3285_vm6, %v3278_v27 }
 0x17a   : > { %4670 = vmatmul.mubr.msk.bf16.gmra.mrb[16].mxu0 %vm587_vm4, %v5679_v46  ;;  %v4182_v46 = vld [vmem:[%s5072_s18 + $0x151] sm:$0xff] }
 0x17b   : > { %4673 = vmatprep.mubr.msk.bf16.mxu0 %vm587_vm4, %v5691_v20  ;;  %v4185_v20 = vld [vmem:[%s5072_s18 + $0x171] sm:$0xff]  ;;  %v3281_v32 = vpack.c.bf16 %v4183_v49, %v4182_v46 }
 0x17c   : > { %v3282_v54 = vpack.c.bf16 %v4185_v20, %v4184_v29 }
 0x180   : > { %4708 = vmatmul.mubr.msk.bf16.gmra.mrb[52].mxu1 %vm3285_vm6, %v3279_v48 }
 0x181   : > { %4711 = vmatprep.mubr.msk.bf16.mxu1 %vm3285_vm6, %v3280_v60 }
 0x182   : > { %4674 = vmatmul.mubr.msk.bf16.gmra.mrb[20].mxu0 %vm587_vm4, %v5695_v47  ;;  %v4187_v47 = vld [vmem:[%s5072_s18 + $0x189] sm:$0xff] }
 0x183   : > { %4677 = vmatprep.mubr.msk.bf16.mxu0 %vm587_vm4, %v5707_v57  ;;  %v3283_v4 = vpack.c.bf16 %v4187_v47, %v4186_v37  ;;  %v2956_v57 = vpack.c.bf16 %v2940_v17, %v2939_v35 }
 0x188   : > { %4712 = vmatmul.mubr.msk.bf16.gmra.mrb[56].mxu1 %vm3285_vm6, %v3281_v32 }
 0x189   : > { %4715 = vmatprep.mubr.msk.bf16.mxu1 %vm3285_vm6, %v3282_v54 }
 0x18a   : > { %4678 = vmatmul.mubr.msk.bf16.gmra.mrb[24].mxu0 %vm587_vm4, %v5711_v0 }
 0x18b   : > { %4681 = vmatprep.mubr.msk.bf16.mxu0 %vm587_vm4, %v5723_v31 }
 0x190   : > { %4716 = vmatmul.mubr.msk.bf16.gmra.mrb[60].mxu1 %vm3285_vm6, %v3283_v4 }
 0x192   : > { %4682 = vmatmul.mubr.msk.bf16.gmra.mrb[28].mxu0 %vm587_vm4, %v2956_v57 }
 0x1eb   : > { %v4485_v9 = vpop.f32.mrb[0].mxu1 }
 0x1ec   : > { %v1573_v18 = vpop.f32.mrb[1].mxu1 }
 0x1ed   : > { %v4486_v30 = vpop.f32.mrb[2].mxu1 }
 0x1ee   : > { %v1576_v25 = vpop.f32.mrb[3].mxu1 }
 0x1f3   : > { %v5944_v0 = vpop.f32.mrb[4].mxu1 }
 0x1f4   : > { %v5946_v28 = vpop.f32.mrb[5].mxu1 }
 0x1f5   : > { %v5948_v23 = vpop.f32.mrb[6].mxu1 }
 0x1f6   : > { %v5950_v11 = vpop.f32.mrb[7].mxu1 }
 0x1fb   : > { %v5952_v31 = vpop.f32.mrb[8].mxu1 }
 0x1fc   : > { %v5954_v51 = vpop.f32.mrb[9].mxu1 }
 0x1fd   : > { %v5956_v58 = vpop.f32.mrb[10].mxu1 }
 0x1fe   : > { %v5958_v59 = vpop.f32.mrb[11].mxu1 }
 0x203   : > { %v5960_v15 = vpop.f32.mrb[12].mxu1 }
 0x204   : > { %v5962_v22 = vpop.f32.mrb[13].mxu1 }
 0x205   : > { %v5964_v24 = vpop.f32.mrb[14].mxu1 }
 0x206   : > { %v5966_v33 = vpop.f32.mrb[15].mxu1 }
 0x20b   : > { %v5968_v36 = vpop.f32.mrb[16].mxu1 }
 0x20c   : > { %v5970_v38 = vpop.f32.mrb[17].mxu1 }
 0x20d   : > { %v5972_v56 = vpop.f32.mrb[18].mxu1 }
 0x20e   : > { %v5974_v44 = vpop.f32.mrb[19].mxu1 }
 0x213   : > { %v5976_v45 = vpop.f32.mrb[20].mxu1 }
 0x214   : > { %v5978_v16 = vpop.f32.mrb[21].mxu1 }
 0x215   : > { %v5980_v42 = vpop.f32.mrb[22].mxu1 }
 0x216   : > { %v5982_v50 = vpop.f32.mrb[23].mxu1 }
 0x21b   : > { %v5984_v5 = vpop.f32.mrb[24].mxu1 }
 0x21c   : > { %v5986_v21 = vpop.f32.mrb[25].mxu1 }
 0x21d   : > { %v5988_v2 = vpop.f32.mrb[26].mxu1 }
 0x21e   : > { %v5990_v3 = vpop.f32.mrb[27].mxu1 }
 0x223   : > { %v5992_v6 = vpop.f32.mrb[28].mxu1 }
 0x224   : > { %v5994_v61 = vpop.f32.mrb[29].mxu1 }
 0x225   : > { %v5996_v12 = vpop.f32.mrb[30].mxu1 }
 0x226   : > { %v5998_v41 = vpop.f32.mrb[31].mxu1 }
 0x22b   : > { %v4689_v13 = vpop.f32.mrb[32].mxu1 }
 0x22c   : > { %3501 = vst.msk [vmem:[%s5077_s21 + $0x10] sm:$0xff] %vm587_vm4, %v4689_v13  ;;  %v3372_v53 = vpop.f32.mrb[33].mxu1  ;;  %v3783_v55 = vmul.f32 %v4689_v13, %v4689_v13  ;;  %v3712_v8 = vsel %vm587_vm4, %v4689_v13, 0.0 }
 0x22d   : > { %v4655_v14 = vpop.f32.mrb[0].mxu0  ;;  %3499 = vst.msk [vmem:[%s5077_s21] sm:$0xff] %vm587_vm4, %v3372_v53  ;;  %v4690_v34 = vpop.f32.mrb[34].mxu1  ;;  %v3709_v52 = vsel %vm587_vm4, %v3372_v53, 0.0  ;;  %v3781_v19 = vmul.f32 %v3372_v53, %v3372_v53 }
 0x22e   : > { %v4719_v26 = vadd.f32 %v4655_v14, %v4485_v9  ;;  %v3044_v39 = vpop.f32.mrb[1].mxu0  ;;  %3502 = vst.msk [vmem:[%s5077_s21 + $0x18] sm:$0xff] %vm587_vm4, %v4690_v34  ;;  %v3375_v1 = vpop.f32.mrb[35].mxu1  ;;  %v3784_v10 = vmul.f32 %v4690_v34, %v4690_v34  ;;  %v3816_v43 = vsel %vm587_vm4, %v3783_v55, 0.0  ;;  %v3714_v60 = vsel %vm587_vm4, %v4690_v34, 0.0 }
 0x22f   : > { %v4720_v7 = vadd.f32 %v3044_v39, %v1573_v18  ;;  %v4656_v62 = vpop.f32.mrb[2].mxu0  ;;  %3500 = vst.msk [vmem:[%s5077_s21 + $0x8] sm:$0xff] %vm587_vm4, %v3375_v1  ;;  %v3710_v40 = vsel %vm587_vm4, %v3375_v1, 0.0  ;;  %v3813_v29 = vsel %vm587_vm4, %v3781_v19, 0.0  ;;  %v3782_v20 = vmul.f32 %v3375_v1, %v3375_v1 }
 0x230   : > { %3205 = vst.msk [vmem:[%s5067_s15 + $0x10] sm:$0xff] %vm587_vm4, %v4719_v26  ;;  %v4721_v27 = vadd.f32 %v4656_v62, %v4486_v30  ;;  %v3047_v63 = vpop.f32.mrb[3].mxu0  ;;  %v3711_v46 = vadd.f32 %v3710_v40, %v3709_v52  ;;  %v3535_v49 = vsel %vm587_vm4, %v4719_v26, 0.0  ;;  %v3607_v54 = vmul.f32 %v4719_v26, %v4719_v26 }
 0x231   : > { %3203 = vst.msk [vmem:[%s5067_s15] sm:$0xff] %vm587_vm4, %v4720_v7  ;;  %v3605_v48 = vmul.f32 %v4720_v7, %v4720_v7  ;;  %v4722_v32 = vadd.f32 %v3047_v63, %v1576_v25  ;;  %v3532_v37 = vsel %vm587_vm4, %v4720_v7, 0.0  ;;  %v3818_v47 = vsel %vm587_vm4, %v3784_v10, 0.0 }
 0x232   : > { %3206 = vst.msk [vmem:[%s5067_s15 + $0x18] sm:$0xff] %vm587_vm4, %v4721_v27  ;;  %v3713_v35 = vadd.f32 %v3712_v8, %v3711_v46  ;;  %v3608_v4 = vmul.f32 %v4721_v27, %v4721_v27  ;;  %v3814_v57 = vsel %vm587_vm4, %v3782_v20, 0.0  ;;  %v3640_v10 = vsel %vm587_vm4, %v3607_v54, 0.0 }
 0x233   : > { %v4693_v17 = vpop.f32.mrb[36].mxu1  ;;  %3204 = vst.msk [vmem:[%s5067_s15 + $0x8] sm:$0xff] %vm587_vm4, %v4722_v32  ;;  %v3533_v9 = vsel %vm587_vm4, %v4722_v32, 0.0  ;;  %v3606_v18 = vmul.f32 %v4722_v32, %v4722_v32  ;;  %v3637_v13 = vsel %vm587_vm4, %v3605_v48, 0.0  ;;  %v3815_v14 = vadd.f32 %v3814_v57, %v3813_v29 }
 0x234   : > { %3505 = vst.msk [vmem:[%s5077_s21 + $0x30] sm:$0xff] %vm587_vm4, %v4693_v17  ;;  %v3388_v25 = vpop.f32.mrb[37].mxu1  ;;  %v3534_v53 = vadd.f32 %v3533_v9, %v3532_v37  ;;  %v3715_v52 = vadd.f32 %v3714_v60, %v3713_v35  ;;  %v3537_v48 = vsel %vm587_vm4, %v4721_v27, 0.0  ;;  %v3787_v60 = vmul.f32 %v4693_v17, %v4693_v17 }
 0x235   : > { %v4659_v30 = vpop.f32.mrb[4].mxu0  ;;  %3503 = vst.msk [vmem:[%s5077_s21 + $0x20] sm:$0xff] %vm587_vm4, %v3388_v25  ;;  %v4694_v39 = vpop.f32.mrb[38].mxu1  ;;  %v3638_v34 = vsel %vm587_vm4, %v3606_v18, 0.0  ;;  %v3716_v19 = vsel %vm587_vm4, %v3388_v25, 0.0  ;;  %v3785_v7 = vmul.f32 %v3388_v25, %v3388_v25  ;;  %v3817_v63 = vadd.f32 %v3816_v43, %v3815_v14 }
 0x236   : > { %v4723_v55 = vadd.f32 %v4659_v30, %v5944_v0  ;;  %v3060_v26 = vpop.f32.mrb[5].mxu0  ;;  %3506 = vst.msk [vmem:[%s5077_s21 + $0x38] sm:$0xff] %vm587_vm4, %v4694_v39  ;;  %v3391_v1 = vpop.f32.mrb[39].mxu1  ;;  %v3536_v8 = vadd.f32 %v3535_v49, %v3534_v53  ;;  %v3639_v0 = vadd.f32 %v3638_v34, %v3637_v13  ;;  %v3717_v46 = vadd.f32 %v3716_v19, %v3715_v52 }
 0x237   : > { %v4660_v62 = vpop.f32.mrb[6].mxu0  ;;  %3504 = vst.msk [vmem:[%s5077_s21 + $0x28] sm:$0xff] %vm587_vm4, %v3391_v1  ;;  %v3820_v29 = vsel %vm587_vm4, %v3785_v7, 0.0  ;;  %v3819_v32 = vadd.f32 %v3818_v47, %v3817_v63  ;;  %v4724_v37 = vadd.f32 %v3060_v26, %v5946_v28  ;;  %v3642_v49 = vsel %vm587_vm4, %v3608_v4, 0.0 }
 0x238   : > { %3209 = vst.msk [vmem:[%s5067_s15 + $0x30] sm:$0xff] %vm587_vm4, %v4723_v55  ;;  %v3063_v40 = vpop.f32.mrb[7].mxu0  ;;  %v3641_v20 = vadd.f32 %v3640_v10, %v3639_v0  ;;  %v3538_v43 = vadd.f32 %v3537_v48, %v3536_v8  ;;  %v3720_v54 = vsel %vm587_vm4, %v4693_v17, 0.0  ;;  %v3611_v35 = vmul.f32 %v4723_v55, %v4723_v55 }
 0x239   : > { %v4725_v57 = vadd.f32 %v4660_v62, %v5948_v23  ;;  %v3821_v9 = vadd.f32 %v3820_v29, %v3819_v32  ;;  %3207 = vst.msk [vmem:[%s5067_s15 + $0x20] sm:$0xff] %vm587_vm4, %v4724_v37  ;;  %v3539_v27 = vsel %vm587_vm4, %v4724_v37, 0.0  ;;  %v3609_v18 = vmul.f32 %v4724_v37, %v4724_v37 }
 0x23a   : > { %v3643_v47 = vadd.f32 %v3642_v49, %v3641_v20  ;;  %v3824_v28 = vsel %vm587_vm4, %v3787_v60, 0.0  ;;  %v3543_v25 = vsel %vm587_vm4, %v4723_v55, 0.0  ;;  %v3540_v13 = vadd.f32 %v3539_v27, %v3538_v43 }
 0x23b   : > { %v4697_v30 = vpop.f32.mrb[40].mxu1  ;;  %v3788_v4 = vmul.f32 %v4694_v39, %v4694_v39  ;;  %3210 = vst.msk [vmem:[%s5067_s15 + $0x38] sm:$0xff] %vm587_vm4, %v4725_v57  ;;  %v3644_v14 = vsel %vm587_vm4, %v3609_v18, 0.0  ;;  %v3718_v53 = vsel %vm587_vm4, %v3391_v1, 0.0  ;;  %v3786_v26 = vmul.f32 %v3391_v1, %v3391_v1 }
 0x23c   : > { %3509 = vst.msk [vmem:[%s5077_s21 + $0x50] sm:$0xff] %vm587_vm4, %v4697_v30  ;;  %v3404_v17 = vpop.f32.mrb[41].mxu1  ;;  %v4726_v34 = vadd.f32 %v3063_v40, %v5950_v11  ;;  %v3648_v19 = vsel %vm587_vm4, %v3611_v35, 0.0  ;;  %v3645_v7 = vadd.f32 %v3644_v14, %v3643_v47  ;;  %v3722_v62 = vsel %vm587_vm4, %v4694_v39, 0.0 }
 0x23d   : > { %v4663_v23 = vpop.f32.mrb[8].mxu0  ;;  %3507 = vst.msk [vmem:[%s5077_s21 + $0x40] sm:$0xff] %vm587_vm4, %v3404_v17  ;;  %v6062_v52 = vpop.f32.mrb[42].mxu1  ;;  %v3719_v10 = vadd.f32 %v3718_v53, %v3717_v46  ;;  %v3612_v1 = vmul.f32 %v4725_v57, %v4725_v57  ;;  %v3822_v11 = vsel %vm587_vm4, %v3786_v26, 0.0  ;;  %v3826_v20 = vsel %vm587_vm4, %v3788_v4, 0.0 }
 0x23e   : > { %v3076_v55 = vpop.f32.mrb[9].mxu0  ;;  %3510 = vst.msk [vmem:[%s5077_s21 + $0x58] sm:$0xff] %vm587_vm4, %v6062_v52  ;;  %v3407_v8 = vpop.f32.mrb[43].mxu1  ;;  %3208 = vst.msk [vmem:[%s5067_s15 + $0x28] sm:$0xff] %vm587_vm4, %v4726_v34  ;;  %v3541_v0 = vsel %vm587_vm4, %v4726_v34, 0.0  ;;  %v3610_v40 = vmul.f32 %v4726_v34, %v4726_v34  ;;  %v3823_v39 = vadd.f32 %v3822_v11, %v3821_v9  ;;  %v4727_v29 = vadd.f32 %v4663_v23, %v5952_v31 }
 0x23f   : > { %v4664_v63 = vpop.f32.mrb[10].mxu0  ;;  %3508 = vst.msk [vmem:[%s5077_s21 + $0x48] sm:$0xff] %vm587_vm4, %v3407_v8  ;;  %v3721_v60 = vadd.f32 %v3720_v54, %v3719_v10  ;;  %v3542_v46 = vadd.f32 %v3541_v0, %v3540_v13  ;;  %v3545_v32 = vsel %vm587_vm4, %v4725_v57, 0.0  ;;  %v3789_v43 = vmul.f32 %v3404_v17, %v3404_v17 }
 0x240   : > { %v3079_v48 = vpop.f32.mrb[11].mxu0  ;;  %v3646_v37 = vsel %vm587_vm4, %v3610_v40, 0.0  ;;  %v3825_v49 = vadd.f32 %v3824_v28, %v3823_v39  ;;  %3213 = vst.msk [vmem:[%s5067_s15 + $0x50] sm:$0xff] %vm587_vm4, %v4727_v29  ;;  %v3724_v54 = vsel %vm587_vm4, %v3404_v17, 0.0  ;;  %v3650_v9 = vsel %vm587_vm4, %v3612_v1, 0.0 }
 0x241   : > { %v3544_v35 = vadd.f32 %v3543_v25, %v3542_v46  ;;  %v3647_v27 = vadd.f32 %v3646_v37, %v3645_v7  ;;  %v3723_v18 = vadd.f32 %v3722_v62, %v3721_v60  ;;  %v3828_v31 = vsel %vm587_vm4, %v3789_v43, 0.0 }
 0x242   : > { %v4728_v57 = vadd.f32 %v3076_v55, %v5954_v51  ;;  %v3791_v4 = vmul.f32 %v4697_v30, %v4697_v30  ;;  %v3827_v28 = vadd.f32 %v3826_v20, %v3825_v49  ;;  %v3728_v14 = vsel %vm587_vm4, %v4697_v30, 0.0 }
 0x243   : > { %v6085_v47 = vpop.f32.mrb[44].mxu1  ;;  %v3649_v13 = vadd.f32 %v3648_v19, %v3647_v27  ;;  %v3546_v25 = vadd.f32 %v3545_v32, %v3544_v35  ;;  %v3725_v53 = vadd.f32 %v3724_v54, %v3723_v18  ;;  %v3615_v19 = vmul.f32 %v4727_v29, %v4727_v29 }
 0x244   : > { %3513 = vst.msk [vmem:[%s5077_s21 + $0x70] sm:$0xff] %vm587_vm4, %v6085_v47  ;;  %v3420_v17 = vpop.f32.mrb[45].mxu1  ;;  %3211 = vst.msk [vmem:[%s5067_s15 + $0x40] sm:$0xff] %vm587_vm4, %v4728_v57  ;;  %v3547_v26 = vsel %vm587_vm4, %v4728_v57, 0.0  ;;  %v3613_v51 = vmul.f32 %v4728_v57, %v4728_v57  ;;  %v3829_v7 = vadd.f32 %v3828_v31, %v3827_v28  ;;  %v4729_v0 = vadd.f32 %v4664_v63, %v5956_v58 }
 0x245   : > { %v4667_v23 = vpop.f32.mrb[12].mxu0  ;;  %3511 = vst.msk [vmem:[%s5077_s21 + $0x60] sm:$0xff] %vm587_vm4, %v3420_v17  ;;  %v6096_v55 = vpop.f32.mrb[46].mxu1  ;;  %v3548_v62 = vadd.f32 %v3547_v26, %v3546_v25  ;;  %v3651_v10 = vadd.f32 %v3650_v9, %v3649_v13  ;;  %v3726_v40 = vsel %vm587_vm4, %v3407_v8, 0.0  ;;  %v3790_v60 = vmul.f32 %v3407_v8, %v3407_v8 }
 0x246   : > { %v3092_v34 = vpop.f32.mrb[13].mxu0  ;;  %3514 = vst.msk [vmem:[%s5077_s21 + $0x78] sm:$0xff] %vm587_vm4, %v6096_v55  ;;  %v6101_v1 = vpop.f32.mrb[47].mxu1  ;;  %v3652_v11 = vsel %vm587_vm4, %v3613_v51, 0.0  ;;  %v3832_v46 = vsel %vm587_vm4, %v3791_v4, 0.0  ;;  %v3727_v32 = vadd.f32 %v3726_v40, %v3725_v53  ;;  %v4730_v37 = vadd.f32 %v3079_v48, %v5958_v59  ;;  %3214 = vst.msk [vmem:[%s5067_s15 + $0x58] sm:$0xff] %vm587_vm4, %v4729_v0 }
 0x247   : > { %v4668_v30 = vpop.f32.mrb[14].mxu0  ;;  %3512 = vst.msk [vmem:[%s5077_s21 + $0x68] sm:$0xff] %vm587_vm4, %v6101_v1  ;;  %v3653_v20 = vadd.f32 %v3652_v11, %v3651_v10  ;;  %v3551_v43 = vsel %vm587_vm4, %v4727_v29, 0.0  ;;  %v3730_v58 = vsel %vm587_vm4, %v6062_v52, 0.0  ;;  %v3792_v63 = vmul.f32 %v6062_v52, %v6062_v52 }
 0x248   : > { %v6109_v39 = vpop.f32.mrb[15].mxu0  ;;  %v3830_v8 = vsel %vm587_vm4, %v3790_v60, 0.0  ;;  %v3729_v49 = vadd.f32 %v3728_v14, %v3727_v32  ;;  %3212 = vst.msk [vmem:[%s5067_s15 + $0x48] sm:$0xff] %vm587_vm4, %v4730_v37  ;;  %v3549_v27 = vsel %vm587_vm4, %v4730_v37, 0.0  ;;  %v3614_v59 = vmul.f32 %v4730_v37, %v4730_v37 }
 0x249   : > { %v3831_v35 = vadd.f32 %v3830_v8, %v3829_v7  ;;  %v3656_v48 = vsel %vm587_vm4, %v3615_v19, 0.0  ;;  %v3616_v29 = vmul.f32 %v4729_v0, %v4729_v0  ;;  %v3550_v54 = vadd.f32 %v3549_v27, %v3548_v62 }
 0x24a   : > { %v4731_v52 = vadd.f32 %v4667_v23, %v5960_v15  ;;  %v3654_v31 = vsel %vm587_vm4, %v3614_v59, 0.0  ;;  %v3731_v57 = vadd.f32 %v3730_v58, %v3729_v49  ;;  %v3732_v13 = vsel %vm587_vm4, %v3420_v17, 0.0 }
 0x24b   : > { %v6126_v9 = vpop.f32.mrb[48].mxu1  ;;  %v3833_v18 = vadd.f32 %v3832_v46, %v3831_v35  ;;  %v3834_v25 = vsel %vm587_vm4, %v3792_v63, 0.0  ;;  %v3553_v14 = vsel %vm587_vm4, %v4729_v0, 0.0  ;;  %v3552_v15 = vadd.f32 %v3551_v43, %v3550_v54 }
 0x24c   : > { %3517 = vst.msk [vmem:[%s5077_s21 + $0x90] sm:$0xff] %vm587_vm4, %v6126_v9  ;;  %v6133_v28 = vpop.f32.mrb[49].mxu1  ;;  %v3655_v23 = vadd.f32 %v3654_v31, %v3653_v20  ;;  %3217 = vst.msk [vmem:[%s5067_s15 + $0x70] sm:$0xff] %vm587_vm4, %v4731_v52  ;;  %v3795_v51 = vmul.f32 %v6085_v47, %v6085_v47  ;;  %v3733_v19 = vadd.f32 %v3732_v13, %v3731_v57  ;;  %v3736_v40 = vsel %vm587_vm4, %v6085_v47, 0.0 }
 0x24d   : > { %v4671_v4 = vpop.f32.mrb[16].mxu0  ;;  %3515 = vst.msk [vmem:[%s5077_s21 + $0x80] sm:$0xff] %vm587_vm4, %v6133_v28  ;;  %v6144_v26 = vpop.f32.mrb[50].mxu1  ;;  %v3793_v7 = vmul.f32 %v3420_v17, %v3420_v17  ;;  %v3835_v62 = vadd.f32 %v3834_v25, %v3833_v18  ;;  %v4732_v60 = vadd.f32 %v3092_v34, %v5962_v22  ;;  %v3554_v46 = vadd.f32 %v3553_v14, %v3552_v15 }
 0x24e   : > { %v6142_v53 = vpop.f32.mrb[17].mxu0  ;;  %3518 = vst.msk [vmem:[%s5077_s21 + $0x98] sm:$0xff] %vm587_vm4, %v6144_v26  ;;  %v6153_v11 = vpop.f32.mrb[51].mxu1  ;;  %v3657_v0 = vadd.f32 %v3656_v48, %v3655_v23  ;;  %v3658_v20 = vsel %vm587_vm4, %v3616_v29, 0.0  ;;  %v3619_v32 = vmul.f32 %v4731_v52, %v4731_v52  ;;  %v4733_v43 = vadd.f32 %v4668_v30, %v5964_v24 }
 0x24f   : > { %v6151_v10 = vpop.f32.mrb[18].mxu0  ;;  %3516 = vst.msk [vmem:[%s5077_s21 + $0x88] sm:$0xff] %vm587_vm4, %v6153_v11  ;;  %v3836_v37 = vsel %vm587_vm4, %v3793_v7, 0.0  ;;  %3215 = vst.msk [vmem:[%s5067_s15 + $0x60] sm:$0xff] %vm587_vm4, %v4732_v60  ;;  %v3555_v47 = vsel %vm587_vm4, %v4732_v60, 0.0  ;;  %v3617_v22 = vmul.f32 %v4732_v60, %v4732_v60  ;;  %v3840_v63 = vsel %vm587_vm4, %v3795_v51, 0.0 }
 0x250   : > { %v6161_v17 = vpop.f32.mrb[19].mxu0  ;;  %v3837_v58 = vadd.f32 %v3836_v37, %v3835_v62  ;;  %v3659_v34 = vadd.f32 %v3658_v20, %v3657_v0  ;;  %v3559_v8 = vsel %vm587_vm4, %v4731_v52, 0.0  ;;  %v3556_v49 = vadd.f32 %v3555_v47, %v3554_v46  ;;  %3218 = vst.msk [vmem:[%s5067_s15 + $0x78] sm:$0xff] %vm587_vm4, %v4733_v43 }
 0x251   : > { %v3796_v35 = vmul.f32 %v6096_v55, %v6096_v55  ;;  %v3660_v24 = vsel %vm587_vm4, %v3617_v22, 0.0  ;;  %v3734_v30 = vsel %vm587_vm4, %v6101_v1, 0.0  ;;  %v3794_v27 = vmul.f32 %v6101_v1, %v6101_v1 }
 0x252   : > { %v4734_v59 = vadd.f32 %v6109_v39, %v5966_v33  ;;  %v3664_v29 = vsel %vm587_vm4, %v3619_v32, 0.0  ;;  %v3661_v54 = vadd.f32 %v3660_v24, %v3659_v34  ;;  %v3738_v52 = vsel %vm587_vm4, %v6096_v55, 0.0 }
 0x253   : > { %v6182_v48 = vpop.f32.mrb[52].mxu1  ;;  %v3735_v18 = vadd.f32 %v3734_v30, %v3733_v19  ;;  %v3620_v1 = vmul.f32 %v4733_v43, %v4733_v43  ;;  %v3838_v33 = vsel %vm587_vm4, %v3794_v27, 0.0  ;;  %v4735_v51 = vadd.f32 %v4671_v4, %v5968_v36 }
 0x254   : > { %3521 = vst.msk [vmem:[%s5077_s21 + $0xb0] sm:$0xff] %vm587_vm4, %v6182_v48  ;;  %v6192_v57 = vpop.f32.mrb[53].mxu1  ;;  %3216 = vst.msk [vmem:[%s5067_s15 + $0x68] sm:$0xff] %vm587_vm4, %v4734_v59  ;;  %v3557_v39 = vsel %vm587_vm4, %v4734_v59, 0.0  ;;  %v3618_v13 = vmul.f32 %v4734_v59, %v4734_v59  ;;  %v3839_v15 = vadd.f32 %v3838_v33, %v3837_v58  ;;  %v3842_v62 = vsel %vm587_vm4, %v3796_v35, 0.0 }
 0x255   : > { %v6190_v31 = vpop.f32.mrb[20].mxu0  ;;  %3519 = vst.msk [vmem:[%s5077_s21 + $0xa0] sm:$0xff] %vm587_vm4, %v6192_v57  ;;  %v6203_v25 = vpop.f32.mrb[54].mxu1  ;;  %v3737_v14 = vadd.f32 %v3736_v40, %v3735_v18  ;;  %v3558_v23 = vadd.f32 %v3557_v39, %v3556_v49  ;;  %v3561_v0 = vsel %vm587_vm4, %v4733_v43, 0.0  ;;  %v3797_v40 = vmul.f32 %v6133_v28, %v6133_v28  ;;  %3221 = vst.msk [vmem:[%s5067_s15 + $0x90] sm:$0xff] %vm587_vm4, %v4735_v51 }
 0x256   : > { %v6201_v55 = vpop.f32.mrb[21].mxu0  ;;  %3522 = vst.msk [vmem:[%s5077_s21 + $0xb8] sm:$0xff] %vm587_vm4, %v6203_v25  ;;  %v6211_v7 = vpop.f32.mrb[55].mxu1  ;;  %v3662_v60 = vsel %vm587_vm4, %v3618_v13, 0.0  ;;  %v3841_v4 = vadd.f32 %v3840_v63, %v3839_v15  ;;  %v3740_v32 = vsel %vm587_vm4, %v6133_v28, 0.0  ;;  %v3666_v37 = vsel %vm587_vm4, %v3620_v1, 0.0 }
 0x257   : > { %v6209_v19 = vpop.f32.mrb[22].mxu0  ;;  %3520 = vst.msk [vmem:[%s5077_s21 + $0xa8] sm:$0xff] %vm587_vm4, %v6211_v7  ;;  %v3560_v46 = vadd.f32 %v3559_v8, %v3558_v23  ;;  %v3663_v20 = vadd.f32 %v3662_v60, %v3661_v54  ;;  %v3739_v43 = vadd.f32 %v3738_v52, %v3737_v14  ;;  %v3844_v58 = vsel %vm587_vm4, %v3797_v40, 0.0 }
 0x258   : > { %v6221_v36 = vpop.f32.mrb[23].mxu0  ;;  %v4736_v47 = vadd.f32 %v6142_v53, %v5970_v38  ;;  %v3799_v34 = vmul.f32 %v6126_v9, %v6126_v9  ;;  %v3843_v63 = vadd.f32 %v3842_v62, %v3841_v4  ;;  %v3744_v49 = vsel %vm587_vm4, %v6126_v9, 0.0 }
 0x259   : > { %v3665_v22 = vadd.f32 %v3664_v29, %v3663_v20  ;;  %v3562_v8 = vadd.f32 %v3561_v0, %v3560_v46  ;;  %v3741_v35 = vadd.f32 %v3740_v32, %v3739_v43  ;;  %v3623_v27 = vmul.f32 %v4735_v51, %v4735_v51 }
 0x25a   : > { %3219 = vst.msk [vmem:[%s5067_s15 + $0x80] sm:$0xff] %vm587_vm4, %v4736_v47  ;;  %v3563_v28 = vsel %vm587_vm4, %v4736_v47, 0.0  ;;  %v3621_v24 = vmul.f32 %v4736_v47, %v4736_v47  ;;  %v3845_v38 = vadd.f32 %v3844_v58, %v3843_v63  ;;  %v4737_v52 = vadd.f32 %v6151_v10, %v5972_v56 }
 0x25b   : > { %v6238_v30 = vpop.f32.mrb[56].mxu1  ;;  %v3564_v53 = vadd.f32 %v3563_v28, %v3562_v8  ;;  %v3667_v59 = vadd.f32 %v3666_v37, %v3665_v22  ;;  %v3742_v18 = vsel %vm587_vm4, %v6153_v11, 0.0  ;;  %v3798_v1 = vmul.f32 %v6153_v11, %v6153_v11 }
 0x25c   : > { %3525 = vst.msk [vmem:[%s5077_s21 + $0xd0] sm:$0xff] %vm587_vm4, %v6238_v30  ;;  %v6245_v9 = vpop.f32.mrb[57].mxu1  ;;  %v3668_v54 = vsel %vm587_vm4, %v3621_v24, 0.0  ;;  %v3848_v13 = vsel %vm587_vm4, %v3799_v34, 0.0  ;;  %v3743_v56 = vadd.f32 %v3742_v18, %v3741_v35  ;;  %v4738_v10 = vadd.f32 %v6161_v17, %v5974_v44  ;;  %3222 = vst.msk [vmem:[%s5067_s15 + $0x98] sm:$0xff] %vm587_vm4, %v4737_v52 }
 0x25d   : > { %v6243_v29 = vpop.f32.mrb[24].mxu0  ;;  %3523 = vst.msk [vmem:[%s5077_s21 + $0xc0] sm:$0xff] %vm587_vm4, %v6245_v9  ;;  %v6259_v39 = vpop.f32.mrb[58].mxu1  ;;  %v3669_v14 = vadd.f32 %v3668_v54, %v3667_v59  ;;  %v3567_v23 = vsel %vm587_vm4, %v4735_v51, 0.0  ;;  %v3746_v62 = vsel %vm587_vm4, %v6144_v26, 0.0  ;;  %v3800_v0 = vmul.f32 %v6144_v26, %v6144_v26 }
 0x25e   : > { %v6257_v33 = vpop.f32.mrb[25].mxu0  ;;  %3526 = vst.msk [vmem:[%s5077_s21 + $0xd8] sm:$0xff] %vm587_vm4, %v6259_v39  ;;  %v6269_v15 = vpop.f32.mrb[59].mxu1  ;;  %v3846_v60 = vsel %vm587_vm4, %v3798_v1, 0.0  ;;  %v3745_v17 = vadd.f32 %v3744_v49, %v3743_v56  ;;  %3220 = vst.msk [vmem:[%s5067_s15 + $0x88] sm:$0xff] %vm587_vm4, %v4738_v10  ;;  %v3565_v51 = vsel %vm587_vm4, %v4738_v10, 0.0  ;;  %v3622_v4 = vmul.f32 %v4738_v10, %v4738_v10 }
 0x25f   : > { %v6267_v11 = vpop.f32.mrb[26].mxu0  ;;  %3524 = vst.msk [vmem:[%s5077_s21 + $0xc8] sm:$0xff] %vm587_vm4, %v6269_v15  ;;  %v3847_v40 = vadd.f32 %v3846_v60, %v3845_v38  ;;  %v3672_v46 = vsel %vm587_vm4, %v3623_v27, 0.0  ;;  %v3624_v26 = vmul.f32 %v4737_v52, %v4737_v52  ;;  %v3566_v20 = vadd.f32 %v3565_v51, %v3564_v53 }
 0x260   : > { %v6282_v44 = vpop.f32.mrb[27].mxu0  ;;  %v4739_v32 = vadd.f32 %v6190_v31, %v5976_v45  ;;  %v3670_v43 = vsel %vm587_vm4, %v3622_v4, 0.0  ;;  %v3747_v58 = vadd.f32 %v3746_v62, %v3745_v17  ;;  %v3748_v47 = vsel %vm587_vm4, %v6192_v57, 0.0 }
 0x261   : > { %v3849_v37 = vadd.f32 %v3848_v13, %v3847_v40  ;;  %v3850_v22 = vsel %vm587_vm4, %v3800_v0, 0.0  ;;  %v3569_v34 = vsel %vm587_vm4, %v4737_v52, 0.0  ;;  %v3568_v63 = vadd.f32 %v3567_v23, %v3566_v20 }
 0x262   : > { %v3671_v8 = vadd.f32 %v3670_v43, %v3669_v14  ;;  %3225 = vst.msk [vmem:[%s5067_s15 + $0xb0] sm:$0xff] %vm587_vm4, %v4739_v32  ;;  %v3803_v45 = vmul.f32 %v6182_v48, %v6182_v48  ;;  %v3749_v31 = vadd.f32 %v3748_v47, %v3747_v58  ;;  %v3801_v35 = vmul.f32 %v6192_v57, %v6192_v57 }
 0x263   : > { %v6297_v49 = vpop.f32.mrb[60].mxu1  ;;  %v3851_v28 = vadd.f32 %v3850_v22, %v3849_v37  ;;  %v4740_v53 = vadd.f32 %v6201_v55, %v5978_v16  ;;  %v3570_v59 = vadd.f32 %v3569_v34, %v3568_v63  ;;  %v3674_v52 = vsel %vm587_vm4, %v3624_v26, 0.0 }
 0x264   : > { %3529 = vst.msk [vmem:[%s5077_s21 + $0xf0] sm:$0xff] %vm587_vm4, %v6297_v49  ;;  %v6308_v27 = vpop.f32.mrb[61].mxu1  ;;  %v3673_v38 = vadd.f32 %v3672_v46, %v3671_v8  ;;  %v3627_v18 = vmul.f32 %v4739_v32, %v4739_v32  ;;  %v3852_v1 = vsel %vm587_vm4, %v3801_v35, 0.0  ;;  %v4741_v13 = vadd.f32 %v6209_v19, %v5980_v42 }
 0x265   : > { %v6306_v24 = vpop.f32.mrb[28].mxu0  ;;  %3527 = vst.msk [vmem:[%s5077_s21 + $0xe0] sm:$0xff] %vm587_vm4, %v6308_v27  ;;  %v6317_v57 = vpop.f32.mrb[62].mxu1  ;;  %v3853_v14 = vadd.f32 %v3852_v1, %v3851_v28  ;;  %3223 = vst.msk [vmem:[%s5067_s15 + $0xa0] sm:$0xff] %vm587_vm4, %v4740_v53  ;;  %v3571_v56 = vsel %vm587_vm4, %v4740_v53, 0.0  ;;  %v3625_v10 = vmul.f32 %v4740_v53, %v4740_v53  ;;  %v3752_v42 = vsel %vm587_vm4, %v6182_v48, 0.0 }
 0x266   : > { %v6315_v54 = vpop.f32.mrb[29].mxu0  ;;  %3530 = vst.msk [vmem:[%s5077_s21 + $0xf8] sm:$0xff] %vm587_vm4, %v6317_v57  ;;  %v6328_v55 = vpop.f32.mrb[63].mxu1  ;;  %v3675_v23 = vadd.f32 %v3674_v52, %v3673_v38  ;;  %v3856_v19 = vsel %vm587_vm4, %v3803_v45, 0.0  ;;  %v3572_v0 = vadd.f32 %v3571_v56, %v3570_v59  ;;  %v3804_v60 = vmul.f32 %v6203_v25, %v6203_v25  ;;  %3226 = vst.msk [vmem:[%s5067_s15 + $0xb8] sm:$0xff] %vm587_vm4, %v4741_v13 }
 0x267   : > { %v6326_v16 = vpop.f32.mrb[30].mxu0  ;;  %3528 = vst.msk [vmem:[%s5077_s21 + $0xe8] sm:$0xff] %vm587_vm4, %v6328_v55  ;;  %v3676_v17 = vsel %vm587_vm4, %v3625_v10, 0.0  ;;  %v3750_v40 = vsel %vm587_vm4, %v6211_v7, 0.0  ;;  %v3802_v51 = vmul.f32 %v6211_v7, %v6211_v7  ;;  %v4742_v4 = vadd.f32 %v6221_v36, %v5982_v50 }
 0x268   : > { %v6336_v62 = vpop.f32.mrb[31].mxu0  ;;  %v3575_v48 = vsel %vm587_vm4, %v4739_v32, 0.0  ;;  %v3677_v46 = vadd.f32 %v3676_v17, %v3675_v23  ;;  %v3754_v26 = vsel %vm587_vm4, %v6203_v25, 0.0  ;;  %v3751_v20 = vadd.f32 %v3750_v40, %v3749_v31 }
 0x269   : > { %v3680_v37 = vsel %vm587_vm4, %v3627_v18, 0.0  ;;  %v3854_v43 = vsel %vm587_vm4, %v3802_v51, 0.0  ;;  %3224 = vst.msk [vmem:[%s5067_s15 + $0xa8] sm:$0xff] %vm587_vm4, %v4742_v4  ;;  %v3573_v58 = vsel %vm587_vm4, %v4742_v4, 0.0  ;;  %v3626_v7 = vmul.f32 %v4742_v4, %v4742_v4 }
 0x26a   : > { %v3753_v47 = vadd.f32 %v3752_v42, %v3751_v20  ;;  %v3855_v22 = vadd.f32 %v3854_v43, %v3853_v14  ;;  %v3574_v50 = vadd.f32 %v3573_v58, %v3572_v0  ;;  %v4743_v36 = vadd.f32 %v6243_v29, %v5984_v5 }
 0x26b   : > { %v3858_v32 = vsel %vm587_vm4, %v3804_v60, 0.0  ;;  %v3628_v25 = vmul.f32 %v4741_v13, %v4741_v13  ;;  %v3678_v34 = vsel %vm587_vm4, %v3626_v7, 0.0  ;;  %v3805_v63 = vmul.f32 %v6245_v9, %v6245_v9 }
 0x26c   : > { %v3857_v8 = vadd.f32 %v3856_v19, %v3855_v22  ;;  %v3576_v45 = vadd.f32 %v3575_v48, %v3574_v50  ;;  %v3679_v31 = vadd.f32 %v3678_v34, %v3677_v46  ;;  %3229 = vst.msk [vmem:[%s5067_s15 + $0xd0] sm:$0xff] %vm587_vm4, %v4743_v36  ;;  %v3756_v35 = vsel %vm587_vm4, %v6245_v9, 0.0 }
 0x26d   : > { %v3577_v28 = vsel %vm587_vm4, %v4741_v13, 0.0  ;;  %v3755_v5 = vadd.f32 %v3754_v26, %v3753_v47  ;;  %v3860_v29 = vsel %vm587_vm4, %v3805_v63, 0.0  ;;  %v4744_v38 = vadd.f32 %v6257_v33, %v5986_v21 }
 0x26e   : > { %v3681_v53 = vadd.f32 %v3680_v37, %v3679_v31  ;;  %v3807_v59 = vmul.f32 %v6238_v30, %v6238_v30  ;;  %v3859_v52 = vadd.f32 %v3858_v32, %v3857_v8  ;;  %v3578_v18 = vadd.f32 %v3577_v28, %v3576_v45 }
 0x26f   : > { %v3682_v1 = vsel %vm587_vm4, %v3628_v25, 0.0  ;;  %v3757_v14 = vadd.f32 %v3756_v35, %v3755_v5  ;;  %3227 = vst.msk [vmem:[%s5067_s15 + $0xc0] sm:$0xff] %vm587_vm4, %v4744_v38  ;;  %v3579_v9 = vsel %vm587_vm4, %v4744_v38, 0.0  ;;  %v3629_v13 = vmul.f32 %v4744_v38, %v4744_v38 }
 0x270   : > { %v3760_v56 = vsel %vm587_vm4, %v6238_v30, 0.0  ;;  %v3861_v10 = vadd.f32 %v3860_v29, %v3859_v52  ;;  %v3580_v21 = vadd.f32 %v3579_v9, %v3578_v18  ;;  %v3683_v33 = vadd.f32 %v3682_v1, %v3681_v53 }
 0x271   : > { %v3684_v23 = vsel %vm587_vm4, %v3629_v13, 0.0  ;;  %v4745_v42 = vadd.f32 %v6267_v11, %v5988_v2  ;;  %v3758_v19 = vsel %vm587_vm4, %v6269_v15, 0.0  ;;  %v3806_v0 = vmul.f32 %v6269_v15, %v6269_v15 }
 0x272   : > { %v3864_v60 = vsel %vm587_vm4, %v3807_v59, 0.0  ;;  %v3685_v17 = vadd.f32 %v3684_v23, %v3683_v33  ;;  %v3759_v40 = vadd.f32 %v3758_v19, %v3757_v14  ;;  %v4746_v30 = vadd.f32 %v6282_v44, %v5990_v3 }
 0x273   : > { %v3583_v51 = vsel %vm587_vm4, %v4743_v36, 0.0  ;;  %v3631_v4 = vmul.f32 %v4743_v36, %v4743_v36  ;;  %v3808_v48 = vmul.f32 %v6259_v39, %v6259_v39  ;;  %3230 = vst.msk [vmem:[%s5067_s15 + $0xd8] sm:$0xff] %vm587_vm4, %v4745_v42  ;;  %v3862_v2 = vsel %vm587_vm4, %v3806_v0, 0.0 }
 0x274   : > { %v3761_v11 = vadd.f32 %v3760_v56, %v3759_v40  ;;  %v3863_v46 = vadd.f32 %v3862_v2, %v3861_v10  ;;  %3228 = vst.msk [vmem:[%s5067_s15 + $0xc8] sm:$0xff] %vm587_vm4, %v4746_v30  ;;  %v3581_v15 = vsel %vm587_vm4, %v4746_v30, 0.0  ;;  %v3630_v26 = vmul.f32 %v4746_v30, %v4746_v30 }
 0x275   : > { %v3762_v3 = vsel %vm587_vm4, %v6259_v39, 0.0  ;;  %v3632_v44 = vmul.f32 %v4745_v42, %v4745_v42  ;;  %v3582_v20 = vadd.f32 %v3581_v15, %v3580_v21  ;;  %v4747_v37 = vadd.f32 %v6306_v24, %v5992_v6 }
 0x276   : > { %v3865_v43 = vadd.f32 %v3864_v60, %v3863_v46  ;;  %v3686_v58 = vsel %vm587_vm4, %v3630_v26, 0.0  ;;  %v3763_v7 = vadd.f32 %v3762_v3, %v3761_v11  ;;  %v3764_v47 = vsel %vm587_vm4, %v6308_v27, 0.0 }
 0x277   : > { %v3688_v22 = vsel %vm587_vm4, %v3631_v4, 0.0  ;;  %v3866_v50 = vsel %vm587_vm4, %v3808_v48, 0.0  ;;  %v3584_v36 = vadd.f32 %v3583_v51, %v3582_v20  ;;  %v3687_v32 = vadd.f32 %v3686_v58, %v3685_v17  ;;  %3233 = vst.msk [vmem:[%s5067_s15 + $0xf0] sm:$0xff] %vm587_vm4, %v4747_v37 }
 0x278   : > { %v3585_v39 = vsel %vm587_vm4, %v4745_v42, 0.0  ;;  %v3765_v25 = vadd.f32 %v3764_v47, %v3763_v7  ;;  %v3809_v6 = vmul.f32 %v6308_v27, %v6308_v27  ;;  %v3867_v24 = vadd.f32 %v3866_v50, %v3865_v43 }
 0x279   : > { %v3689_v34 = vadd.f32 %v3688_v22, %v3687_v32  ;;  %v4748_v63 = vadd.f32 %v6315_v54, %v5994_v61  ;;  %v3586_v8 = vadd.f32 %v3585_v39, %v3584_v36  ;;  %v3690_v45 = vsel %vm587_vm4, %v3632_v44, 0.0  ;;  %v3708_v39 = vld [vmem:[%s6487_s8 + $0x2] sm:$0x1] }
 0x27a   : > { %v3868_v31 = vsel %vm587_vm4, %v3809_v6, 0.0  ;;  %v4749_v35 = vadd.f32 %v6326_v16, %v5996_v12  ;;  %v3811_v38 = vmul.f32 %v6297_v49, %v6297_v49  ;;  %v3766_v53 = vsel %vm587_vm4, %v6328_v55, 0.0 }
 0x27b   : > { %v3869_v28 = vadd.f32 %v3868_v31, %v3867_v24  ;;  %3231 = vst.msk [vmem:[%s5067_s15 + $0xe0] sm:$0xff] %vm587_vm4, %v4748_v63  ;;  %v3587_v5 = vsel %vm587_vm4, %v4748_v63, 0.0  ;;  %v3633_v27 = vmul.f32 %v4748_v63, %v4748_v63  ;;  %v3691_v29 = vadd.f32 %v3690_v45, %v3689_v34  ;;  %v3780_v63 = vld [vmem:[%s6487_s8 + $0x3] sm:$0x1] }
 0x27c   : > { %v3588_v61 = vadd.f32 %v3587_v5, %v3586_v8  ;;  %3234 = vst.msk [vmem:[%s5067_s15 + $0xf8] sm:$0xff] %vm587_vm4, %v4749_v35  ;;  %v3810_v12 = vmul.f32 %v6328_v55, %v6328_v55  ;;  %v4750_v16 = vadd.f32 %v6336_v62, %v5998_v41  ;;  %v3768_v59 = vsel %vm587_vm4, %v6297_v49, 0.0  ;;  %v3531_v8 = vld [vmem:[%s6487_s8] sm:$0x1]  ;;  %v3604_v5 = vld [vmem:[%s6487_s8 + $0x1] sm:$0x1] }
 0x27d   : > { %v3692_v54 = vsel %vm587_vm4, %v3633_v27, 0.0  ;;  %v3635_v52 = vmul.f32 %v4747_v37, %v4747_v37  ;;  %v3767_v1 = vadd.f32 %v3766_v53, %v3765_v25  ;;  %v3812_v14 = vmul.f32 %v6317_v57, %v6317_v57 }
 0x27e   : > { %v3693_v18 = vadd.f32 %v3692_v54, %v3691_v29  ;;  %v3870_v9 = vsel %vm587_vm4, %v3810_v12, 0.0  ;;  %3232 = vst.msk [vmem:[%s5067_s15 + $0xe8] sm:$0xff] %vm587_vm4, %v4750_v16  ;;  %v3589_v13 = vsel %vm587_vm4, %v4750_v16, 0.0  ;;  %v3634_v56 = vmul.f32 %v4750_v16, %v4750_v16 }
 0x27f   : > { %v3872_v55 = vsel %vm587_vm4, %v3811_v38, 0.0  ;;  %v3769_v10 = vadd.f32 %v3768_v59, %v3767_v1  ;;  %v3871_v41 = vadd.f32 %v3870_v9, %v3869_v28  ;;  %v3590_v62 = vadd.f32 %v3589_v13, %v3588_v61 }
 0x280   : > { %v3591_v49 = vsel %vm587_vm4, %v4747_v37, 0.0  ;;  %v3770_v21 = vsel %vm587_vm4, %v6317_v57, 0.0  ;;  %v3636_v33 = vmul.f32 %v4749_v35, %v4749_v35  ;;  %v3694_v23 = vsel %vm587_vm4, %v3634_v56, 0.0 }
 0x281   : > { %v3771_v42 = vadd.f32 %v3770_v21, %v3769_v10  ;;  %v3873_v19 = vadd.f32 %v3872_v55, %v3871_v41  ;;  %v3592_v0 = vadd.f32 %v3591_v49, %v3590_v62  ;;  %v3695_v60 = vadd.f32 %v3694_v23, %v3693_v18 }
 0x282   : > { %v3696_v17 = vsel %vm587_vm4, %v3635_v52, 0.0  ;;  %v3874_v40 = vsel %vm587_vm4, %v3812_v14, 0.0  ;;  %v3593_v30 = vsel %vm587_vm4, %v4749_v35, 0.0  ;;  %v3698_v11 = vsel %vm587_vm4, %v3636_v33, 0.0 }
 0x283   : > { %v3772_v51 = vrot.slane %v3771_v42, 4  ;;  %v3875_v4 = vadd.f32 %v3874_v40, %v3873_v19  ;;  %v3594_v48 = vadd.f32 %v3593_v30, %v3592_v0  ;;  %v3697_v2 = vadd.f32 %v3696_v17, %v3695_v60 }
 0x285   : > { %v3773_v57 = vadd.f32 %v3772_v51, %v3771_v42  ;;  %v3876_v46 = vrot.slane %v3875_v4, 4  ;;  %v3595_v15 = vrot.slane %v3594_v48, 4  ;;  %v3699_v26 = vadd.f32 %v3698_v11, %v3697_v2 }
 0x287   : > { %v3774_v3 = vrot.slane %v3773_v57, 2  ;;  %v3877_v44 = vadd.f32 %v3876_v46, %v3875_v4  ;;  %v3596_v20 = vadd.f32 %v3595_v15, %v3594_v48  ;;  %v3700_v37 = vrot.slane %v3699_v26, 4 }
 0x289   : > { %v3775_v43 = vadd.f32 %v3774_v3, %v3773_v57  ;;  %v3878_v58 = vrot.slane %v3877_v44, 2  ;;  %v3597_v7 = vrot.slane %v3596_v20, 2  ;;  %v3701_v47 = vadd.f32 %v3700_v37, %v3699_v26 }
 0x28b   : > { %v3776_v22 = vrot.slane %v3775_v43, 1  ;;  %v3879_v50 = vadd.f32 %v3878_v58, %v3877_v44  ;;  %v3598_v36 = vadd.f32 %v3597_v7, %v3596_v20  ;;  %v3702_v32 = vrot.slane %v3701_v47, 2 }
 0x28d   : > { %v3777_v25 = vadd.f32 %v3776_v22, %v3775_v43  ;;  %v3880_v6 = vrot.slane %v3879_v50, 1  ;;  %v3599_v24 = vrot.slane %v3598_v36, 1  ;;  %v3703_v34 = vadd.f32 %v3702_v32, %v3701_v47 }
 0x28f   : > { %v3778_v45 = vadd.f32 %v3777_v25, %v3708_v39  ;;  %v3881_v31 = vadd.f32 %v3880_v6, %v3879_v50  ;;  %v3600_v35 = vadd.f32 %v3599_v24, %v3598_v36  ;;  %v3704_v28 = vrot.slane %v3703_v34, 1 }
 0x291   : > { %3779 = vst.msk [vmem:[%s6487_s8 + $0x2] sm:$0x1] %vm3602_vm7, %v3778_v45  ;;  %v3882_v27 = vadd.f32 %v3881_v31, %v3780_v63  ;;  %v3601_v29 = vadd.f32 %v3600_v35, %v3531_v8  ;;  %v3705_v38 = vadd.f32 %v3704_v28, %v3703_v34 }
 0x293   : > { %3883 = vst.msk [vmem:[%s6487_s8 + $0x3] sm:$0x1] %vm3602_vm7, %v3882_v27  ;;  %3603 = vst.msk [vmem:[%s6487_s8] sm:$0x1] %vm3602_vm7, %v3601_v29  ;;  %v3706_v61 = vadd.f32 %v3705_v38, %v3604_v5 }
 0x295   : > { %3707 = vst.msk [vmem:[%s6487_s8 + $0x1] sm:$0x1] %vm3602_vm7, %v3706_v61 }
 0x296 PF: > { %s19_s27 = sadd.s32 1, %s5003_s27  }
 0x297   : > { %p16_p5 = scmp.ge.s32.totalorder %s19_s27, 4  }
 0x299   :  { %18 = sbr.rel (!%p16_p5) target bundleno = 1 (0x1), region = 112 }

</bundles_post_ra>
